<compile_context>
chip_gen: v7x
topology: tpu7x:2x2x1
jax: 0.10.0
libtpu: 0.0.40
codegen_flags: <defaults>
</compile_context>

<pallas_src>
import jax
import jax.numpy as jnp
from jax.experimental import pallas as pl
from jax.experimental.pallas import tpu as pltpu

LEAKY_SLOPE = 0.2
EPS = 1e-5

# Architecture geometry (im_chan=1, hidden_dim=16, k=4, s=2, 28x28 input).
H_IN = 28          # input spatial size
K = 4              # conv kernel size
S = 2              # conv stride
C1 = 16            # conv1 output channels
C2 = 32            # conv2 output channels
OH1 = 13           # conv1 output spatial size
OH2 = 5            # conv2 output spatial size
SLAB1 = K * H_IN           # 112  columns of the conv1 row operator input
ROW1 = OH1 * C1            # 208  one conv1 output row, (w, c) order
STEP1 = S * H_IN           # 56   flat-input offset between conv1 output rows
SLAB2 = K * OH1 * C1       # 832  columns of the conv2 row operator input
ROW2 = OH2 * C2            # 160  one conv2 output row, (w, c) order
STEP2 = S * OH1 * C1       # 416  flat-y1 offset between conv2 output rows
FLAT = OH2 * ROW2          # 800  flattened embedding-net feature size


def _leaky(x):
    return jnp.where(x > 0, x, LEAKY_SLOPE * x)


def _round_up(x, m):
    return (x + m - 1) // m * m


# ---------------------------------------------------------------------------
# The single fused Pallas kernel
# ---------------------------------------------------------------------------
def fused_forward_kernel(x_ref, w1_ref, s1_ref, w2_ref, s2_ref,
                         wf1_ref, bf1_ref, wf2_ref, bf2_ref, wf3_ref, bf3_ref,
                         o_ref):
    """Whole ClassificationNet forward for one batch tile (all 2-D matmuls)."""
    # conv1 + folded BN + LeakyReLU: output row r reads the 4x28 input slab
    # starting at input row 2r (flat offset 56*r).
    rows1 = []
    for r in range(OH1):
        xs = x_ref[:, STEP1 * r: STEP1 * r + SLAB1]                  # (BT, 112) bf16
        acc = jnp.dot(xs, w1_ref[...], preferred_element_type=jnp.float32)
        rows1.append(_leaky(acc + s1_ref[...]).astype(jnp.bfloat16))  # (BT, 208)

    # conv2 + folded BN + LeakyReLU: output row r reads conv1 rows 2r .. 2r+3.
    rows2 = []
    for r in range(OH2):
        ys = jnp.concatenate(rows1[2 * r: 2 * r + K // S * 2], axis=-1)  # (BT, 832)
        acc = jnp.dot(ys, w2_ref[...], preferred_element_type=jnp.float32)
        rows2.append(_leaky(acc + s2_ref[...]).astype(jnp.bfloat16))     # (BT, 160)

    # Flatten (kernel-native (h, w, c) order; fc1 rows were pre-permuted).
    flat = jnp.concatenate(rows2, axis=-1)                           # (BT, 800)

    # MLP head: Linear(800,32)+LReLU -> Linear(32,32)+LReLU -> folded
    # Linear(32,2)@Linear(2,10).
    h = jnp.dot(flat, wf1_ref[...], preferred_element_type=jnp.float32) + bf1_ref[...]
    h = _leaky(h).astype(jnp.bfloat16)
    h = jnp.dot(h, wf2_ref[...], preferred_element_type=jnp.float32) + bf2_ref[...]
    h = _leaky(h).astype(jnp.bfloat16)
    o_ref[...] = (jnp.dot(h, wf3_ref[...], preferred_element_type=jnp.float32)
                  + bf3_ref[...])


# ---------------------------------------------------------------------------
# One-time parameter folding (plain JAX): BN fold, conv->row-operator lowering,
# flatten permutation, fc3 @ classifier fold, bf16 casts.
# ---------------------------------------------------------------------------
def fold_params(params):
    f32, bf16 = jnp.float32, jnp.bfloat16

    scale1 = params["bn1_gamma"] / jnp.sqrt(params["bn1_var"] + EPS)
    shift1 = params["bn1_beta"] + (params["b_conv1"] - params["bn1_mean"]) * scale1
    scale2 = params["bn2_gamma"] / jnp.sqrt(params["bn2_var"] + EPS)
    shift2 = params["bn2_beta"] + (params["b_conv2"] - params["bn2_mean"]) * scale2

    w1s = params["w_conv1"].astype(f32) * scale1           # (4, 4, 1, 16)
    w2s = params["w_conv2"].astype(f32) * scale2           # (4, 4, 16, 32)

    # conv1 row operator (112, 208): W1[dr*28 + w, ow*16 + c] = w1s[dr, w-2*ow, 0, c]
    W1 = jnp.zeros((K, H_IN, OH1, C1), f32)
    ow1 = jnp.arange(OH1)
    for j in range(K):
        W1 = W1.at[:, S * ow1 + j, ow1, :].set(w1s[:, j, 0, :][:, None, :])
    W1 = W1.reshape(SLAB1, ROW1)

    # conv2 row operator (832, 160):
    # W2[(i*13 + ow1)*16 + c1, ow2*32 + c2] = w2s[i, ow1-2*ow2, c1, c2]
    W2t = jnp.zeros((K, C1, OH1, OH2, C2), f32)            # (i, c1, ow1, ow2, c2)
    ow2 = jnp.arange(OH2)
    for j in range(K):
        W2t = W2t.at[:, :, S * ow2 + j, ow2, :].set(w2s[:, j, :, :][:, :, None, :])
    W2 = jnp.transpose(W2t, (0, 2, 1, 3, 4)).reshape(SLAB2, ROW2)

    # fc1: permute rows from torch NCHW-flatten order (c,h,w) to kernel (h,w,c).
    wf1 = (params["w_fc1"].reshape(C2, OH2, OH2, C2)
           .transpose(1, 2, 0, 3).reshape(FLAT, C2))

    # fc3 (32->2) folded with classifier (2->10): no activation between them.
    wf3c = params["w_fc3"] @ params["w_cls"]                        # (32, 10)
    bf3c = params["b_fc3"] @ params["w_cls"] + params["b_cls"]      # (10,)

    return dict(
        w1=W1.astype(bf16),
        s1=jnp.tile(shift1, OH1).reshape(1, ROW1).astype(f32),
        w2=W2.astype(bf16),
        s2=jnp.tile(shift2, OH2).reshape(1, ROW2).astype(f32),
        wf1=wf1.astype(bf16),
        bf1=params["b_fc1"].reshape(1, -1).astype(f32),
        wf2=params["w_fc2"].astype(bf16),
        bf2=params["b_fc2"].reshape(1, -1).astype(f32),
        wf3=wf3c.astype(bf16),
        bf3=bf3c.reshape(1, -1).astype(f32),
    )


# ---------------------------------------------------------------------------
# pallas_call wrapper: grid over batch tiles; all weights VMEM-resident.
# ---------------------------------------------------------------------------
def fused_forward(kp, x_nchw):
    B = x_nchw.shape[0]
    classes = kp["bf3"].shape[1]
    x = x_nchw.reshape(B, H_IN * H_IN).astype(jnp.bfloat16)   # C=1: NCHW==NHWC flatten

    bt = min(128, _round_up(max(B, 1), 8))        # batch tile (sublane-aligned)
    b_pad = _round_up(B, bt)
    if b_pad != B:
        x = jnp.pad(x, ((0, b_pad - B), (0, 0)))

    weights = (kp["w1"], kp["s1"], kp["w2"], kp["s2"], kp["wf1"], kp["bf1"],
               kp["wf2"], kp["bf2"], kp["wf3"], kp["bf3"])

    def _resident(a):
        # Whole array, same block index every grid step -> fetched once, stays
        # resident in VMEM across the whole grid.
        return pl.BlockSpec(a.shape, lambda i, _nd=a.ndim: (0,) * _nd)

    out = pl.pallas_call(
        fused_forward_kernel,
        out_shape=jax.ShapeDtypeStruct((b_pad, classes), jnp.float32),
        grid=(b_pad // bt,),
        in_specs=[pl.BlockSpec((bt, H_IN * H_IN), lambda i: (i, 0))]
                 + [_resident(w) for w in weights],
        out_specs=pl.BlockSpec((bt, classes), lambda i: (i, 0)),
        compiler_params=pltpu.CompilerParams(
            dimension_semantics=("parallel",)),
    )(x, *weights)
    return out[:B]


def classification_net_forward(params, x_nchw):
    return fused_forward(fold_params(params), x_nchw)


# ---------------------------------------------------------------------------
# Plain-JAX reference (mirrors the PyTorch module in eval mode)
# ---------------------------------------------------------------------------
def reference_forward(params, x_nchw):
    x = x_nchw.astype(jnp.float32)

    def conv_bn_lrelu(x, w_hwio, b, gamma, beta, mean, var):
        w_oihw = jnp.transpose(w_hwio, (3, 2, 0, 1))
        y = jax.lax.conv_general_dilated(
            x, w_oihw, window_strides=(S, S), padding="VALID",
            dimension_numbers=("NCHW", "OIHW", "NCHW"))
        y = y + b[None, :, None, None]
        y = (y - mean[None, :, None, None]) / jnp.sqrt(var + EPS)[None, :, None, None]
        y = y * gamma[None, :, None, None] + beta[None, :, None, None]
        return jnp.where(y > 0, y, LEAKY_SLOPE * y)

    y = conv_bn_lrelu(x, params["w_conv1"], params["b_conv1"], params["bn1_gamma"],
                      params["bn1_beta"], params["bn1_mean"], params["bn1_var"])
    y = conv_bn_lrelu(y, params["w_conv2"], params["b_conv2"], params["bn2_gamma"],
                      params["bn2_beta"], params["bn2_mean"], params["bn2_var"])
    flat = y.reshape(y.shape[0], -1)                     # torch.nn.Flatten (NCHW)
    h = flat @ params["w_fc1"] + params["b_fc1"]
    h = jnp.where(h > 0, h, LEAKY_SLOPE * h)
    h = h @ params["w_fc2"] + params["b_fc2"]
    h = jnp.where(h > 0, h, LEAKY_SLOPE * h)
    e = h @ params["w_fc3"] + params["b_fc3"]
    return e @ params["w_cls"] + params["b_cls"]


# ---------------------------------------------------------------------------
# Deterministic parameter init (eval-mode BN stats included)
# ---------------------------------------------------------------------------
def init_params(key, im_chan=1, hidden_dim=16, projection_dim=2, classes=10, k=4):
    ks = jax.random.split(key, 20)
    u = lambda kk, shape, s: jax.random.uniform(kk, shape, jnp.float32, -s, s)
    n = lambda kk, shape, s: s * jax.random.normal(kk, shape, jnp.float32)
    c2 = hidden_dim * 2
    flat_dim = (k + 1) ** 2 * c2  # 800, matches EmbeddingNet._get_flattened_shape
    return {
        # conv weights stored as (KH, KW, Cin, Cout)
        "w_conv1": u(ks[0], (k, k, im_chan, hidden_dim), 0.2),
        "b_conv1": u(ks[1], (hidden_dim,), 0.1),
        "bn1_gamma": 1.0 + n(ks[2], (hidden_dim,), 0.1),
        "bn1_beta": n(ks[3], (hidden_dim,), 0.1),
        "bn1_mean": n(ks[4], (hidden_dim,), 0.1),
        "bn1_var": 1.0 + jax.random.uniform(ks[5], (hidden_dim,), jnp.float32, 0.0, 0.5),
        "w_conv2": u(ks[6], (k, k, hidden_dim, c2), 0.05),
        "b_conv2": u(ks[7], (c2,), 0.05),
        "bn2_gamma": 1.0 + n(ks[8], (c2,), 0.1),
        "bn2_beta": n(ks[9], (c2,), 0.1),
        "bn2_mean": n(ks[10], (c2,), 0.1),
        "bn2_var": 1.0 + jax.random.uniform(ks[11], (c2,), jnp.float32, 0.0, 0.5),
        # MLP / classifier linears stored as (in, out); fc1 rows in NCHW order
        "w_fc1": u(ks[12], (flat_dim, c2), 0.05),
        "b_fc1": u(ks[13], (c2,), 0.05),
        "w_fc2": u(ks[14], (c2, c2), 0.1),
        "b_fc2": u(ks[15], (c2,), 0.1),
        "w_fc3": u(ks[16], (c2, projection_dim), 0.1),
        "b_fc3": u(ks[17], (projection_dim,), 0.1),
        "w_cls": u(ks[18], (projection_dim, classes), 0.5),
        "b_cls": u(ks[19], (classes,), 0.1),
    }


if __name__ == "__main__":
    key = jax.random.PRNGKey(0)
    pkey, xkey = jax.random.split(key)

    params = init_params(pkey, im_chan=1, hidden_dim=16, projection_dim=2, classes=10)
    x = jax.random.normal(xkey, (2, 1, 28, 28), dtype=jnp.float32)  # NCHW, MNIST-style

    fwd = jax.jit(classification_net_forward)
    logits = fwd(params, x)
    jax.block_until_ready(logits)

    assert logits.shape == (2, 10), logits.shape
    assert logits.dtype == jnp.float32
    assert bool(jnp.all(jnp.isfinite(logits)))

    # Tolerance-based check against the plain-JAX reference (kernel uses bf16
    # matmul inputs with f32 accumulation).
    ref = reference_forward(params, x)
    max_diff = float(jnp.max(jnp.abs(logits - ref)))
    assert bool(jnp.allclose(logits, ref, rtol=2e-2, atol=2e-2)), max_diff

    print("KERNEL_OK")
</pallas_src>

<mosaic_0001>
module attributes {stable_mosaic.version = 11 : i64} {
  func.func @fused_forward_kernel(%arg0: i32, %arg1: memref<8x784xbf16, #tpu.memory_space<vmem>>, %arg2: memref<112x208xbf16, #tpu.memory_space<vmem>>, %arg3: memref<1x208xf32, #tpu.memory_space<vmem>>, %arg4: memref<832x160xbf16, #tpu.memory_space<vmem>>, %arg5: memref<1x160xf32, #tpu.memory_space<vmem>>, %arg6: memref<800x32xbf16, #tpu.memory_space<vmem>>, %arg7: memref<1x32xf32, #tpu.memory_space<vmem>>, %arg8: memref<32x32xbf16, #tpu.memory_space<vmem>>, %arg9: memref<1x32xf32, #tpu.memory_space<vmem>>, %arg10: memref<32x10xbf16, #tpu.memory_space<vmem>>, %arg11: memref<1x10xf32, #tpu.memory_space<vmem>>, %arg12: memref<8x10xf32, #tpu.memory_space<vmem>>) attributes {dimension_semantics = [#tpu.dimension_semantics<parallel>], iteration_bounds = array<i64: 1>, scalar_prefetch = 0 : i64, scratch_operands = 0 : i64, tpu.core_type = #tpu.core_type<tc>, window_params = [{transform_indices = @transform_0, window_bounds = array<i64: 8, 784>}, {pipeline_mode = #tpu.pipeline_mode<synchronous>, transform_indices = @transform_1, window_bounds = array<i64: 112, 208>}, {pipeline_mode = #tpu.pipeline_mode<synchronous>, transform_indices = @transform_2, window_bounds = array<i64: 1, 208>}, {pipeline_mode = #tpu.pipeline_mode<synchronous>, transform_indices = @transform_3, window_bounds = array<i64: 832, 160>}, {pipeline_mode = #tpu.pipeline_mode<synchronous>, transform_indices = @transform_4, window_bounds = array<i64: 1, 160>}, {pipeline_mode = #tpu.pipeline_mode<synchronous>, transform_indices = @transform_5, window_bounds = array<i64: 800, 32>}, {pipeline_mode = #tpu.pipeline_mode<synchronous>, transform_indices = @transform_6, window_bounds = array<i64: 1, 32>}, {pipeline_mode = #tpu.pipeline_mode<synchronous>, transform_indices = @transform_7, window_bounds = array<i64: 32, 32>}, {pipeline_mode = #tpu.pipeline_mode<synchronous>, transform_indices = @transform_8, window_bounds = array<i64: 1, 32>}, {pipeline_mode = #tpu.pipeline_mode<synchronous>, transform_indices = @transform_9, window_bounds = array<i64: 32, 10>}, {pipeline_mode = #tpu.pipeline_mode<synchronous>, transform_indices = @transform_10, window_bounds = array<i64: 1, 10>}, {transform_indices = @transform_11, window_bounds = array<i64: 8, 10>}]} {
    %c0 = arith.constant 0 : index
    %c0_0 = arith.constant 0 : index
    %0 = vector.load %arg1[%c0, %c0_0] : memref<8x784xbf16, #tpu.memory_space<vmem>>, vector<8x112xbf16>
    %c0_1 = arith.constant 0 : index
    %c0_2 = arith.constant 0 : index
    %1 = vector.load %arg2[%c0_1, %c0_2] : memref<112x208xbf16, #tpu.memory_space<vmem>>, vector<112x208xbf16>
    %cst = arith.constant dense<0.000000e+00> : vector<8x208xf32>
    %2 = tpu.matmul %0, %1, %cst {dimension_numbers = #tpu.dot_dimension_numbers<[1], [0], [0], [1], [0, 0, 1, 1], [], []>} : vector<8x112xbf16>, vector<112x208xbf16>, vector<8x208xf32> -> vector<8x208xf32>
    %c0_3 = arith.constant 0 : index
    %c0_4 = arith.constant 0 : index
    %3 = vector.load %arg3[%c0_3, %c0_4] : memref<1x208xf32, #tpu.memory_space<vmem>>, vector<1x208xf32>
    %4 = vector.broadcast %3 : vector<1x208xf32> to vector<8x208xf32>
    %5 = arith.addf %2, %4 : vector<8x208xf32>
    %cst_5 = arith.constant 0.000000e+00 : f32
    %6 = vector.broadcast %cst_5 : f32 to vector<8x208xf32>
    %7 = arith.cmpf ogt, %5, %6 : vector<8x208xf32>
    %cst_6 = arith.constant 2.000000e-01 : f32
    %8 = vector.broadcast %cst_6 : f32 to vector<8x208xf32>
    %9 = arith.mulf %8, %5 : vector<8x208xf32>
    %10 = arith.select %7, %5, %9 : vector<8x208xi1>, vector<8x208xf32>
    %11 = arith.truncf %10 : vector<8x208xf32> to vector<8x208xbf16>
    %c0_7 = arith.constant 0 : index
    %c56 = arith.constant 56 : index
    %12 = vector.load %arg1[%c0_7, %c56] : memref<8x784xbf16, #tpu.memory_space<vmem>>, vector<8x112xbf16>
    %c0_8 = arith.constant 0 : index
    %c0_9 = arith.constant 0 : index
    %13 = vector.load %arg2[%c0_8, %c0_9] : memref<112x208xbf16, #tpu.memory_space<vmem>>, vector<112x208xbf16>
    %cst_10 = arith.constant dense<0.000000e+00> : vector<8x208xf32>
    %14 = tpu.matmul %12, %13, %cst_10 {dimension_numbers = #tpu.dot_dimension_numbers<[1], [0], [0], [1], [0, 0, 1, 1], [], []>} : vector<8x112xbf16>, vector<112x208xbf16>, vector<8x208xf32> -> vector<8x208xf32>
    %c0_11 = arith.constant 0 : index
    %c0_12 = arith.constant 0 : index
    %15 = vector.load %arg3[%c0_11, %c0_12] : memref<1x208xf32, #tpu.memory_space<vmem>>, vector<1x208xf32>
    %16 = vector.broadcast %15 : vector<1x208xf32> to vector<8x208xf32>
    %17 = arith.addf %14, %16 : vector<8x208xf32>
    %cst_13 = arith.constant 0.000000e+00 : f32
    %18 = vector.broadcast %cst_13 : f32 to vector<8x208xf32>
    %19 = arith.cmpf ogt, %17, %18 : vector<8x208xf32>
    %cst_14 = arith.constant 2.000000e-01 : f32
    %20 = vector.broadcast %cst_14 : f32 to vector<8x208xf32>
    %21 = arith.mulf %20, %17 : vector<8x208xf32>
    %22 = arith.select %19, %17, %21 : vector<8x208xi1>, vector<8x208xf32>
    %23 = arith.truncf %22 : vector<8x208xf32> to vector<8x208xbf16>
    %c0_15 = arith.constant 0 : index
    %c112 = arith.constant 112 : index
    %24 = vector.load %arg1[%c0_15, %c112] : memref<8x784xbf16, #tpu.memory_space<vmem>>, vector<8x112xbf16>
    %c0_16 = arith.constant 0 : index
    %c0_17 = arith.constant 0 : index
    %25 = vector.load %arg2[%c0_16, %c0_17] : memref<112x208xbf16, #tpu.memory_space<vmem>>, vector<112x208xbf16>
    %cst_18 = arith.constant dense<0.000000e+00> : vector<8x208xf32>
    %26 = tpu.matmul %24, %25, %cst_18 {dimension_numbers = #tpu.dot_dimension_numbers<[1], [0], [0], [1], [0, 0, 1, 1], [], []>} : vector<8x112xbf16>, vector<112x208xbf16>, vector<8x208xf32> -> vector<8x208xf32>
    %c0_19 = arith.constant 0 : index
    %c0_20 = arith.constant 0 : index
    %27 = vector.load %arg3[%c0_19, %c0_20] : memref<1x208xf32, #tpu.memory_space<vmem>>, vector<1x208xf32>
    %28 = vector.broadcast %27 : vector<1x208xf32> to vector<8x208xf32>
    %29 = arith.addf %26, %28 : vector<8x208xf32>
    %cst_21 = arith.constant 0.000000e+00 : f32
    %30 = vector.broadcast %cst_21 : f32 to vector<8x208xf32>
    %31 = arith.cmpf ogt, %29, %30 : vector<8x208xf32>
    %cst_22 = arith.constant 2.000000e-01 : f32
    %32 = vector.broadcast %cst_22 : f32 to vector<8x208xf32>
    %33 = arith.mulf %32, %29 : vector<8x208xf32>
    %34 = arith.select %31, %29, %33 : vector<8x208xi1>, vector<8x208xf32>
    %35 = arith.truncf %34 : vector<8x208xf32> to vector<8x208xbf16>
    %c0_23 = arith.constant 0 : index
    %c168 = arith.constant 168 : index
    %36 = vector.load %arg1[%c0_23, %c168] : memref<8x784xbf16, #tpu.memory_space<vmem>>, vector<8x112xbf16>
    %c0_24 = arith.constant 0 : index
    %c0_25 = arith.constant 0 : index
    %37 = vector.load %arg2[%c0_24, %c0_25] : memref<112x208xbf16, #tpu.memory_space<vmem>>, vector<112x208xbf16>
    %cst_26 = arith.constant dense<0.000000e+00> : vector<8x208xf32>
    %38 = tpu.matmul %36, %37, %cst_26 {dimension_numbers = #tpu.dot_dimension_numbers<[1], [0], [0], [1], [0, 0, 1, 1], [], []>} : vector<8x112xbf16>, vector<112x208xbf16>, vector<8x208xf32> -> vector<8x208xf32>
    %c0_27 = arith.constant 0 : index
    %c0_28 = arith.constant 0 : index
    %39 = vector.load %arg3[%c0_27, %c0_28] : memref<1x208xf32, #tpu.memory_space<vmem>>, vector<1x208xf32>
    %40 = vector.broadcast %39 : vector<1x208xf32> to vector<8x208xf32>
    %41 = arith.addf %38, %40 : vector<8x208xf32>
    %cst_29 = arith.constant 0.000000e+00 : f32
    %42 = vector.broadcast %cst_29 : f32 to vector<8x208xf32>
    %43 = arith.cmpf ogt, %41, %42 : vector<8x208xf32>
    %cst_30 = arith.constant 2.000000e-01 : f32
    %44 = vector.broadcast %cst_30 : f32 to vector<8x208xf32>
    %45 = arith.mulf %44, %41 : vector<8x208xf32>
    %46 = arith.select %43, %41, %45 : vector<8x208xi1>, vector<8x208xf32>
    %47 = arith.truncf %46 : vector<8x208xf32> to vector<8x208xbf16>
    %c0_31 = arith.constant 0 : index
    %c224 = arith.constant 224 : index
    %48 = vector.load %arg1[%c0_31, %c224] : memref<8x784xbf16, #tpu.memory_space<vmem>>, vector<8x112xbf16>
    %c0_32 = arith.constant 0 : index
    %c0_33 = arith.constant 0 : index
    %49 = vector.load %arg2[%c0_32, %c0_33] : memref<112x208xbf16, #tpu.memory_space<vmem>>, vector<112x208xbf16>
    %cst_34 = arith.constant dense<0.000000e+00> : vector<8x208xf32>
    %50 = tpu.matmul %48, %49, %cst_34 {dimension_numbers = #tpu.dot_dimension_numbers<[1], [0], [0], [1], [0, 0, 1, 1], [], []>} : vector<8x112xbf16>, vector<112x208xbf16>, vector<8x208xf32> -> vector<8x208xf32>
    %c0_35 = arith.constant 0 : index
    %c0_36 = arith.constant 0 : index
    %51 = vector.load %arg3[%c0_35, %c0_36] : memref<1x208xf32, #tpu.memory_space<vmem>>, vector<1x208xf32>
    %52 = vector.broadcast %51 : vector<1x208xf32> to vector<8x208xf32>
    %53 = arith.addf %50, %52 : vector<8x208xf32>
    %cst_37 = arith.constant 0.000000e+00 : f32
    %54 = vector.broadcast %cst_37 : f32 to vector<8x208xf32>
    %55 = arith.cmpf ogt, %53, %54 : vector<8x208xf32>
    %cst_38 = arith.constant 2.000000e-01 : f32
    %56 = vector.broadcast %cst_38 : f32 to vector<8x208xf32>
    %57 = arith.mulf %56, %53 : vector<8x208xf32>
    %58 = arith.select %55, %53, %57 : vector<8x208xi1>, vector<8x208xf32>
    %59 = arith.truncf %58 : vector<8x208xf32> to vector<8x208xbf16>
    %c0_39 = arith.constant 0 : index
    %c280 = arith.constant 280 : index
    %60 = vector.load %arg1[%c0_39, %c280] : memref<8x784xbf16, #tpu.memory_space<vmem>>, vector<8x112xbf16>
    %c0_40 = arith.constant 0 : index
    %c0_41 = arith.constant 0 : index
    %61 = vector.load %arg2[%c0_40, %c0_41] : memref<112x208xbf16, #tpu.memory_space<vmem>>, vector<112x208xbf16>
    %cst_42 = arith.constant dense<0.000000e+00> : vector<8x208xf32>
    %62 = tpu.matmul %60, %61, %cst_42 {dimension_numbers = #tpu.dot_dimension_numbers<[1], [0], [0], [1], [0, 0, 1, 1], [], []>} : vector<8x112xbf16>, vector<112x208xbf16>, vector<8x208xf32> -> vector<8x208xf32>
    %c0_43 = arith.constant 0 : index
    %c0_44 = arith.constant 0 : index
    %63 = vector.load %arg3[%c0_43, %c0_44] : memref<1x208xf32, #tpu.memory_space<vmem>>, vector<1x208xf32>
    %64 = vector.broadcast %63 : vector<1x208xf32> to vector<8x208xf32>
    %65 = arith.addf %62, %64 : vector<8x208xf32>
    %cst_45 = arith.constant 0.000000e+00 : f32
    %66 = vector.broadcast %cst_45 : f32 to vector<8x208xf32>
    %67 = arith.cmpf ogt, %65, %66 : vector<8x208xf32>
    %cst_46 = arith.constant 2.000000e-01 : f32
    %68 = vector.broadcast %cst_46 : f32 to vector<8x208xf32>
    %69 = arith.mulf %68, %65 : vector<8x208xf32>
    %70 = arith.select %67, %65, %69 : vector<8x208xi1>, vector<8x208xf32>
    %71 = arith.truncf %70 : vector<8x208xf32> to vector<8x208xbf16>
    %c0_47 = arith.constant 0 : index
    %c336 = arith.constant 336 : index
    %72 = vector.load %arg1[%c0_47, %c336] : memref<8x784xbf16, #tpu.memory_space<vmem>>, vector<8x112xbf16>
    %c0_48 = arith.constant 0 : index
    %c0_49 = arith.constant 0 : index
    %73 = vector.load %arg2[%c0_48, %c0_49] : memref<112x208xbf16, #tpu.memory_space<vmem>>, vector<112x208xbf16>
    %cst_50 = arith.constant dense<0.000000e+00> : vector<8x208xf32>
    %74 = tpu.matmul %72, %73, %cst_50 {dimension_numbers = #tpu.dot_dimension_numbers<[1], [0], [0], [1], [0, 0, 1, 1], [], []>} : vector<8x112xbf16>, vector<112x208xbf16>, vector<8x208xf32> -> vector<8x208xf32>
    %c0_51 = arith.constant 0 : index
    %c0_52 = arith.constant 0 : index
    %75 = vector.load %arg3[%c0_51, %c0_52] : memref<1x208xf32, #tpu.memory_space<vmem>>, vector<1x208xf32>
    %76 = vector.broadcast %75 : vector<1x208xf32> to vector<8x208xf32>
    %77 = arith.addf %74, %76 : vector<8x208xf32>
    %cst_53 = arith.constant 0.000000e+00 : f32
    %78 = vector.broadcast %cst_53 : f32 to vector<8x208xf32>
    %79 = arith.cmpf ogt, %77, %78 : vector<8x208xf32>
    %cst_54 = arith.constant 2.000000e-01 : f32
    %80 = vector.broadcast %cst_54 : f32 to vector<8x208xf32>
    %81 = arith.mulf %80, %77 : vector<8x208xf32>
    %82 = arith.select %79, %77, %81 : vector<8x208xi1>, vector<8x208xf32>
    %83 = arith.truncf %82 : vector<8x208xf32> to vector<8x208xbf16>
    %c0_55 = arith.constant 0 : index
    %c392 = arith.constant 392 : index
    %84 = vector.load %arg1[%c0_55, %c392] : memref<8x784xbf16, #tpu.memory_space<vmem>>, vector<8x112xbf16>
    %c0_56 = arith.constant 0 : index
    %c0_57 = arith.constant 0 : index
    %85 = vector.load %arg2[%c0_56, %c0_57] : memref<112x208xbf16, #tpu.memory_space<vmem>>, vector<112x208xbf16>
    %cst_58 = arith.constant dense<0.000000e+00> : vector<8x208xf32>
    %86 = tpu.matmul %84, %85, %cst_58 {dimension_numbers = #tpu.dot_dimension_numbers<[1], [0], [0], [1], [0, 0, 1, 1], [], []>} : vector<8x112xbf16>, vector<112x208xbf16>, vector<8x208xf32> -> vector<8x208xf32>
    %c0_59 = arith.constant 0 : index
    %c0_60 = arith.constant 0 : index
    %87 = vector.load %arg3[%c0_59, %c0_60] : memref<1x208xf32, #tpu.memory_space<vmem>>, vector<1x208xf32>
    %88 = vector.broadcast %87 : vector<1x208xf32> to vector<8x208xf32>
    %89 = arith.addf %86, %88 : vector<8x208xf32>
    %cst_61 = arith.constant 0.000000e+00 : f32
    %90 = vector.broadcast %cst_61 : f32 to vector<8x208xf32>
    %91 = arith.cmpf ogt, %89, %90 : vector<8x208xf32>
    %cst_62 = arith.constant 2.000000e-01 : f32
    %92 = vector.broadcast %cst_62 : f32 to vector<8x208xf32>
    %93 = arith.mulf %92, %89 : vector<8x208xf32>
    %94 = arith.select %91, %89, %93 : vector<8x208xi1>, vector<8x208xf32>
    %95 = arith.truncf %94 : vector<8x208xf32> to vector<8x208xbf16>
    %c0_63 = arith.constant 0 : index
    %c448 = arith.constant 448 : index
    %96 = vector.load %arg1[%c0_63, %c448] : memref<8x784xbf16, #tpu.memory_space<vmem>>, vector<8x112xbf16>
    %c0_64 = arith.constant 0 : index
    %c0_65 = arith.constant 0 : index
    %97 = vector.load %arg2[%c0_64, %c0_65] : memref<112x208xbf16, #tpu.memory_space<vmem>>, vector<112x208xbf16>
    %cst_66 = arith.constant dense<0.000000e+00> : vector<8x208xf32>
    %98 = tpu.matmul %96, %97, %cst_66 {dimension_numbers = #tpu.dot_dimension_numbers<[1], [0], [0], [1], [0, 0, 1, 1], [], []>} : vector<8x112xbf16>, vector<112x208xbf16>, vector<8x208xf32> -> vector<8x208xf32>
    %c0_67 = arith.constant 0 : index
    %c0_68 = arith.constant 0 : index
    %99 = vector.load %arg3[%c0_67, %c0_68] : memref<1x208xf32, #tpu.memory_space<vmem>>, vector<1x208xf32>
    %100 = vector.broadcast %99 : vector<1x208xf32> to vector<8x208xf32>
    %101 = arith.addf %98, %100 : vector<8x208xf32>
    %cst_69 = arith.constant 0.000000e+00 : f32
    %102 = vector.broadcast %cst_69 : f32 to vector<8x208xf32>
    %103 = arith.cmpf ogt, %101, %102 : vector<8x208xf32>
    %cst_70 = arith.constant 2.000000e-01 : f32
    %104 = vector.broadcast %cst_70 : f32 to vector<8x208xf32>
    %105 = arith.mulf %104, %101 : vector<8x208xf32>
    %106 = arith.select %103, %101, %105 : vector<8x208xi1>, vector<8x208xf32>
    %107 = arith.truncf %106 : vector<8x208xf32> to vector<8x208xbf16>
    %c0_71 = arith.constant 0 : index
    %c504 = arith.constant 504 : index
    %108 = vector.load %arg1[%c0_71, %c504] : memref<8x784xbf16, #tpu.memory_space<vmem>>, vector<8x112xbf16>
    %c0_72 = arith.constant 0 : index
    %c0_73 = arith.constant 0 : index
    %109 = vector.load %arg2[%c0_72, %c0_73] : memref<112x208xbf16, #tpu.memory_space<vmem>>, vector<112x208xbf16>
    %cst_74 = arith.constant dense<0.000000e+00> : vector<8x208xf32>
    %110 = tpu.matmul %108, %109, %cst_74 {dimension_numbers = #tpu.dot_dimension_numbers<[1], [0], [0], [1], [0, 0, 1, 1], [], []>} : vector<8x112xbf16>, vector<112x208xbf16>, vector<8x208xf32> -> vector<8x208xf32>
    %c0_75 = arith.constant 0 : index
    %c0_76 = arith.constant 0 : index
    %111 = vector.load %arg3[%c0_75, %c0_76] : memref<1x208xf32, #tpu.memory_space<vmem>>, vector<1x208xf32>
    %112 = vector.broadcast %111 : vector<1x208xf32> to vector<8x208xf32>
    %113 = arith.addf %110, %112 : vector<8x208xf32>
    %cst_77 = arith.constant 0.000000e+00 : f32
    %114 = vector.broadcast %cst_77 : f32 to vector<8x208xf32>
    %115 = arith.cmpf ogt, %113, %114 : vector<8x208xf32>
    %cst_78 = arith.constant 2.000000e-01 : f32
    %116 = vector.broadcast %cst_78 : f32 to vector<8x208xf32>
    %117 = arith.mulf %116, %113 : vector<8x208xf32>
    %118 = arith.select %115, %113, %117 : vector<8x208xi1>, vector<8x208xf32>
    %119 = arith.truncf %118 : vector<8x208xf32> to vector<8x208xbf16>
    %c0_79 = arith.constant 0 : index
    %c560 = arith.constant 560 : index
    %120 = vector.load %arg1[%c0_79, %c560] : memref<8x784xbf16, #tpu.memory_space<vmem>>, vector<8x112xbf16>
    %c0_80 = arith.constant 0 : index
    %c0_81 = arith.constant 0 : index
    %121 = vector.load %arg2[%c0_80, %c0_81] : memref<112x208xbf16, #tpu.memory_space<vmem>>, vector<112x208xbf16>
    %cst_82 = arith.constant dense<0.000000e+00> : vector<8x208xf32>
    %122 = tpu.matmul %120, %121, %cst_82 {dimension_numbers = #tpu.dot_dimension_numbers<[1], [0], [0], [1], [0, 0, 1, 1], [], []>} : vector<8x112xbf16>, vector<112x208xbf16>, vector<8x208xf32> -> vector<8x208xf32>
    %c0_83 = arith.constant 0 : index
    %c0_84 = arith.constant 0 : index
    %123 = vector.load %arg3[%c0_83, %c0_84] : memref<1x208xf32, #tpu.memory_space<vmem>>, vector<1x208xf32>
    %124 = vector.broadcast %123 : vector<1x208xf32> to vector<8x208xf32>
    %125 = arith.addf %122, %124 : vector<8x208xf32>
    %cst_85 = arith.constant 0.000000e+00 : f32
    %126 = vector.broadcast %cst_85 : f32 to vector<8x208xf32>
    %127 = arith.cmpf ogt, %125, %126 : vector<8x208xf32>
    %cst_86 = arith.constant 2.000000e-01 : f32
    %128 = vector.broadcast %cst_86 : f32 to vector<8x208xf32>
    %129 = arith.mulf %128, %125 : vector<8x208xf32>
    %130 = arith.select %127, %125, %129 : vector<8x208xi1>, vector<8x208xf32>
    %131 = arith.truncf %130 : vector<8x208xf32> to vector<8x208xbf16>
    %c0_87 = arith.constant 0 : index
    %c616 = arith.constant 616 : index
    %132 = vector.load %arg1[%c0_87, %c616] : memref<8x784xbf16, #tpu.memory_space<vmem>>, vector<8x112xbf16>
    %c0_88 = arith.constant 0 : index
    %c0_89 = arith.constant 0 : index
    %133 = vector.load %arg2[%c0_88, %c0_89] : memref<112x208xbf16, #tpu.memory_space<vmem>>, vector<112x208xbf16>
    %cst_90 = arith.constant dense<0.000000e+00> : vector<8x208xf32>
    %134 = tpu.matmul %132, %133, %cst_90 {dimension_numbers = #tpu.dot_dimension_numbers<[1], [0], [0], [1], [0, 0, 1, 1], [], []>} : vector<8x112xbf16>, vector<112x208xbf16>, vector<8x208xf32> -> vector<8x208xf32>
    %c0_91 = arith.constant 0 : index
    %c0_92 = arith.constant 0 : index
    %135 = vector.load %arg3[%c0_91, %c0_92] : memref<1x208xf32, #tpu.memory_space<vmem>>, vector<1x208xf32>
    %136 = vector.broadcast %135 : vector<1x208xf32> to vector<8x208xf32>
    %137 = arith.addf %134, %136 : vector<8x208xf32>
    %cst_93 = arith.constant 0.000000e+00 : f32
    %138 = vector.broadcast %cst_93 : f32 to vector<8x208xf32>
    %139 = arith.cmpf ogt, %137, %138 : vector<8x208xf32>
    %cst_94 = arith.constant 2.000000e-01 : f32
    %140 = vector.broadcast %cst_94 : f32 to vector<8x208xf32>
    %141 = arith.mulf %140, %137 : vector<8x208xf32>
    %142 = arith.select %139, %137, %141 : vector<8x208xi1>, vector<8x208xf32>
    %143 = arith.truncf %142 : vector<8x208xf32> to vector<8x208xbf16>
    %144 = tpu.concatenate %11, %23, %35, %47 in 1 : vector<8x208xbf16>, vector<8x208xbf16>, vector<8x208xbf16>, vector<8x208xbf16> -> vector<8x832xbf16>
    %c0_95 = arith.constant 0 : index
    %c0_96 = arith.constant 0 : index
    %145 = vector.load %arg4[%c0_95, %c0_96] : memref<832x160xbf16, #tpu.memory_space<vmem>>, vector<832x160xbf16>
    %cst_97 = arith.constant dense<0.000000e+00> : vector<8x160xf32>
    %146 = tpu.matmul %144, %145, %cst_97 {dimension_numbers = #tpu.dot_dimension_numbers<[1], [0], [0], [1], [0, 0, 1, 1], [], []>} : vector<8x832xbf16>, vector<832x160xbf16>, vector<8x160xf32> -> vector<8x160xf32>
    %c0_98 = arith.constant 0 : index
    %c0_99 = arith.constant 0 : index
    %147 = vector.load %arg5[%c0_98, %c0_99] : memref<1x160xf32, #tpu.memory_space<vmem>>, vector<1x160xf32>
    %148 = vector.broadcast %147 : vector<1x160xf32> to vector<8x160xf32>
    %149 = arith.addf %146, %148 : vector<8x160xf32>
    %cst_100 = arith.constant 0.000000e+00 : f32
    %150 = vector.broadcast %cst_100 : f32 to vector<8x160xf32>
    %151 = arith.cmpf ogt, %149, %150 : vector<8x160xf32>
    %cst_101 = arith.constant 2.000000e-01 : f32
    %152 = vector.broadcast %cst_101 : f32 to vector<8x160xf32>
    %153 = arith.mulf %152, %149 : vector<8x160xf32>
    %154 = arith.select %151, %149, %153 : vector<8x160xi1>, vector<8x160xf32>
    %155 = arith.truncf %154 : vector<8x160xf32> to vector<8x160xbf16>
    %156 = tpu.concatenate %35, %47, %59, %71 in 1 : vector<8x208xbf16>, vector<8x208xbf16>, vector<8x208xbf16>, vector<8x208xbf16> -> vector<8x832xbf16>
    %c0_102 = arith.constant 0 : index
    %c0_103 = arith.constant 0 : index
    %157 = vector.load %arg4[%c0_102, %c0_103] : memref<832x160xbf16, #tpu.memory_space<vmem>>, vector<832x160xbf16>
    %cst_104 = arith.constant dense<0.000000e+00> : vector<8x160xf32>
    %158 = tpu.matmul %156, %157, %cst_104 {dimension_numbers = #tpu.dot_dimension_numbers<[1], [0], [0], [1], [0, 0, 1, 1], [], []>} : vector<8x832xbf16>, vector<832x160xbf16>, vector<8x160xf32> -> vector<8x160xf32>
    %c0_105 = arith.constant 0 : index
    %c0_106 = arith.constant 0 : index
    %159 = vector.load %arg5[%c0_105, %c0_106] : memref<1x160xf32, #tpu.memory_space<vmem>>, vector<1x160xf32>
    %160 = vector.broadcast %159 : vector<1x160xf32> to vector<8x160xf32>
    %161 = arith.addf %158, %160 : vector<8x160xf32>
    %cst_107 = arith.constant 0.000000e+00 : f32
    %162 = vector.broadcast %cst_107 : f32 to vector<8x160xf32>
    %163 = arith.cmpf ogt, %161, %162 : vector<8x160xf32>
    %cst_108 = arith.constant 2.000000e-01 : f32
    %164 = vector.broadcast %cst_108 : f32 to vector<8x160xf32>
    %165 = arith.mulf %164, %161 : vector<8x160xf32>
    %166 = arith.select %163, %161, %165 : vector<8x160xi1>, vector<8x160xf32>
    %167 = arith.truncf %166 : vector<8x160xf32> to vector<8x160xbf16>
    %168 = tpu.concatenate %59, %71, %83, %95 in 1 : vector<8x208xbf16>, vector<8x208xbf16>, vector<8x208xbf16>, vector<8x208xbf16> -> vector<8x832xbf16>
    %c0_109 = arith.constant 0 : index
    %c0_110 = arith.constant 0 : index
    %169 = vector.load %arg4[%c0_109, %c0_110] : memref<832x160xbf16, #tpu.memory_space<vmem>>, vector<832x160xbf16>
    %cst_111 = arith.constant dense<0.000000e+00> : vector<8x160xf32>
    %170 = tpu.matmul %168, %169, %cst_111 {dimension_numbers = #tpu.dot_dimension_numbers<[1], [0], [0], [1], [0, 0, 1, 1], [], []>} : vector<8x832xbf16>, vector<832x160xbf16>, vector<8x160xf32> -> vector<8x160xf32>
    %c0_112 = arith.constant 0 : index
    %c0_113 = arith.constant 0 : index
    %171 = vector.load %arg5[%c0_112, %c0_113] : memref<1x160xf32, #tpu.memory_space<vmem>>, vector<1x160xf32>
    %172 = vector.broadcast %171 : vector<1x160xf32> to vector<8x160xf32>
    %173 = arith.addf %170, %172 : vector<8x160xf32>
    %cst_114 = arith.constant 0.000000e+00 : f32
    %174 = vector.broadcast %cst_114 : f32 to vector<8x160xf32>
    %175 = arith.cmpf ogt, %173, %174 : vector<8x160xf32>
    %cst_115 = arith.constant 2.000000e-01 : f32
    %176 = vector.broadcast %cst_115 : f32 to vector<8x160xf32>
    %177 = arith.mulf %176, %173 : vector<8x160xf32>
    %178 = arith.select %175, %173, %177 : vector<8x160xi1>, vector<8x160xf32>
    %179 = arith.truncf %178 : vector<8x160xf32> to vector<8x160xbf16>
    %180 = tpu.concatenate %83, %95, %107, %119 in 1 : vector<8x208xbf16>, vector<8x208xbf16>, vector<8x208xbf16>, vector<8x208xbf16> -> vector<8x832xbf16>
    %c0_116 = arith.constant 0 : index
    %c0_117 = arith.constant 0 : index
    %181 = vector.load %arg4[%c0_116, %c0_117] : memref<832x160xbf16, #tpu.memory_space<vmem>>, vector<832x160xbf16>
    %cst_118 = arith.constant dense<0.000000e+00> : vector<8x160xf32>
    %182 = tpu.matmul %180, %181, %cst_118 {dimension_numbers = #tpu.dot_dimension_numbers<[1], [0], [0], [1], [0, 0, 1, 1], [], []>} : vector<8x832xbf16>, vector<832x160xbf16>, vector<8x160xf32> -> vector<8x160xf32>
    %c0_119 = arith.constant 0 : index
    %c0_120 = arith.constant 0 : index
    %183 = vector.load %arg5[%c0_119, %c0_120] : memref<1x160xf32, #tpu.memory_space<vmem>>, vector<1x160xf32>
    %184 = vector.broadcast %183 : vector<1x160xf32> to vector<8x160xf32>
    %185 = arith.addf %182, %184 : vector<8x160xf32>
    %cst_121 = arith.constant 0.000000e+00 : f32
    %186 = vector.broadcast %cst_121 : f32 to vector<8x160xf32>
    %187 = arith.cmpf ogt, %185, %186 : vector<8x160xf32>
    %cst_122 = arith.constant 2.000000e-01 : f32
    %188 = vector.broadcast %cst_122 : f32 to vector<8x160xf32>
    %189 = arith.mulf %188, %185 : vector<8x160xf32>
    %190 = arith.select %187, %185, %189 : vector<8x160xi1>, vector<8x160xf32>
    %191 = arith.truncf %190 : vector<8x160xf32> to vector<8x160xbf16>
    %192 = tpu.concatenate %107, %119, %131, %143 in 1 : vector<8x208xbf16>, vector<8x208xbf16>, vector<8x208xbf16>, vector<8x208xbf16> -> vector<8x832xbf16>
    %c0_123 = arith.constant 0 : index
    %c0_124 = arith.constant 0 : index
    %193 = vector.load %arg4[%c0_123, %c0_124] : memref<832x160xbf16, #tpu.memory_space<vmem>>, vector<832x160xbf16>
    %cst_125 = arith.constant dense<0.000000e+00> : vector<8x160xf32>
    %194 = tpu.matmul %192, %193, %cst_125 {dimension_numbers = #tpu.dot_dimension_numbers<[1], [0], [0], [1], [0, 0, 1, 1], [], []>} : vector<8x832xbf16>, vector<832x160xbf16>, vector<8x160xf32> -> vector<8x160xf32>
    %c0_126 = arith.constant 0 : index
    %c0_127 = arith.constant 0 : index
    %195 = vector.load %arg5[%c0_126, %c0_127] : memref<1x160xf32, #tpu.memory_space<vmem>>, vector<1x160xf32>
    %196 = vector.broadcast %195 : vector<1x160xf32> to vector<8x160xf32>
    %197 = arith.addf %194, %196 : vector<8x160xf32>
    %cst_128 = arith.constant 0.000000e+00 : f32
    %198 = vector.broadcast %cst_128 : f32 to vector<8x160xf32>
    %199 = arith.cmpf ogt, %197, %198 : vector<8x160xf32>
    %cst_129 = arith.constant 2.000000e-01 : f32
    %200 = vector.broadcast %cst_129 : f32 to vector<8x160xf32>
    %201 = arith.mulf %200, %197 : vector<8x160xf32>
    %202 = arith.select %199, %197, %201 : vector<8x160xi1>, vector<8x160xf32>
    %203 = arith.truncf %202 : vector<8x160xf32> to vector<8x160xbf16>
    %204 = tpu.concatenate %155, %167, %179, %191, %203 in 1 : vector<8x160xbf16>, vector<8x160xbf16>, vector<8x160xbf16>, vector<8x160xbf16>, vector<8x160xbf16> -> vector<8x800xbf16>
    %c0_130 = arith.constant 0 : index
    %c0_131 = arith.constant 0 : index
    %205 = vector.load %arg6[%c0_130, %c0_131] : memref<800x32xbf16, #tpu.memory_space<vmem>>, vector<800x32xbf16>
    %cst_132 = arith.constant dense<0.000000e+00> : vector<8x32xf32>
    %206 = tpu.matmul %204, %205, %cst_132 {dimension_numbers = #tpu.dot_dimension_numbers<[1], [0], [0], [1], [0, 0, 1, 1], [], []>} : vector<8x800xbf16>, vector<800x32xbf16>, vector<8x32xf32> -> vector<8x32xf32>
    %c0_133 = arith.constant 0 : index
    %c0_134 = arith.constant 0 : index
    %207 = vector.load %arg7[%c0_133, %c0_134] : memref<1x32xf32, #tpu.memory_space<vmem>>, vector<1x32xf32>
    %208 = vector.broadcast %207 : vector<1x32xf32> to vector<8x32xf32>
    %209 = arith.addf %206, %208 : vector<8x32xf32>
    %cst_135 = arith.constant 0.000000e+00 : f32
    %210 = vector.broadcast %cst_135 : f32 to vector<8x32xf32>
    %211 = arith.cmpf ogt, %209, %210 : vector<8x32xf32>
    %cst_136 = arith.constant 2.000000e-01 : f32
    %212 = vector.broadcast %cst_136 : f32 to vector<8x32xf32>
    %213 = arith.mulf %212, %209 : vector<8x32xf32>
    %214 = arith.select %211, %209, %213 : vector<8x32xi1>, vector<8x32xf32>
    %215 = arith.truncf %214 : vector<8x32xf32> to vector<8x32xbf16>
    %c0_137 = arith.constant 0 : index
    %c0_138 = arith.constant 0 : index
    %216 = vector.load %arg8[%c0_137, %c0_138] : memref<32x32xbf16, #tpu.memory_space<vmem>>, vector<32x32xbf16>
    %cst_139 = arith.constant dense<0.000000e+00> : vector<8x32xf32>
    %217 = tpu.matmul %215, %216, %cst_139 {dimension_numbers = #tpu.dot_dimension_numbers<[1], [0], [0], [1], [0, 0, 1, 1], [], []>} : vector<8x32xbf16>, vector<32x32xbf16>, vector<8x32xf32> -> vector<8x32xf32>
    %c0_140 = arith.constant 0 : index
    %c0_141 = arith.constant 0 : index
    %218 = vector.load %arg9[%c0_140, %c0_141] : memref<1x32xf32, #tpu.memory_space<vmem>>, vector<1x32xf32>
    %219 = vector.broadcast %218 : vector<1x32xf32> to vector<8x32xf32>
    %220 = arith.addf %217, %219 : vector<8x32xf32>
    %cst_142 = arith.constant 0.000000e+00 : f32
    %221 = vector.broadcast %cst_142 : f32 to vector<8x32xf32>
    %222 = arith.cmpf ogt, %220, %221 : vector<8x32xf32>
    %cst_143 = arith.constant 2.000000e-01 : f32
    %223 = vector.broadcast %cst_143 : f32 to vector<8x32xf32>
    %224 = arith.mulf %223, %220 : vector<8x32xf32>
    %225 = arith.select %222, %220, %224 : vector<8x32xi1>, vector<8x32xf32>
    %226 = arith.truncf %225 : vector<8x32xf32> to vector<8x32xbf16>
    %c0_144 = arith.constant 0 : index
    %c0_145 = arith.constant 0 : index
    %227 = vector.load %arg10[%c0_144, %c0_145] : memref<32x10xbf16, #tpu.memory_space<vmem>>, vector<32x10xbf16>
    %cst_146 = arith.constant dense<0.000000e+00> : vector<8x10xf32>
    %228 = tpu.matmul %226, %227, %cst_146 {dimension_numbers = #tpu.dot_dimension_numbers<[1], [0], [0], [1], [0, 0, 1, 1], [], []>} : vector<8x32xbf16>, vector<32x10xbf16>, vector<8x10xf32> -> vector<8x10xf32>
    %c0_147 = arith.constant 0 : index
    %c0_148 = arith.constant 0 : index
    %229 = vector.load %arg11[%c0_147, %c0_148] : memref<1x10xf32, #tpu.memory_space<vmem>>, vector<1x10xf32>
    %230 = vector.broadcast %229 : vector<1x10xf32> to vector<8x10xf32>
    %231 = arith.addf %228, %230 : vector<8x10xf32>
    %c0_149 = arith.constant 0 : index
    %c0_150 = arith.constant 0 : index
    %232 = vector.load %arg12[%c0_149, %c0_150] : memref<8x10xf32, #tpu.memory_space<vmem>>, vector<8x10xf32>
    tpu.vector_store %arg12[%c0_149, %c0_150], %231 {strides = array<i32>} : memref<8x10xf32, #tpu.memory_space<vmem>>, vector<8x10xf32>,
    return
  }
  func.func @transform_0(%arg0: i32) -> (i32, i32) {
    %c0_i32 = arith.constant 0 : i32
    %c0_i32_0 = arith.constant 0 : i32
    return %arg0, %c0_i32 : i32, i32
  }
  func.func @transform_1(%arg0: i32) -> (i32, i32) {
    %c0_i32 = arith.constant 0 : i32
    %c0_i32_0 = arith.constant 0 : i32
    %c0_i32_1 = arith.constant 0 : i32
    return %c0_i32, %c0_i32_0 : i32, i32
  }
  func.func @transform_2(%arg0: i32) -> (i32, i32) {
    %c0_i32 = arith.constant 0 : i32
    %c0_i32_0 = arith.constant 0 : i32
    %c0_i32_1 = arith.constant 0 : i32
    return %c0_i32, %c0_i32_0 : i32, i32
  }
  func.func @transform_3(%arg0: i32) -> (i32, i32) {
    %c0_i32 = arith.constant 0 : i32
    %c0_i32_0 = arith.constant 0 : i32
    %c0_i32_1 = arith.constant 0 : i32
    return %c0_i32, %c0_i32_0 : i32, i32
  }
  func.func @transform_4(%arg0: i32) -> (i32, i32) {
    %c0_i32 = arith.constant 0 : i32
    %c0_i32_0 = arith.constant 0 : i32
    %c0_i32_1 = arith.constant 0 : i32
    return %c0_i32, %c0_i32_0 : i32, i32
  }
  func.func @transform_5(%arg0: i32) -> (i32, i32) {
    %c0_i32 = arith.constant 0 : i32
    %c0_i32_0 = arith.constant 0 : i32
    %c0_i32_1 = arith.constant 0 : i32
    return %c0_i32, %c0_i32_0 : i32, i32
  }
  func.func @transform_6(%arg0: i32) -> (i32, i32) {
    %c0_i32 = arith.constant 0 : i32
    %c0_i32_0 = arith.constant 0 : i32
    %c0_i32_1 = arith.constant 0 : i32
    return %c0_i32, %c0_i32_0 : i32, i32
  }
  func.func @transform_7(%arg0: i32) -> (i32, i32) {
    %c0_i32 = arith.constant 0 : i32
    %c0_i32_0 = arith.constant 0 : i32
    %c0_i32_1 = arith.constant 0 : i32
    return %c0_i32, %c0_i32_0 : i32, i32
  }
  func.func @transform_8(%arg0: i32) -> (i32, i32) {
    %c0_i32 = arith.constant 0 : i32
    %c0_i32_0 = arith.constant 0 : i32
    %c0_i32_1 = arith.constant 0 : i32
    return %c0_i32, %c0_i32_0 : i32, i32
  }
  func.func @transform_9(%arg0: i32) -> (i32, i32) {
    %c0_i32 = arith.constant 0 : i32
    %c0_i32_0 = arith.constant 0 : i32
    %c0_i32_1 = arith.constant 0 : i32
    return %c0_i32, %c0_i32_0 : i32, i32
  }
  func.func @transform_10(%arg0: i32) -> (i32, i32) {
    %c0_i32 = arith.constant 0 : i32
    %c0_i32_0 = arith.constant 0 : i32
    %c0_i32_1 = arith.constant 0 : i32
    return %c0_i32, %c0_i32_0 : i32, i32
  }
  func.func @transform_11(%arg0: i32) -> (i32, i32) {
    %c0_i32 = arith.constant 0 : i32
    %c0_i32_0 = arith.constant 0 : i32
    return %arg0, %c0_i32 : i32, i32
  }
}

</mosaic_0001>

<bundles_post_ra>
// kernel: tile.13
= control target key start
LH: loop header
LB: loop body
LE: loop exit
PB: predicated region body
PF: predicated region fallthrough
CT: control target
= control target key end

     0   :  { %s28_s0 = inlined_call_operand.vmem [shape: f32[16], index: 0, kind: input, shape index: {}]   ;;  %s29_s1 = inlined_call_operand.vmem [shape: f32[13,16], index: 1, kind: output, shape index: {}]  }
   0x1   :  { %v4_v0 = vld [vmem:[%s28_s0] ss:$0 sm:$0xff] }
   0x2   :  { %5 = vst [vmem:[%s29_s1] sm:$0xff] %v4_v0  ;;  %8 = vst [vmem:[%s29_s1 + $0x8] sm:$0xff] %v4_v0 }

// kernel: tile.14
= control target key start
LH: loop header
LB: loop body
LE: loop exit
PB: predicated region body
PF: predicated region fallthrough
CT: control target
= control target key end

     0   :  { %s78_s10 = smov 112   ;;  %s79_s11 = smov 80   ;;  %vm4_vm0 = vcmask 130048   ;;  %vm10_vm1 = vcmask 1048448   ;;  %vm16_vm2 = vcmask 917248   ;;  %vm22_vm3 = vcmask 786048   ;;  %s125_s0 = inlined_call_operand.vmem [shape: f32[13,16], index: 0, kind: input, shape index: {}]   ;;  %s126_s1 = inlined_call_operand.vmem [shape: f32[1,208], index: 1, kind: output, shape index: {}]  }
   0x1   :  { %v63_v0 = vld [vmem:[%s125_s0 + $0x7] sm:$0x1]   ;;  %v65_v1 = vld [vmem:[%s125_s0 + $0x5] sm:$0x1]   ;;  %s25_s12 = smov 3  ;;  %s32_s17 = smov 3 }
   0x2   :  { %8 = vrot.lane.b32.xlu0 %v63_v0, %s78_s10  ;;  %20 = vrot.lane.b32.xlu1 %v65_v1, %s79_s11  ;;  %v64_v2 = vld [vmem:[%s125_s0 + $0x6] sm:$0x1]   ;;  %s39_s18 = smov 3  ;;  %s80_s19 = smov 96   ;;  %vm29_vm4 = vcmask 654848   ;;  %vm36_vm5 = vcmask 523648  }
   0x3   :  { %v66_v3 = vld [vmem:[%s125_s0 + $0x4] ss:$8 sm:%s25_s12]   ;;  %s81_s20 = smov 64   ;;  %v67_v4 = vld [vmem:[%s125_s0 + $0x3] ss:$8 sm:%s32_s17]   ;;  %s2_s23 = smov 3 }
   0x4   :  { %v68_v5 = vld [vmem:[%s125_s0 + $0x2] ss:$8 sm:%s39_s18]   ;;  %v3_v6 = vld [vmem:[%s125_s0] ss:$8 sm:%s2_s23]   ;;  %s46_s28 = smov 3  ;;  %s82_s29 = smov 48  }
   0x5   :  { %5 = vst.msk [vmem:[#allocation0] ss:$8 sm:$0x3] %vm4_vm0, %v3_v6   ;;  %s83_s30 = smov 32   ;;  %v69_v7 = vld [vmem:[%s125_s0 + $0x1] ss:$8 sm:%s46_s28]  }
   0x6   :  { %14 = vrot.lane.b32.xlu0 %v64_v2, %s80_s19  ;;  %27 = vrot.lane.b32.xlu1 %v66_v3, %s81_s20  ;;  %s84_s0 = smov 16   ;;  %vm43_vm6 = vcmask 392448   ;;  %vm50_vm7 = vcmask 261248  }
   0xa   :  { %34 = vrot.lane.b32.xlu0 %v67_v4, %s82_s29  ;;  %41 = vrot.lane.b32.xlu1 %v68_v5, %s83_s30 }
   0xe   :  { %48 = vrot.lane.b32.xlu0 %v69_v7, %s84_s0 }
  0x74   :  { %v9_v8 = vpop.permute.xlu0 %8   ;;  %v21_v9 = vpop.permute.xlu1 %20  }
  0x75   :  { %11 = vst.msk [vmem:[#allocation0] sm:$0x1] %vm10_vm1, %v9_v8  }
  0x78   :  { %v15_v10 = vpop.permute.xlu0 %14   ;;  %v28_v11 = vpop.permute.xlu1 %27  }
  0x79   :  { %17 = vst.msk [vmem:[#allocation0] sm:$0x1] %vm16_vm2, %v15_v10  }
  0x7a   :  { %23 = vst.msk [vmem:[#allocation0] sm:$0x1] %vm22_vm3, %v21_v9  }
  0x7b   :  { %30 = vst.msk [vmem:[#allocation0] ss:$8 sm:$0x3] %vm29_vm4, %v28_v11  }
  0x7c   :  { %v35_v12 = vpop.permute.xlu0 %34   ;;  %v42_v13 = vpop.permute.xlu1 %41  }
  0x7d   :  { %37 = vst.msk [vmem:[#allocation0] ss:$8 sm:$0x3] %vm36_vm5, %v35_v12  }
  0x7e   :  { %44 = vst.msk [vmem:[#allocation0] ss:$8 sm:$0x3] %vm43_vm6, %v42_v13  }
  0x80   :  { %v49_v14 = vpop.permute.xlu0 %48  }
  0x81   :  { %51 = vst.msk [vmem:[#allocation0] ss:$8 sm:$0x3] %vm50_vm7, %v49_v14  }
  0x88   :  { %v55_v15 = vld [vmem:[#allocation0] sm:$0x1]  ;;  %v59_v16 = vld [vmem:[#allocation0 + $0x8] sm:$0x1] }
  0x89   :  { %57 = vst [vmem:[%s126_s1] sm:$0x1] %v55_v15  ;;  %70 = vst [vmem:[%s126_s1 + $0x1] sm:$0x1] %v59_v16 }

// kernel: tile.18
= control target key start
LH: loop header
LB: loop body
LE: loop exit
PB: predicated region body
PF: predicated region fallthrough
CT: control target
= control target key end

     0   :  { %s22_s0 = inlined_call_operand.vmem [shape: f32[32], index: 0, kind: input, shape index: {}]   ;;  %s23_s1 = inlined_call_operand.vmem [shape: f32[5,32], index: 1, kind: output, shape index: {}]  }
   0x1   :  { %v4_v0 = vld [vmem:[%s22_s0] ss:$0 sm:$0xff] }
   0x2   :  { %5 = vst [vmem:[%s23_s1] sm:$0xff] %v4_v0 }

// kernel: tile.19
= control target key start
LH: loop header
LB: loop body
LE: loop exit
PB: predicated region body
PF: predicated region fallthrough
CT: control target
= control target key end

     0   :  { %s42_s8 = smov 96   ;;  %s2_s11 = smov 3  ;;  %vm4_vm0 = vcmask 261120   ;;  %vm10_vm1 = vcmask 1048320   ;;  %vm16_vm2 = vcmask 785920   ;;  %vm22_vm3 = vcmask 523520   ;;  %s73_s0 = inlined_call_operand.vmem [shape: f32[5,32], index: 0, kind: input, shape index: {}]   ;;  %s74_s1 = inlined_call_operand.vmem [shape: f32[1,160], index: 1, kind: output, shape index: {}]  }
   0x1   :  { %v35_v0 = vld [vmem:[%s73_s0 + $0x3] sm:$0x1]   ;;  %v37_v1 = vld [vmem:[%s73_s0 + $0x1] sm:$0x1]   ;;  %v36_v2 = vld [vmem:[%s73_s0 + $0x2] sm:$0x1]  }
   0x2   :  { %8 = vrot.lane.b32.xlu0 %v35_v0, %s42_s8  ;;  %s43_s14 = smov 32   ;;  %v3_v3 = vld [vmem:[%s73_s0] ss:$4 sm:%s2_s11]   ;;  %s44_s0 = smov 64  }
   0x3   :  { %20 = vrot.lane.b32.xlu1 %v37_v1, %s43_s14  ;;  %5 = vst.msk [vmem:[#allocation0] ss:$8 sm:$0x3] %vm4_vm0, %v3_v3  }
   0x6   :  { %14 = vrot.lane.b32.xlu0 %v36_v2, %s44_s0 }
   0xa   :  { %v31_v4 = vld [vmem:[#allocation0 + $0x8] sm:$0x1] }
   0xb   :  { %38 = vst [vmem:[%s74_s1 + $0x1] sm:$0x1] %v31_v4 }
  0x74   :  { %v9_v5 = vpop.permute.xlu0 %8  }
  0x75   :  { %11 = vst.msk [vmem:[#allocation0] sm:$0x1] %vm10_vm1, %v9_v5   ;;  %v21_v6 = vpop.permute.xlu1 %20  }
  0x78   :  { %v15_v7 = vpop.permute.xlu0 %14  }
  0x79   :  { %17 = vst.msk [vmem:[#allocation0] sm:$0x1] %vm16_vm2, %v15_v7  }
  0x7a   :  { %23 = vst.msk [vmem:[#allocation0] sm:$0x1] %vm22_vm3, %v21_v6  }
  0x81   :  { %v27_v8 = vld [vmem:[#allocation0] sm:$0x1] }
  0x82   :  { %29 = vst [vmem:[%s74_s1] sm:$0x1] %v27_v8 }

// kernel: classification_net_forward.1
= control target key start
LH: loop header
LB: loop body
LE: loop exit
PB: predicated region body
PF: predicated region fallthrough
CT: control target
= control target key end

     0   :  { %v6282_v2 = vmov 0   ;;  %s4027_s25 = smov 72   ;;  %s4028_s26 = smov 88   ;;  %vm136_vm0 = vcmask 916480   ;;  %vm199_vm1 = vcmask 588800   ;;  %vm257_vm2 = vcmask 130048   ;;  %s6268_s0 = inlined_call_operand.vmem [shape: bf16[8,784], index: 0, kind: input, shape index: {}]   ;;  %s6269_s1 = inlined_call_operand.vmem [shape: bf16[112,208], index: 1, kind: input, shape index: {}]   ;;  %s6270_s3 = inlined_call_operand.vmem [shape: bf16[832,160], index: 3, kind: input, shape index: {}]   ;;  %s6271_s2 = inlined_call_operand.vmem [shape: f32[1,208], index: 2, kind: input, shape index: {}]   ;;  %s6272_s4 = inlined_call_operand.vmem [shape: f32[1,160], index: 4, kind: input, shape index: {}]   ;;  %s6273_s5 = inlined_call_operand.vmem [shape: bf16[800,32], index: 5, kind: input, shape index: {}]   ;;  %s6274_s7 = inlined_call_operand.vmem [shape: bf16[32,32], index: 7, kind: input, shape index: {}]   ;;  %s6275_s6 = inlined_call_operand.vmem [shape: f32[1,32], index: 6, kind: input, shape index: {}]   ;;  %s6276_s9 = inlined_call_operand.vmem [shape: bf16[32,10], index: 9, kind: input, shape index: {}]   ;;  %s6277_s8 = inlined_call_operand.vmem [shape: f32[1,32], index: 8, kind: input, shape index: {}]   ;;  %s6278_s10 = inlined_call_operand.vmem [shape: f32[1,10], index: 10, kind: input, shape index: {}]   ;;  %s6279_s11 = inlined_call_operand.vmem [shape: f32[8,10], index: 11, kind: output, shape index: {}]  }
   0x1   :  { %v189_v0 = vld [vmem:[%s6268_s0] sm:$0xff]  ;;  %172 = vmatprep.mubr.bf16.mxu1 %v6282_v2  ;;  %294 = vmatprep.mubr.bf16.mxu0 %v6282_v2  ;;  %v4123_v9 = vld [vmem:[%s6269_s1 + $0x14] ss:$8 sps:$4 sm:$0xff]   ;;  %v4131_v10 = vld [vmem:[%s6269_s1 + $0x10] ss:$8 sps:$4 sm:$0xff]   ;;  %s4029_s18 = smov 16  }
   0x2   :  { %v311_v1 = vld [vmem:[%s6268_s0 + $0x4] sm:$0xff]  ;;  %v3306_v3 = vcombine.low %v189_v0, %v189_v0  ;;  %v3307_v7 = vcombine.high %v189_v0, %v189_v0  ;;  %v4152_v13 = vld [vmem:[%s6269_s1 + $0x34] ss:$8 sps:$4 sm:$0xff]   ;;  %v4162_v15 = vld [vmem:[%s6269_s1 + $0x30] ss:$8 sps:$4 sm:$0xff]   ;;  %s4031_s13 = smov 48  }
   0x3   :  { %v3310_v4 = vcombine.low %v311_v1, %v311_v1  ;;  %v4113_v5 = vld [vmem:[%s6269_s1 + $0x4] ss:$8 sps:$4 sm:$0xff]   ;;  %v4118_v6 = vld [vmem:[%s6269_s1] ss:$8 sps:$4 sm:$0xff]   ;;  %v3311_v8 = vcombine.high %v311_v1, %v311_v1  ;;  %v4188_v21 = vld [vmem:[%s6269_s1 + $0x54] ss:$8 sps:$4 sm:$0xff]  }
   0x4   :  { %195 = vrot.lane.b32.xlu0 %v3306_v3, %s4027_s25  ;;  %140 = vmatprep.subr.bf16.mxu1 %v4113_v5  ;;  %v4138_v11 = vld [vmem:[%s6269_s1 + $0x24] ss:$8 sps:$4 sm:$0xff]   ;;  %v4145_v12 = vld [vmem:[%s6269_s1 + $0x20] ss:$8 sps:$4 sm:$0xff]   ;;  %v4195_v24 = vld [vmem:[%s6269_s1 + $0x50] ss:$8 sps:$4 sm:$0xff]  }
   0x5   :  { %317 = vrot.lane.b32.xlu1 %v3310_v4, %s4028_s26  ;;  %262 = vmatprep.subr.bf16.mxu0 %v4113_v5  ;;  %v433_v14 = vld [vmem:[%s6268_s0 + $0x8] sm:$0xff]  ;;  %v735_v26 = vld [vmem:[%s6268_s0 + $0x10] sm:$0xff]  ;;  %s4033_s23 = smov 104   ;;  %v39_v30 = vld [vmem:[%s6268_s0] sm:$0xf]  ;;  %s4035_s29 = smov 120  }
   0x6   :  { %141 = vmatpush1.bf16.msra.mxu1 %v4118_v6  ;;  %263 = vmatpush1.bf16.msra.mxu0 %v4118_v6  ;;  %v4169_v16 = vld [vmem:[%s6269_s1 + $0x44] ss:$8 sps:$4 sm:$0xff]   ;;  %v3315_v17 = vcombine.high %v433_v14, %v433_v14  ;;  %v3314_v18 = vcombine.low %v433_v14, %v433_v14  ;;  %v4181_v20 = vld [vmem:[%s6269_s1 + $0x40] ss:$8 sps:$4 sm:$0xff]   ;;  %v4219_v28 = vcombine.low %v735_v26, %v735_v26  ;;  %s4036_s30 = smov 8   ;;  %vm321_vm3 = vcmask 719872  }
   0x7   :  { %142 = vmatprep.subr.bf16.mxu1 %v4123_v9  ;;  %264 = vmatprep.subr.bf16.mxu0 %v4123_v9  ;;  %v613_v19 = vld [vmem:[%s6268_s0 + $0xc] sm:$0xff]  ;;  %v4214_v27 = vld [vmem:[%s6269_s1 + $0x60] ss:$8 sps:$4 sm:$0xff]   ;;  %v4221_v29 = vcombine.high %v735_v26, %v735_v26  ;;  %vm379_vm4 = vcmask 261120   ;;  %vm443_vm5 = vcmask 850944   ;;  %vm501_vm6 = vcmask 392192  }
   0x8   :  { %197 = vrot.lane.b32.xlu0 %v3307_v7, %s4027_s25  ;;  %s4030_s25 = smov 32   ;;  %v3321_v22 = vcombine.high %v613_v19, %v613_v19  ;;  %v3320_v23 = vcombine.low %v613_v19, %v613_v19  ;;  %v4202_v25 = vld [vmem:[%s6269_s1 + $0x64] ss:$8 sps:$4 sm:$0xff]   ;;  %s4034_s1 = smov 80   ;;  %vm623_vm7 = vcmask 523264   ;;  %vm681_vm8 = vcmask 64512  }
   0x9   :  { %319 = vrot.lane.b32.xlu1 %v3311_v8, %s4028_s26  ;;  %v3710_v31 = vld [vmem:[%s6268_s0 + $0xc] ss:$0 sps:$4 sm:$0xff]   ;;  %s4037_s0 = smov 24   ;;  %vm745_vm9 = vcmask 654336   ;;  %v4413_v1 = vld [vmem:[%s6270_s3] ss:$8 sps:$4 sm:$0xff]  }
   0xa   :  { %143 = vmatpush1.bf16.msra.mxu1 %v4131_v10  ;;  %265 = vmatpush1.bf16.msra.mxu0 %v4131_v10  ;;  %v4408_v0 = vld [vmem:[%s6270_s3 + $0x4] ss:$8 sps:$4 sm:$0xff]   ;;  %v4484_v14 = vld [vmem:[%s6270_s3 + $0x60] ss:$8 sps:$4 sm:$0xff]   ;;  %v4513_v19 = vld [vmem:[%s6270_s3 + $0x94] ss:$8 sps:$4 sm:$0xff]  }
   0xb   :  { %144 = vmatprep.subr.bf16.mxu1 %v4138_v11  ;;  %266 = vmatprep.subr.bf16.mxu0 %v4138_v11  ;;  %v4557_v26 = vld [vmem:[%s6270_s3 + $0xc0] ss:$8 sps:$4 sm:$0xff]   ;;  %s4039_s26 = smov 96  }
   0xc   :  { %253 = vrot.lane.b32.xlu0 %v3306_v3, %s4029_s18  ;;  %v4420_v3 = vld [vmem:[%s6270_s3 + $0x14] ss:$8 sps:$4 sm:$0xff]  }
   0xd   :  { %255 = vrot.lane.b32.xlu1 %v3307_v7, %s4029_s18  ;;  %s4032_s18 = smov 64   ;;  %v4443_v7 = vld [vmem:[%s6270_s3 + $0x34] ss:$8 sps:$4 sm:$0xff]  }
   0xe   :  { %145 = vmatpush1.bf16.msra.mxu1 %v4145_v12  ;;  %267 = vmatpush1.bf16.msra.mxu0 %v4145_v12 }
   0xf   :  { %146 = vmatprep.subr.bf16.mxu1 %v4152_v13  ;;  %268 = vmatprep.subr.bf16.mxu0 %v4152_v13 }
  0x10   :  { %375 = vrot.lane.b32.xlu0 %v3310_v4, %s4030_s25  ;;  %v4425_v4 = vld [vmem:[%s6270_s3 + $0x10] ss:$8 sps:$4 sm:$0xff]  }
  0x11   :  { %377 = vrot.lane.b32.xlu1 %v3311_v8, %s4030_s25  ;;  %v4448_v8 = vld [vmem:[%s6270_s3 + $0x30] ss:$8 sps:$4 sm:$0xff]  }
  0x12   :  { %147 = vmatpush1.bf16.msra.mxu1 %v4162_v15  ;;  %269 = vmatpush1.bf16.msra.mxu0 %v4162_v15 }
  0x13   :  { %148 = vmatprep.subr.bf16.mxu1 %v4169_v16  ;;  %270 = vmatprep.subr.bf16.mxu0 %v4169_v16 }
  0x14   :  { %497 = vrot.lane.b32.xlu0 %v3314_v18, %s4031_s13 }
  0x15   :  { %499 = vrot.lane.b32.xlu1 %v3315_v17, %s4031_s13 }
  0x16   :  { %149 = vmatpush1.bf16.msra.mxu1 %v4181_v20  ;;  %271 = vmatpush1.bf16.msra.mxu0 %v4181_v20 }
  0x17   :  { %150 = vmatprep.subr.bf16.mxu1 %v4188_v21  ;;  %272 = vmatprep.subr.bf16.mxu0 %v4188_v21 }
  0x18   :  { %619 = vrot.lane.b32.xlu0 %v3320_v23, %s4032_s18 }
  0x19   :  { %621 = vrot.lane.b32.xlu1 %v3321_v22, %s4032_s18 }
  0x1a   :  { %151 = vmatpush1.bf16.msra.mxu1 %v4195_v24  ;;  %273 = vmatpush1.bf16.msra.mxu0 %v4195_v24 }
  0x1b   :  { %152 = vmatprep.subr.bf16.mxu1 %v4202_v25  ;;  %274 = vmatprep.subr.bf16.mxu0 %v4202_v25 }
  0x1c   :  { %439 = vrot.lane.b32.xlu0 %v3314_v18, %s4033_s23  ;;  %v4508_v18 = vld [vmem:[%s6270_s3 + $0x80] ss:$8 sps:$4 sm:$0xff]  }
  0x1d   :  { %441 = vrot.lane.b32.xlu1 %v3315_v17, %s4033_s23  ;;  %v4503_v17 = vld [vmem:[%s6270_s3 + $0x84] ss:$8 sps:$4 sm:$0xff]  }
  0x1e   :  { %153 = vmatpush1.bf16.msra.mxu1 %v4214_v27  ;;  %275 = vmatpush1.bf16.msra.mxu0 %v4214_v27 }
  0x1f   :  { %204 = vmatprep.subr.bf16.mxu1 %v4113_v5  ;;  %384 = vmatprep.subr.bf16.mxu0 %v4113_v5 }
  0x20   :  { %741 = vrot.lane.b32.xlu0 %v4219_v28, %s4034_s1 }
  0x21   :  { %743 = vrot.lane.b32.xlu1 %v4221_v29, %s4034_s1  ;;  %3305 = vmatmul.mubr.msk.bf16.vlgmr.msra.gmra.mrb[0].mxu1 %vm136_vm0, %v39_v30  ;;  %v56_v30 = vlaneseq }
  0x22   :  { %205 = vmatpush1.bf16.msra.mxu1 %v4118_v6  ;;  %236 = vmatprep.mubr.bf16.mxu1 %v6282_v2 }
  0x23   :  { %206 = vmatprep.subr.bf16.mxu1 %v4123_v9 }
  0x24   :  { %559 = vrot.lane.b32.xlu0 %v3710_v31, %s4035_s29  ;;  %v4576_v31 = vld [vmem:[%s6270_s3 + $0xe4] ss:$8 sps:$4 sm:$0xff]  }
  0x25   :  { %677 = vrot.lane.b32.xlu1 %v3320_v23, %s4036_s30  ;;  %v4537_v23 = vld [vmem:[%s6270_s3 + $0xb4] ss:$8 sps:$4 sm:$0xff]  }
  0x26   :  { %207 = vmatpush1.bf16.msra.mxu1 %v4131_v10 }
  0x27   :  { %208 = vmatprep.subr.bf16.mxu1 %v4138_v11 }
  0x28   :  { %679 = vrot.lane.b32.xlu0 %v3321_v22, %s4036_s30  ;;  %v4532_v22 = vld [vmem:[%s6270_s3 + $0xa0] ss:$8 sps:$4 sm:$0xff]  }
  0x2a   :  { %209 = vmatpush1.bf16.msra.mxu1 %v4145_v12 }
  0x2b   :  { %210 = vmatprep.subr.bf16.mxu1 %v4152_v13 }
  0x2c   :  { %799 = vrot.lane.b32.xlu0 %v4219_v28, %s4037_s0  ;;  %v4569_v28 = vld [vmem:[%s6270_s3 + $0xd0] ss:$8 sps:$4 sm:$0xff]  }
  0x2e   :  { %211 = vmatpush1.bf16.msra.mxu1 %v4162_v15 }
  0x2f   :  { %212 = vmatprep.subr.bf16.mxu1 %v4169_v16 }
  0x32   :  { %213 = vmatpush1.bf16.msra.mxu1 %v4181_v20 }
  0x33   :  { %214 = vmatprep.subr.bf16.mxu1 %v4188_v21 }
  0x36   :  { %215 = vmatpush1.bf16.msra.mxu1 %v4195_v24 }
  0x37   :  { %216 = vmatprep.subr.bf16.mxu1 %v4202_v25 }
  0x3a   :  { %217 = vmatpush1.bf16.msra.mxu1 %v4214_v27 }
  0x3b   :  { %326 = vmatprep.subr.bf16.mxu1 %v4113_v5 }
  0x76   :  { %v196_v32 = vpop.permute.xlu0 %195 }
  0x77   :  { %v318_v33 = vpop.permute.xlu1 %317 }
  0x7a   :  { %v198_v34 = vpop.permute.xlu0 %197 }
  0x7b   :  { %v320_v35 = vpop.permute.xlu1 %319  ;;  %v200_v36 = vsel %vm199_vm1, %v196_v32, %v198_v34  ;;  %v4581_v32 = vld [vmem:[%s6270_s3 + $0xe0] ss:$8 sps:$4 sm:$0xff]   ;;  %v4590_v34 = vld [vmem:[%s6270_s3 + $0xf4] ss:$8 sps:$4 sm:$0xff]  }
  0x7c   :  { %3308 = vmatmul.mubr.msk.bf16.vlgmr.msra.gmra.mrb[4].mxu1 %vm136_vm0, %v200_v36  ;;  %v322_v42 = vsel %vm321_vm3, %v318_v33, %v320_v35  ;;  %v4585_v33 = vshrl.u32 %v56_v30, 7  ;;  %v4595_v35 = vld [vmem:[%s6270_s3 + $0xf0] ss:$8 sps:$4 sm:$0xff]  }
  0x7d   :  { %327 = vmatpush1.bf16.msra.mxu1 %v4118_v6  ;;  %358 = vmatprep.mubr.bf16.mxu1 %v6282_v2  ;;  %6426 = vst [vmem:[#allocation3_spill] sm:$0xff] %v4595_v35 }
  0x7e   :  { %328 = vmatprep.subr.bf16.mxu1 %v4123_v9  ;;  %v254_v38 = vpop.permute.xlu0 %253  ;;  %6425 = vst [vmem:[#allocation2_spill] sm:$0xff] %v4585_v33  ;;  %v6281_v36 = vsub.s32 0, %v4585_v33 }
  0x7f   :  { %v256_v37 = vpop.permute.xlu1 %255 }
  0x80   :  { %v258_v39 = vsel %vm257_vm2, %v254_v38, %v256_v37  ;;  %v4603_v37 = vld [vmem:[%s6270_s3 + $0x104] ss:$8 sps:$4 sm:$0xff]   ;;  %v54_v38 = vld [vmem:[%s6271_s2] sm:$0x3] }
  0x81   :  { %3309 = vmatmul.mubr.msk.bf16.vlgmr.msra.gmra.mrb[0].mxu0 %vm136_vm0, %v258_v39  ;;  %329 = vmatpush1.bf16.msra.mxu1 %v4131_v10  ;;  %6427 = vst [vmem:[#allocation4_spill] sm:$0xff] %v4603_v37  ;;  %v6280_v39 = vsub.s32 1, %v4585_v33  ;;  %v4817_v33 = vld [vmem:[%s6270_s3 + $0x160] ss:$8 sps:$4 sm:$0xff]  }
  0x82   :  { %385 = vmatpush1.bf16.msra.mxu0 %v4118_v6  ;;  %330 = vmatprep.subr.bf16.mxu1 %v4138_v11  ;;  %v376_v41 = vpop.permute.xlu0 %375  ;;  %6454 = vst [vmem:[#allocation31_spill] sm:$0xff] %v4817_v33 }
  0x83   :  { %386 = vmatprep.subr.bf16.mxu0 %v4123_v9  ;;  %416 = vmatprep.mubr.bf16.mxu0 %v6282_v2  ;;  %v378_v40 = vpop.permute.xlu1 %377 }
  0x84   :  { %v380_v43 = vsel %vm379_vm4, %v376_v41, %v378_v40  ;;  %v4612_v40 = vrot.slane %v54_v38, %v6281_v36  ;;  %v4802_v36 = vld [vmem:[%s6270_s3 + $0x150] ss:$8 sps:$4 sm:$0xff]  }
  0x85   :  { %331 = vmatpush1.bf16.msra.mxu1 %v4145_v12  ;;  %6452 = vst [vmem:[#allocation29_spill] sm:$0xff] %v4802_v36 }
  0x86   :  { %387 = vmatpush1.bf16.msra.mxu0 %v4131_v10  ;;  %332 = vmatprep.subr.bf16.mxu1 %v4152_v13  ;;  %v498_v45 = vpop.permute.xlu0 %497  ;;  %6428 = vst [vmem:[#allocation5_spill] sm:$0xff] %v4612_v40 }
  0x87   :  { %388 = vmatprep.subr.bf16.mxu0 %v4138_v11  ;;  %v500_v44 = vpop.permute.xlu1 %499 }
  0x88   :  { %v502_v51 = vsel %vm501_vm6, %v498_v45, %v500_v44 }
  0x89   :  { %333 = vmatpush1.bf16.msra.mxu1 %v4162_v15 }
  0x8a   :  { %389 = vmatpush1.bf16.msra.mxu0 %v4145_v12  ;;  %334 = vmatprep.subr.bf16.mxu1 %v4169_v16  ;;  %v620_v47 = vpop.permute.xlu0 %619 }
  0x8b   :  { %390 = vmatprep.subr.bf16.mxu0 %v4152_v13  ;;  %v622_v46 = vpop.permute.xlu1 %621 }
  0x8c   :  { %v624_v54 = vsel %vm623_vm7, %v620_v47, %v622_v46 }
  0x8d   :  { %335 = vmatpush1.bf16.msra.mxu1 %v4181_v20 }
  0x8e   :  { %391 = vmatpush1.bf16.msra.mxu0 %v4162_v15  ;;  %336 = vmatprep.subr.bf16.mxu1 %v4188_v21  ;;  %v440_v49 = vpop.permute.xlu0 %439 }
  0x8f   :  { %392 = vmatprep.subr.bf16.mxu0 %v4169_v16  ;;  %v442_v48 = vpop.permute.xlu1 %441 }
  0x90   :  { %v444_v50 = vsel %vm443_vm5, %v440_v49, %v442_v48 }
  0x91   :  { %337 = vmatpush1.bf16.msra.mxu1 %v4195_v24 }
  0x92   :  { %393 = vmatpush1.bf16.msra.mxu0 %v4181_v20  ;;  %338 = vmatprep.subr.bf16.mxu1 %v4202_v25  ;;  %v742_v52 = vpop.permute.xlu0 %741 }
  0x93   :  { %394 = vmatprep.subr.bf16.mxu0 %v4188_v21  ;;  %v744_v55 = vpop.permute.xlu1 %743 }
  0x94   :  { %v746_v59 = vsel %vm745_vm9, %v742_v52, %v744_v55  ;;  %v3769_v52 = vld [vmem:[%s6270_s3 + $0x304] ss:$8 sps:$4 sm:$0xff]  }
  0x95   :  { %339 = vmatpush1.bf16.msra.mxu1 %v4214_v27 }
  0x96   :  { %395 = vmatpush1.bf16.msra.mxu0 %v4195_v24  ;;  %448 = vmatprep.subr.bf16.mxu1 %v4113_v5  ;;  %v560_v53 = vpop.permute.xlu0 %559 }
  0x97   :  { %396 = vmatprep.subr.bf16.mxu0 %v4202_v25  ;;  %v678_v56 = vpop.permute.xlu1 %677 }
  0x98   :  { %3312 = vmatmul.mubr.msk.bf16.vlgmr.msra.gmra.mrb[8].mxu1 %vm136_vm0, %v322_v42  ;;  %v4616_v42 = vrot.slane %v54_v38, %v6280_v39  ;;  %v4795_v39 = vld [vmem:[%s6270_s3 + $0x154] ss:$8 sps:$4 sm:$0xff]  }
  0x99   :  { %449 = vmatpush1.bf16.msra.mxu1 %v4118_v6  ;;  %480 = vmatprep.mubr.bf16.mxu1 %v6282_v2  ;;  %6451 = vst [vmem:[#allocation28_spill] sm:$0xff] %v4795_v39 }
  0x9a   :  { %397 = vmatpush1.bf16.msra.mxu0 %v4214_v27  ;;  %450 = vmatprep.subr.bf16.mxu1 %v4123_v9  ;;  %v680_v57 = vpop.permute.xlu0 %679  ;;  %6429 = vst [vmem:[#allocation6_spill] sm:$0xff] %v4616_v42 }
  0x9b   :  { %506 = vmatprep.subr.bf16.mxu0 %v4113_v5  ;;  %v682_v58 = vsel %vm681_vm8, %v678_v56, %v680_v57 }
  0x9d   :  { %3313 = vmatmul.mubr.msk.bf16.vlgmr.msra.gmra.mrb[4].mxu0 %vm136_vm0, %v380_v43  ;;  %451 = vmatpush1.bf16.msra.mxu1 %v4131_v10 }
  0x9e   :  { %507 = vmatpush1.bf16.msra.mxu0 %v4118_v6  ;;  %452 = vmatprep.subr.bf16.mxu1 %v4138_v11 }
  0x9f   :  { %508 = vmatprep.subr.bf16.mxu0 %v4123_v9  ;;  %538 = vmatprep.mubr.bf16.mxu0 %v6282_v2 }
  0xa1   :  { %453 = vmatpush1.bf16.msra.mxu1 %v4145_v12 }
  0xa2   :  { %509 = vmatpush1.bf16.msra.mxu0 %v4131_v10  ;;  %454 = vmatprep.subr.bf16.mxu1 %v4152_v13 }
  0xa3   :  { %510 = vmatprep.subr.bf16.mxu0 %v4138_v11 }
  0xa5   :  { %455 = vmatpush1.bf16.msra.mxu1 %v4162_v15 }
  0xa6   :  { %511 = vmatpush1.bf16.msra.mxu0 %v4145_v12  ;;  %456 = vmatprep.subr.bf16.mxu1 %v4169_v16 }
  0xa7   :  { %512 = vmatprep.subr.bf16.mxu0 %v4152_v13 }
  0xa9   :  { %457 = vmatpush1.bf16.msra.mxu1 %v4181_v20 }
  0xaa   :  { %513 = vmatpush1.bf16.msra.mxu0 %v4162_v15  ;;  %458 = vmatprep.subr.bf16.mxu1 %v4188_v21 }
  0xab   :  { %514 = vmatprep.subr.bf16.mxu0 %v4169_v16 }
  0xad   :  { %459 = vmatpush1.bf16.msra.mxu1 %v4195_v24 }
  0xae   :  { %515 = vmatpush1.bf16.msra.mxu0 %v4181_v20  ;;  %460 = vmatprep.subr.bf16.mxu1 %v4202_v25 }
  0xaf   :  { %516 = vmatprep.subr.bf16.mxu0 %v4188_v21 }
  0xb1   :  { %461 = vmatpush1.bf16.msra.mxu1 %v4214_v27 }
  0xb2   :  { %517 = vmatpush1.bf16.msra.mxu0 %v4195_v24  ;;  %564 = vmatprep.subr.bf16.mxu1 %v4113_v5 }
  0xb3   :  { %518 = vmatprep.subr.bf16.mxu0 %v4202_v25 }
  0xb4   :  { %3316 = vmatmul.mubr.msk.bf16.vlgmr.msra.gmra.mrb[12].mxu1 %vm136_vm0, %v444_v50 }
  0xb5   :  { %565 = vmatpush1.bf16.msra.mxu1 %v4118_v6  ;;  %596 = vmatprep.mubr.bf16.mxu1 %v6282_v2 }
  0xb6   :  { %566 = vmatprep.subr.bf16.mxu1 %v4123_v9  ;;  %519 = vmatpush1.bf16.msra.mxu0 %v4214_v27 }
  0xb7   :  { %628 = vmatprep.subr.bf16.mxu0 %v4113_v5 }
  0xb9   :  { %567 = vmatpush1.bf16.msra.mxu1 %v4131_v10  ;;  %3317 = vmatmul.mubr.msk.bf16.vlgmr.msra.gmra.mrb[8].mxu0 %vm136_vm0, %v502_v51 }
  0xba   :  { %568 = vmatprep.subr.bf16.mxu1 %v4138_v11  ;;  %629 = vmatpush1.bf16.msra.mxu0 %v4118_v6 }
  0xbb   :  { %630 = vmatprep.subr.bf16.mxu0 %v4123_v9  ;;  %660 = vmatprep.mubr.bf16.mxu0 %v6282_v2 }
  0xbd   :  { %569 = vmatpush1.bf16.msra.mxu1 %v4145_v12 }
  0xbe   :  { %570 = vmatprep.subr.bf16.mxu1 %v4152_v13  ;;  %631 = vmatpush1.bf16.msra.mxu0 %v4131_v10 }
  0xbf   :  { %632 = vmatprep.subr.bf16.mxu0 %v4138_v11 }
  0xc1   :  { %571 = vmatpush1.bf16.msra.mxu1 %v4162_v15 }
  0xc2   :  { %572 = vmatprep.subr.bf16.mxu1 %v4169_v16  ;;  %633 = vmatpush1.bf16.msra.mxu0 %v4145_v12 }
  0xc3   :  { %634 = vmatprep.subr.bf16.mxu0 %v4152_v13 }
  0xc5   :  { %573 = vmatpush1.bf16.msra.mxu1 %v4181_v20 }
  0xc6   :  { %574 = vmatprep.subr.bf16.mxu1 %v4188_v21  ;;  %635 = vmatpush1.bf16.msra.mxu0 %v4162_v15 }
  0xc7   :  { %636 = vmatprep.subr.bf16.mxu0 %v4169_v16 }
  0xc9   :  { %575 = vmatpush1.bf16.msra.mxu1 %v4195_v24 }
  0xca   :  { %576 = vmatprep.subr.bf16.mxu1 %v4202_v25  ;;  %637 = vmatpush1.bf16.msra.mxu0 %v4181_v20 }
  0xcb   :  { %638 = vmatprep.subr.bf16.mxu0 %v4188_v21 }
  0xcd   :  { %577 = vmatpush1.bf16.msra.mxu1 %v4214_v27 }
  0xce   :  { %686 = vmatprep.subr.bf16.mxu1 %v4113_v5  ;;  %639 = vmatpush1.bf16.msra.mxu0 %v4195_v24 }
  0xcf   :  { %640 = vmatprep.subr.bf16.mxu0 %v4202_v25 }
  0xd0   :  { %3319 = vmatmul.mubr.msk.bf16.vlgmr.msra.gmra.mrb[16].mxu1 %vm136_vm0, %v560_v53 }
  0xd1   :  { %687 = vmatpush1.bf16.msra.mxu1 %v4118_v6  ;;  %718 = vmatprep.mubr.bf16.mxu1 %v6282_v2 }
  0xd2   :  { %688 = vmatprep.subr.bf16.mxu1 %v4123_v9  ;;  %641 = vmatpush1.bf16.msra.mxu0 %v4214_v27 }
  0xd3   :  { %750 = vmatprep.subr.bf16.mxu0 %v4113_v5 }
  0xd5   :  { %689 = vmatpush1.bf16.msra.mxu1 %v4131_v10  ;;  %3322 = vmatmul.mubr.msk.bf16.vlgmr.msra.gmra.mrb[12].mxu0 %vm136_vm0, %v624_v54 }
  0xd6   :  { %690 = vmatprep.subr.bf16.mxu1 %v4138_v11  ;;  %751 = vmatpush1.bf16.msra.mxu0 %v4118_v6 }
  0xd7   :  { %752 = vmatprep.subr.bf16.mxu0 %v4123_v9  ;;  %782 = vmatprep.mubr.bf16.mxu0 %v6282_v2 }
  0xd9   :  { %691 = vmatpush1.bf16.msra.mxu1 %v4145_v12 }
  0xda   :  { %692 = vmatprep.subr.bf16.mxu1 %v4152_v13  ;;  %753 = vmatpush1.bf16.msra.mxu0 %v4131_v10 }
  0xdb   :  { %754 = vmatprep.subr.bf16.mxu0 %v4138_v11 }
  0xdd   :  { %693 = vmatpush1.bf16.msra.mxu1 %v4162_v15 }
  0xde   :  { %694 = vmatprep.subr.bf16.mxu1 %v4169_v16  ;;  %755 = vmatpush1.bf16.msra.mxu0 %v4145_v12 }
  0xdf   :  { %756 = vmatprep.subr.bf16.mxu0 %v4152_v13 }
  0xe1   :  { %695 = vmatpush1.bf16.msra.mxu1 %v4181_v20 }
  0xe2   :  { %696 = vmatprep.subr.bf16.mxu1 %v4188_v21  ;;  %757 = vmatpush1.bf16.msra.mxu0 %v4162_v15 }
  0xe3   :  { %758 = vmatprep.subr.bf16.mxu0 %v4169_v16 }
  0xe5   :  { %697 = vmatpush1.bf16.msra.mxu1 %v4195_v24 }
  0xe6   :  { %698 = vmatprep.subr.bf16.mxu1 %v4202_v25  ;;  %759 = vmatpush1.bf16.msra.mxu0 %v4181_v20 }
  0xe7   :  { %760 = vmatprep.subr.bf16.mxu0 %v4188_v21 }
  0xe9   :  { %699 = vmatpush1.bf16.msra.mxu1 %v4214_v27 }
  0xea   :  { %761 = vmatpush1.bf16.msra.mxu0 %v4195_v24  ;;  %808 = vmatprep.subr.bf16.mxu1 %v4113_v5  ;;  %v4430_v5 = vld [vmem:[%s6270_s3 + $0x24] ss:$8 sps:$4 sm:$0xff]  }
  0xeb   :  { %762 = vmatprep.subr.bf16.mxu0 %v4202_v25 }
  0xec   :  { %3323 = vmatmul.mubr.msk.bf16.vlgmr.msra.gmra.mrb[20].mxu1 %vm136_vm0, %v682_v58 }
  0xed   :  { %809 = vmatpush1.bf16.msra.mxu1 %v4118_v6  ;;  %840 = vmatprep.mubr.bf16.mxu1 %v6282_v2  ;;  %v4437_v6 = vld [vmem:[%s6270_s3 + $0x20] ss:$8 sps:$4 sm:$0xff]  }
  0xee   :  { %763 = vmatpush1.bf16.msra.mxu0 %v4214_v27  ;;  %810 = vmatprep.subr.bf16.mxu1 %v4123_v9  ;;  %v4453_v9 = vld [vmem:[%s6270_s3 + $0x44] ss:$8 sps:$4 sm:$0xff]  }
  0xef   :  { %1535 = vmatprep.subr.bf16.mxu0 %v4408_v0 }
  0xf1   :  { %3326 = vmatmul.mubr.msk.bf16.vlgmr.msra.gmra.mrb[16].mxu0 %vm136_vm0, %v746_v59  ;;  %811 = vmatpush1.bf16.msra.mxu1 %v4131_v10  ;;  %v4460_v10 = vld [vmem:[%s6270_s3 + $0x40] ss:$8 sps:$4 sm:$0xff]  }
  0xf2   :  { %812 = vmatprep.subr.bf16.mxu1 %v4138_v11  ;;  %1536 = vmatpush1.bf16.msra.mxu0 %v4413_v1  ;;  %v4465_v11 = vld [vmem:[%s6270_s3 + $0x54] ss:$8 sps:$4 sm:$0xff]  }
  0xf3   :  { %1537 = vmatprep.subr.bf16.mxu0 %v4420_v3 }
  0xf4   :  { %v4392_v60 = vpop.f32.mrb[0].mxu1 }
  0xf5   :  { %v4394_v61 = vpop.f32.mrb[1].mxu1  ;;  %813 = vmatpush1.bf16.msra.mxu1 %v4145_v12  ;;  %v4472_v12 = vld [vmem:[%s6270_s3 + $0x50] ss:$8 sps:$4 sm:$0xff]  }
  0xf6   :  { %v178_v62 = vpop.f32.mrb[2].mxu1  ;;  %814 = vmatprep.subr.bf16.mxu1 %v4152_v13  ;;  %1538 = vmatpush1.bf16.msra.mxu0 %v4425_v4  ;;  %v4477_v13 = vld [vmem:[%s6270_s3 + $0x64] ss:$8 sps:$4 sm:$0xff]  }
  0xf7   :  { %v179_v63 = vpop.f32.mrb[3].mxu1  ;;  %1539 = vmatprep.subr.bf16.mxu0 %v4430_v5 }
  0xf9   :  { %815 = vmatpush1.bf16.msra.mxu1 %v4162_v15  ;;  %v4489_v15 = vld [vmem:[%s6270_s3 + $0x74] ss:$8 sps:$4 sm:$0xff]  }
  0xfa   :  { %816 = vmatprep.subr.bf16.mxu1 %v4169_v16  ;;  %1540 = vmatpush1.bf16.msra.mxu0 %v4437_v6  ;;  %v4498_v16 = vld [vmem:[%s6270_s3 + $0x70] ss:$8 sps:$4 sm:$0xff]  }
  0xfb   :  { %1541 = vmatprep.subr.bf16.mxu0 %v4443_v7 }
  0xfd   :  { %817 = vmatpush1.bf16.msra.mxu1 %v4181_v20  ;;  %v4520_v20 = vld [vmem:[%s6270_s3 + $0x90] ss:$8 sps:$4 sm:$0xff]  }
  0xfe   :  { %818 = vmatprep.subr.bf16.mxu1 %v4188_v21  ;;  %1542 = vmatpush1.bf16.msra.mxu0 %v4448_v8  ;;  %v4525_v21 = vld [vmem:[%s6270_s3 + $0xa4] ss:$8 sps:$4 sm:$0xff]  }
  0xff   :  { %1543 = vmatprep.subr.bf16.mxu0 %v4453_v9 }
 0x101   :  { %819 = vmatpush1.bf16.msra.mxu1 %v4195_v24  ;;  %v4545_v24 = vld [vmem:[%s6270_s3 + $0xb0] ss:$8 sps:$4 sm:$0xff]  }
 0x102   :  { %820 = vmatprep.subr.bf16.mxu1 %v4202_v25  ;;  %1544 = vmatpush1.bf16.msra.mxu0 %v4460_v10  ;;  %v4551_v25 = vld [vmem:[%s6270_s3 + $0xc4] ss:$8 sps:$4 sm:$0xff]  }
 0x103   :  { %1545 = vmatprep.subr.bf16.mxu0 %v4465_v11 }
 0x105   :  { %821 = vmatpush1.bf16.msra.mxu1 %v4214_v27  ;;  %v4564_v27 = vld [vmem:[%s6270_s3 + $0xd4] ss:$8 sps:$4 sm:$0xff]  }
 0x106   :  { %1546 = vmatpush1.bf16.msra.mxu0 %v4472_v12  ;;  %1658 = vmatprep.subr.bf16.mxu1 %v3769_v52 }
 0x107   :  { %1547 = vmatprep.subr.bf16.mxu0 %v4477_v13 }
 0x10a   :  { %1548 = vmatpush1.bf16.msra.mxu0 %v4484_v14 }
 0x10b   :  { %1549 = vmatprep.subr.bf16.mxu0 %v4489_v15 }
 0x10e   :  { %1550 = vmatpush1.bf16.msra.mxu0 %v4498_v16 }
 0x10f   :  { %1551 = vmatprep.subr.bf16.mxu0 %v4503_v17 }
 0x112   :  { %1552 = vmatpush1.bf16.msra.mxu0 %v4508_v18 }
 0x113   :  { %1553 = vmatprep.subr.bf16.mxu0 %v4513_v19 }
 0x116   :  { %1554 = vmatpush1.bf16.msra.mxu0 %v4520_v20 }
 0x117   :  { %1555 = vmatprep.subr.bf16.mxu0 %v4525_v21 }
 0x11a   :  { %1556 = vmatpush1.bf16.msra.mxu0 %v4532_v22 }
 0x11b   :  { %1557 = vmatprep.subr.bf16.mxu0 %v4537_v23 }
 0x11e   :  { %1558 = vmatpush1.bf16.msra.mxu0 %v4545_v24 }
 0x11f   :  { %1559 = vmatprep.subr.bf16.mxu0 %v4551_v25 }
 0x122   :  { %1560 = vmatpush1.bf16.msra.mxu0 %v4557_v26 }
 0x123   :  { %1561 = vmatprep.subr.bf16.mxu0 %v4564_v27 }
 0x126   :  { %1562 = vmatpush1.bf16.msra.mxu0 %v4569_v28 }
 0x127   :  { %1563 = vmatprep.subr.bf16.mxu0 %v4576_v31 }
 0x12a   :  { %1564 = vmatpush1.bf16.msra.mxu0 %v4581_v32 }
 0x12b   :  { %1565 = vmatprep.subr.bf16.mxu0 %v4590_v34 }
 0x12e   :  { %1566 = vmatpush1.bf16.msra.mxu0 %v4595_v35 }
 0x12f   :  { %1576 = vmatprep.subr.bf16.mxu0 %v4603_v37 }
 0x14f   :  { %v238_v41 = vpop.f32.mrb[4].mxu1 }
 0x150   :  { %v239_v43 = vadd.f32 %v238_v41, %v4612_v40  ;;  %v240_v44 = vpop.f32.mrb[5].mxu1 }
 0x151   :  { %v242_v45 = vpop.f32.mrb[6].mxu1  ;;  %v241_v47 = vadd.f32 %v240_v44, %v4616_v42 }
 0x152   :  { %vm245_vm10 = vcmp.gt.f32.partialorder %v239_v43, 0.0  ;;  %v247_v46 = vmul.f32 0.2, %v239_v43  ;;  %v243_v48 = vpop.f32.mrb[7].mxu1 }
 0x153   :  { %v248_v55 = vmul.f32 0.2, %v241_v47  ;;  %vm246_vm11 = vcmp.gt.f32.partialorder %v241_v47, 0.0 }
 0x154   :  { %v296_v49 = vpop.f32.mrb[0].mxu0  ;;  %v249_v50 = vsel %vm245_vm10, %v239_v43, %v247_v46 }
 0x155   :  { %v298_v51 = vpop.f32.mrb[1].mxu0  ;;  %v251_v53 = vpack.c.bf16 %v249_v50, %v249_v50  ;;  %v250_v57 = vsel %vm246_vm11, %v241_v47, %v248_v55  ;;  %v297_v59 = vadd.f32 %v296_v49, %v4612_v40 }
 0x156   :  { %v300_v54 = vpop.f32.mrb[2].mxu0  ;;  %v252_v58 = vpack.c.bf16 %v250_v57, %v250_v57  ;;  %v299_v38 = vadd.f32 %v298_v51, %v4616_v42 }
 0x157   :  { %v301_v56 = vpop.f32.mrb[3].mxu0  ;;  %859 = vrot.lane.b32.xlu1 %v251_v53, %s4034_s1  ;;  %v305_v44 = vmul.f32 0.2, %v297_v59  ;;  %vm303_vm13 = vcmp.gt.f32.partialorder %v297_v59, 0.0 }
 0x158   :  { %v306_v50 = vmul.f32 0.2, %v299_v38  ;;  %vm304_vm15 = vcmp.gt.f32.partialorder %v299_v38, 0.0 }
 0x159   :  { %v307_v55 = vsel %vm303_vm13, %v297_v59, %v305_v44 }
 0x15b   :  { %801 = vrot.lane.b32.xlu1 %v4221_v29, %s4037_s0  ;;  %s4038_s0 = smov 112  }
 0x15f   :  { %861 = vrot.lane.b32.xlu1 %v252_v58, %s4034_s1 }
 0x16b   :  { %v360_v62 = vpop.f32.mrb[8].mxu1 }
 0x16c   :  { %v361_v63 = vadd.f32 %v360_v62, %v4612_v40  ;;  %v362_v30 = vpop.f32.mrb[9].mxu1 }
 0x16d   :  { %v363_v41 = vadd.f32 %v362_v30, %v4616_v42  ;;  %v364_v43 = vpop.f32.mrb[10].mxu1 }
 0x16e   :  { %vm367_vm12 = vcmp.gt.f32.partialorder %v361_v63, 0.0  ;;  %v369_v45 = vmul.f32 0.2, %v361_v63  ;;  %v365_v46 = vpop.f32.mrb[11].mxu1 }
 0x16f   :  { %vm368_vm14 = vcmp.gt.f32.partialorder %v363_v41, 0.0  ;;  %v370_v29 = vmul.f32 0.2, %v363_v41 }
 0x170   :  { %v418_v47 = vpop.f32.mrb[4].mxu0  ;;  %v371_v48 = vsel %vm367_vm12, %v361_v63, %v369_v45  ;;  %v4635_v63 = vpack.c.bf16 %v307_v55, %v307_v55  ;;  %v308_v45 = vsel %vm304_vm15, %v299_v38, %v306_v50 }
 0x171   :  { %v419_v49 = vadd.f32 %v418_v47, %v4612_v40  ;;  %v420_v52 = vpop.f32.mrb[5].mxu0  ;;  %v373_v53 = vpack.c.bf16 %v371_v48, %v371_v48  ;;  %v372_v54 = vsel %vm368_vm14, %v363_v41, %v370_v29  ;;  %v4642_v41 = vpack.c.bf16 %v308_v45, %v308_v45 }
 0x172   :  { %v421_v51 = vadd.f32 %v420_v52, %v4616_v42  ;;  %v422_v56 = vpop.f32.mrb[6].mxu0  ;;  %v374_v57 = vpack.c.bf16 %v372_v54, %v372_v54 }
 0x173   :  { %vm425_vm1 = vcmp.gt.f32.partialorder %v419_v49, 0.0  ;;  %v427_v58 = vmul.f32 0.2, %v419_v49  ;;  %v423_v62 = vpop.f32.mrb[7].mxu0  ;;  %1707 = vrot.lane.b32.xlu1 %v373_v53, %s4034_s1 }
 0x174   :  { %876 = vrot.lane.b32.xlu0 %v374_v57, %s4038_s0  ;;  %v428_v43 = vmul.f32 0.2, %v421_v51  ;;  %vm426_vm2 = vcmp.gt.f32.partialorder %v421_v51, 0.0 }
 0x175   :  { %v429_v30 = vsel %vm425_vm1, %v419_v49, %v427_v58 }
 0x176   :  { %v4638_v59 = vpack.c.bf16 %v429_v30, %v429_v30  ;;  %v430_v44 = vsel %vm426_vm2, %v421_v51, %v428_v43  ;;  %vm803_vm2 = vcmask 195584  }
 0x177   :  { %874 = vrot.lane.b32.xlu1 %v373_v53, %s4038_s0  ;;  %v4646_v46 = vpack.c.bf16 %v430_v44, %v430_v44 }
 0x178   :  { %6430 = vst [vmem:[#allocation7_spill] sm:$0xff] %v4638_v59  ;;  %867 = vrot.lane.b32.xlu0 %v4635_v63, %s4030_s25 }
 0x179   :  { %6431 = vst [vmem:[#allocation8_spill] sm:$0xff] %v4646_v46 }
 0x17b   :  { %1715 = vrot.lane.b32.xlu1 %v4638_v59, %s4030_s25 }
 0x17c   :  { %869 = vrot.lane.b32.xlu0 %v4642_v41, %s4030_s25 }
 0x17f   :  { %1717 = vrot.lane.b32.xlu1 %v4646_v46, %s4030_s25 }
 0x180   :  { %1709 = vrot.lane.b32.xlu0 %v374_v57, %s4034_s1 }
 0x187   :  { %v482_v38 = vpop.f32.mrb[12].mxu1 }
 0x188   :  { %v483_v29 = vadd.f32 %v482_v38, %v4612_v40  ;;  %v484_v47 = vpop.f32.mrb[13].mxu1 }
 0x189   :  { %v485_v48 = vadd.f32 %v484_v47, %v4616_v42  ;;  %v486_v50 = vpop.f32.mrb[14].mxu1 }
 0x18a   :  { %vm489_vm3 = vcmp.gt.f32.partialorder %v483_v29, 0.0  ;;  %v491_v49 = vmul.f32 0.2, %v483_v29  ;;  %v487_v52 = vpop.f32.mrb[15].mxu1 }
 0x18b   :  { %vm490_vm5 = vcmp.gt.f32.partialorder %v485_v48, 0.0  ;;  %v492_v53 = vmul.f32 0.2, %v485_v48 }
 0x18c   :  { %v493_v54 = vsel %vm489_vm3, %v483_v29, %v491_v49  ;;  %v540_v58 = vpop.f32.mrb[8].mxu0 }
 0x18d   :  { %v495_v55 = vpack.c.bf16 %v493_v54, %v493_v54  ;;  %v494_v51 = vsel %vm490_vm5, %v485_v48, %v492_v53  ;;  %v541_v57 = vadd.f32 %v540_v58, %v4612_v40  ;;  %v542_v30 = vpop.f32.mrb[9].mxu0 }
 0x18e   :  { %v496_v56 = vpack.c.bf16 %v494_v51, %v494_v51  ;;  %v543_v43 = vadd.f32 %v542_v30, %v4616_v42  ;;  %v544_v45 = vpop.f32.mrb[10].mxu0 }
 0x18f   :  { %1915 = vrot.lane.b32.xlu0 %v495_v55, %s4034_s1  ;;  %vm547_vm6 = vcmp.gt.f32.partialorder %v541_v57, 0.0  ;;  %v549_v62 = vmul.f32 0.2, %v541_v57  ;;  %v545_v38 = vpop.f32.mrb[11].mxu0 }
 0x190   :  { %1724 = vrot.lane.b32.xlu1 %v496_v56, %s4038_s0  ;;  %vm548_vm8 = vcmp.gt.f32.partialorder %v543_v43, 0.0  ;;  %v550_v29 = vmul.f32 0.2, %v543_v43 }
 0x191   :  { %v551_v44 = vsel %vm547_vm6, %v541_v57, %v549_v62 }
 0x192   :  { %v4661_v47 = vpack.c.bf16 %v551_v44, %v551_v44  ;;  %v552_v48 = vsel %vm548_vm8, %v543_v43, %v550_v29 }
 0x193   :  { %1722 = vrot.lane.b32.xlu0 %v495_v55, %s4038_s0  ;;  %v4665_v50 = vpack.c.bf16 %v552_v48, %v552_v48 }
 0x194   :  { %6432 = vst [vmem:[#allocation9_spill] sm:$0xff] %v4661_v47  ;;  %1923 = vrot.lane.b32.xlu1 %v4661_v47, %s4030_s25  ;;  %v4831_v47 = vld [vmem:[%s6270_s3 + $0x170] ss:$8 sps:$4 sm:$0xff]  }
 0x195   :  { %6433 = vst [vmem:[#allocation10_spill] sm:$0xff] %v4665_v50  ;;  %6457 = vst [vmem:[#allocation34_spill] sm:$0xff] %v4831_v47 }
 0x197   :  { %1917 = vrot.lane.b32.xlu0 %v496_v56, %s4034_s1 }
 0x198   :  { %1925 = vrot.lane.b32.xlu1 %v4665_v50, %s4030_s25 }
 0x1a3   :  { %v598_v49 = vpop.f32.mrb[16].mxu1 }
 0x1a4   :  { %v599_v52 = vadd.f32 %v598_v49, %v4612_v40  ;;  %v600_v53 = vpop.f32.mrb[17].mxu1 }
 0x1a5   :  { %v601_v54 = vadd.f32 %v600_v53, %v4616_v42  ;;  %v602_v55 = vpop.f32.mrb[18].mxu1 }
 0x1a6   :  { %vm605_vm10 = vcmp.gt.f32.partialorder %v599_v52, 0.0  ;;  %v607_v51 = vmul.f32 0.2, %v599_v52  ;;  %v603_v56 = vpop.f32.mrb[19].mxu1 }
 0x1a7   :  { %vm606_vm11 = vcmp.gt.f32.partialorder %v601_v54, 0.0  ;;  %v608_v58 = vmul.f32 0.2, %v601_v54 }
 0x1a8   :  { %v609_v57 = vsel %vm605_vm10, %v599_v52, %v607_v51  ;;  %v662_v62 = vpop.f32.mrb[12].mxu0 }
 0x1a9   :  { %v611_v30 = vpack.c.bf16 %v609_v57, %v609_v57  ;;  %v610_v43 = vsel %vm606_vm11, %v601_v54, %v608_v58  ;;  %v663_v45 = vadd.f32 %v662_v62, %v4612_v40  ;;  %v664_v44 = vpop.f32.mrb[13].mxu0  ;;  %v177_v58 = vadd.f32 %v4394_v61, %v4616_v42 }
 0x1aa   :  { %v612_v38 = vpack.c.bf16 %v610_v43, %v610_v43  ;;  %v665_v29 = vadd.f32 %v664_v44, %v4616_v42  ;;  %v666_v48 = vpop.f32.mrb[14].mxu0  ;;  %v175_v57 = vadd.f32 %v4392_v60, %v4612_v40  ;;  %v4696_v60 = vld [vmem:[%s6270_s3 + $0x100] ss:$8 sps:$4 sm:$0xff]  }
 0x1ab   :  { %2123 = vrot.lane.b32.xlu0 %v611_v30, %s4034_s1  ;;  %vm669_vm12 = vcmp.gt.f32.partialorder %v663_v45, 0.0  ;;  %v671_v49 = vmul.f32 0.2, %v663_v45  ;;  %v667_v53 = vpop.f32.mrb[15].mxu0  ;;  %vm182_vm14 = vcmp.gt.f32.partialorder %v177_v58, 0.0 }
 0x1ac   :  { %vm670_vm13 = vcmp.gt.f32.partialorder %v665_v29, 0.0  ;;  %v672_v55 = vmul.f32 0.2, %v665_v29  ;;  %1932 = vrot.lane.b32.xlu1 %v612_v38, %s4038_s0  ;;  %v183_v44 = vmul.f32 0.2, %v175_v57  ;;  %vm181_vm1 = vcmp.gt.f32.partialorder %v175_v57, 0.0 }
 0x1ad   :  { %v673_v52 = vsel %vm669_vm12, %v663_v45, %v671_v49 }
 0x1ae   :  { %v4675_v51 = vpack.c.bf16 %v673_v52, %v673_v52  ;;  %v674_v54 = vsel %vm670_vm13, %v665_v29, %v672_v55  ;;  %v185_v49 = vsel %vm181_vm1, %v175_v57, %v183_v44  ;;  %v4709_v57 = vld [vmem:[%s6270_s3 + $0x300] ss:$8 sps:$4 sm:$0xff]   ;;  %v4726_v44 = vld [vmem:[%s6270_s3 + $0x124] ss:$8 sps:$4 sm:$0xff]  }
 0x1af   :  { %1930 = vrot.lane.b32.xlu0 %v611_v30, %s4038_s0  ;;  %v4680_v56 = vpack.c.bf16 %v674_v54, %v674_v54  ;;  %v184_v30 = vmul.f32 0.2, %v177_v58  ;;  %v187_v55 = vpack.c.bf16 %v185_v49, %v185_v49  ;;  %v4703_v54 = vld [vmem:[%s6270_s3 + $0x114] ss:$8 sps:$4 sm:$0xff]   ;;  %6437 = vst [vmem:[#allocation14_spill] sm:$0xff] %v4709_v57  ;;  %6440 = vst [vmem:[#allocation17_spill] sm:$0xff] %v4726_v44 }
 0x1b0   :  { %6434 = vst [vmem:[#allocation11_spill] sm:$0xff] %v4675_v51  ;;  %2131 = vrot.lane.b32.xlu1 %v4675_v51, %s4030_s25  ;;  %6436 = vst [vmem:[#allocation13_spill] sm:$0xff] %v4703_v54  ;;  %v4752_v49 = vld [vmem:[%s6270_s3 + $0x134] ss:$8 sps:$4 sm:$0xff]  }
 0x1b1   :  { %6435 = vst [vmem:[#allocation12_spill] sm:$0xff] %v4680_v56  ;;  %6444 = vst [vmem:[#allocation21_spill] sm:$0xff] %v4752_v49 }
 0x1b3   :  { %2125 = vrot.lane.b32.xlu0 %v612_v38, %s4034_s1  ;;  %v186_v38 = vsel %vm182_vm14, %v177_v58, %v184_v30  ;;  %v800_v58 = vpop.permute.xlu0 %799  ;;  %v4720_v30 = vld [vmem:[%s6270_s3 + $0x314] ss:$8 sps:$4 sm:$0xff]  }
 0x1b4   :  { %2133 = vrot.lane.b32.xlu1 %v4680_v56, %s4030_s25  ;;  %v188_v53 = vpack.c.bf16 %v186_v38, %v186_v38  ;;  %6439 = vst [vmem:[#allocation16_spill] sm:$0xff] %v4720_v30  ;;  %v4740_v38 = vld [vmem:[%s6270_s3 + $0x120] ss:$8 sps:$4 sm:$0xff]  }
 0x1b5   :  { %6442 = vst [vmem:[#allocation19_spill] sm:$0xff] %v4740_v38 }
 0x1bf   :  { %v720_v62 = vpop.f32.mrb[20].mxu1 }
 0x1c0   :  { %v721_v43 = vadd.f32 %v720_v62, %v4612_v40 }
 0x1c2   :  { %vm727_vm15 = vcmp.gt.f32.partialorder %v721_v43, 0.0  ;;  %v729_v45 = vmul.f32 0.2, %v721_v43 }
 0x1c4   :  { %v731_v29 = vsel %vm727_vm15, %v721_v43, %v729_v45  ;;  %v4715_v43 = vld [vmem:[%s6270_s3 + $0x110] ss:$8 sps:$4 sm:$0xff]  }
 0x1c5   :  { %v733_v48 = vpack.c.bf16 %v731_v29, %v731_v29  ;;  %6438 = vst [vmem:[#allocation15_spill] sm:$0xff] %v4715_v43  ;;  %v4733_v29 = vld [vmem:[%s6270_s3 + $0x310] ss:$8 sps:$4 sm:$0xff]  }
 0x1c6   :  { %6441 = vst [vmem:[#allocation18_spill] sm:$0xff] %v4733_v29 }
 0x1c7   :  { %2331 = vrot.lane.b32.xlu0 %v733_v48, %s4034_s1 }
 0x1c9   :  { %v4691_v61 = vpop.permute.xlu1 %859 }
 0x1ca   :  { %v884_v52 = vsel %vm745_vm9, %v188_v53, %v4691_v61  ;;  %v4758_v53 = vld [vmem:[%s6270_s3 + $0x320] ss:$8 sps:$4 sm:$0xff]  }
 0x1cb   :  { %1567 = vmatprep.mubr.bf16.mxu0 %v884_v52  ;;  %2138 = vrot.lane.b32.xlu0 %v733_v48, %s4038_s0  ;;  %v4746_v48 = vld [vmem:[%s6270_s3 + $0x324] ss:$8 sps:$4 sm:$0xff]   ;;  %6445 = vst [vmem:[#allocation22_spill] sm:$0xff] %v4758_v53  ;;  %v4770_v52 = vld [vmem:[%s6270_s3 + $0x334] ss:$8 sps:$4 sm:$0xff]  }
 0x1cc   :  { %1568 = vmatmul.mubr.bf16.vlgmr.msra.gmra.mrb[20].mxu0 %v187_v55  ;;  %6443 = vst [vmem:[#allocation20_spill] sm:$0xff] %v4746_v48  ;;  %v4764_v55 = vld [vmem:[%s6270_s3 + $0x130] ss:$8 sps:$4 sm:$0xff]   ;;  %6447 = vst [vmem:[#allocation24_spill] sm:$0xff] %v4770_v52 }
 0x1cd   :  { %1577 = vmatpush1.bf16.msra.mxu0 %v4696_v60  ;;  %v802_v62 = vpop.permute.xlu1 %801  ;;  %6446 = vst [vmem:[#allocation23_spill] sm:$0xff] %v4764_v55 }
 0x1ce   :  { %v804_v45 = vsel %vm803_vm2, %v800_v58, %v802_v62  ;;  %1578 = vmatprep.subr.bf16.mxu0 %v4703_v54  ;;  %v4776_v58 = vld [vmem:[%s6270_s3 + $0x144] ss:$8 sps:$4 sm:$0xff]   ;;  %v4782_v62 = vld [vmem:[%s6270_s3 + $0x330] ss:$8 sps:$4 sm:$0xff]  }
 0x1cf   :  { %3327 = vmatmul.mubr.msk.bf16.vlgmr.msra.gmra.mrb[24].mxu1 %vm136_vm0, %v804_v45  ;;  %6448 = vst [vmem:[#allocation25_spill] sm:$0xff] %v4776_v58  ;;  %6449 = vst [vmem:[#allocation26_spill] sm:$0xff] %v4782_v62  ;;  %v4788_v45 = vld [vmem:[%s6270_s3 + $0x140] ss:$8 sps:$4 sm:$0xff]  }
 0x1d0   :  { %1659 = vmatpush1.bf16.msra.mxu1 %v4709_v57  ;;  %1690 = vmatprep.mubr.bf16.mxu1 %v6282_v2  ;;  %6450 = vst [vmem:[#allocation27_spill] sm:$0xff] %v4788_v45  ;;  %v4809_v2 = vld [vmem:[%s6270_s3 + $0x164] ss:$8 sps:$4 sm:$0xff]  }
 0x1d1   :  { %1579 = vmatpush1.bf16.msra.mxu0 %v4715_v43  ;;  %1660 = vmatprep.subr.bf16.mxu1 %v4720_v30  ;;  %6453 = vst [vmem:[#allocation30_spill] sm:$0xff] %v4809_v2  ;;  %v4811_v51 = vpop.permute.xlu1 %861 }
 0x1d2   :  { %1580 = vmatprep.subr.bf16.mxu0 %v4726_v44 }
 0x1d4   :  { %1661 = vmatpush1.bf16.msra.mxu1 %v4733_v29 }
 0x1d5   :  { %1581 = vmatpush1.bf16.msra.mxu0 %v4740_v38  ;;  %1662 = vmatprep.subr.bf16.mxu1 %v4746_v48 }
 0x1d6   :  { %1582 = vmatprep.subr.bf16.mxu0 %v4752_v49 }
 0x1d8   :  { %1663 = vmatpush1.bf16.msra.mxu1 %v4758_v53  ;;  %v722_v53 = vpop.f32.mrb[21].mxu1 }
 0x1d9   :  { %1583 = vmatpush1.bf16.msra.mxu0 %v4764_v55  ;;  %1664 = vmatprep.subr.bf16.mxu1 %v4770_v52  ;;  %v4842_v52 = vld [vmem:[%s6270_s3 + $0x184] ss:$8 sps:$4 sm:$0xff]   ;;  %v723_v29 = vadd.f32 %v722_v53, %v4616_v42  ;;  %v724_v30 = vpop.f32.mrb[22].mxu1  ;;  %v4874_v53 = vld [vmem:[%s6270_s3 + $0x190] ss:$8 sps:$4 sm:$0xff]  }
 0x1da   :  { %1584 = vmatprep.subr.bf16.mxu0 %v4776_v58  ;;  %6458 = vst [vmem:[#allocation35_spill] sm:$0xff] %v4842_v52  ;;  %v784_v30 = vpop.f32.mrb[16].mxu0 }
 0x1db   :  { %v730_v59 = vmul.f32 0.2, %v723_v29  ;;  %vm728_vm3 = vcmp.gt.f32.partialorder %v723_v29, 0.0  ;;  %v786_v46 = vpop.f32.mrb[17].mxu0 }
 0x1dc   :  { %1665 = vmatpush1.bf16.msra.mxu1 %v4782_v62 }
 0x1dd   :  { %1585 = vmatpush1.bf16.msra.mxu0 %v4788_v45  ;;  %1743 = vmatprep.subr.bf16.mxu1 %v4408_v0  ;;  %v4823_v0 = vld [vmem:[%s6270_s3 + $0x174] ss:$8 sps:$4 sm:$0xff]  }
 0x1de   :  { %1586 = vmatprep.subr.bf16.mxu0 %v4795_v39  ;;  %6455 = vst [vmem:[#allocation32_spill] sm:$0xff] %v4823_v0 }
 0x1e1   :  { %1587 = vmatpush1.bf16.msra.mxu0 %v4802_v36 }
 0x1e2   :  { %1588 = vmatprep.subr.bf16.mxu0 %v4809_v2 }
 0x1e5   :  { %v4825_v56 = vpop.permute.xlu1 %1707  ;;  %1589 = vmatpush1.bf16.msra.mxu0 %v4817_v33 }
 0x1e6   :  { %6456 = vst [vmem:[#allocation33_spill] sm:$0xff] %v4825_v56  ;;  %v4833_v50 = vpop.permute.xlu0 %876  ;;  %1590 = vmatprep.subr.bf16.mxu0 %v4823_v0  ;;  %v1730_v62 = vsel %vm745_vm9, %v4642_v41, %v4825_v56  ;;  %v4854_v41 = vld [vmem:[%s6270_s3 + $0x180] ss:$8 sps:$4 sm:$0xff]   ;;  %v785_v56 = vadd.f32 %v784_v30, %v4612_v40 }
 0x1e7   :  { %3432 = vmatmul.mubr.msk.bf16.vlgmr.msra.gmra.mrb[28].mxu1 %vm623_vm7, %v4833_v50  ;;  %6459 = vst [vmem:[#allocation36_spill] sm:$0xff] %v4854_v41  ;;  %v4892_v40 = vld [vmem:[%s6270_s3 + $0x1a0] ss:$8 sps:$4 sm:$0xff]  }
 0x1e8   :  { %1744 = vmatpush1.bf16.msra.mxu1 %v4413_v1  ;;  %1775 = vmatprep.mubr.bf16.mxu1 %v1730_v62  ;;  %v4863_v1 = vld [vmem:[%s6270_s3 + $0x194] ss:$8 sps:$4 sm:$0xff]   ;;  %v725_v62 = vpop.f32.mrb[23].mxu1  ;;  %vm791_vm5 = vcmp.gt.f32.partialorder %v785_v56, 0.0  ;;  %6462 = vst [vmem:[#allocation39_spill] sm:$0xff] %v4892_v40 }
 0x1e9   :  { %v4847_v48 = vpop.permute.xlu1 %874  ;;  %1591 = vmatpush1.bf16.msra.mxu0 %v4831_v47  ;;  %1745 = vmatprep.subr.bf16.mxu1 %v4420_v3  ;;  %6461 = vst [vmem:[#allocation38_spill] sm:$0xff] %v4863_v1 }
 0x1ea   :  { %v4857_v57 = vpop.permute.xlu0 %867  ;;  %1592 = vmatprep.subr.bf16.mxu0 %v4842_v52  ;;  %v732_v52 = vsel %vm728_vm3, %v723_v29, %v730_v59  ;;  %vm2559_vm3 = vcmask 785408  }
 0x1eb   :  { %6460 = vst [vmem:[#allocation37_spill] sm:$0xff] %v4857_v57  ;;  %v889_v3 = vsel %vm379_vm4, %v4811_v51, %v4857_v57  ;;  %v734_v30 = vpack.c.bf16 %v732_v52, %v732_v52 }
 0x1ec   :  { %1746 = vmatpush1.bf16.msra.mxu1 %v4425_v4  ;;  %1608 = vmatprep.mubr.bf16.mxu0 %v889_v3  ;;  %v4883_v4 = vld [vmem:[%s6270_s3 + $0x1a4] ss:$8 sps:$4 sm:$0xff]   ;;  %v787_v3 = vadd.f32 %v786_v46, %v4616_v42 }
 0x1ed   :  { %1593 = vmatpush1.bf16.msra.mxu0 %v4854_v41  ;;  %1747 = vmatprep.subr.bf16.mxu1 %v4430_v5  ;;  %v4876_v62 = vpop.permute.xlu1 %1715  ;;  %v788_v5 = vpop.f32.mrb[18].mxu0  ;;  %v793_v41 = vmul.f32 0.2, %v785_v56 }
 0x1ee   :  { %1594 = vmatprep.subr.bf16.mxu0 %v4863_v1  ;;  %v789_v57 = vpop.f32.mrb[19].mxu0  ;;  %vm792_vm6 = vcmp.gt.f32.partialorder %v787_v3, 0.0  ;;  %v794_v47 = vmul.f32 0.2, %v787_v3  ;;  %2333 = vrot.lane.b32.xlu0 %v734_v30, %s4034_s1  ;;  %v4912_v5 = vld [vmem:[%s6270_s3 + $0x1b0] ss:$8 sps:$4 sm:$0xff]  }
 0x1ef   :  { %2140 = vrot.lane.b32.xlu1 %v734_v30, %s4038_s0  ;;  %v795_v57 = vsel %vm791_vm5, %v785_v56, %v793_v41  ;;  %6465 = vst [vmem:[#allocation42_spill] sm:$0xff] %v4912_v5  ;;  %v4978_v56 = vld [vmem:[%s6270_s3 + $0x204] ss:$8 sps:$4 sm:$0xff]   ;;  %v5054_v30 = vld [vmem:[%s6270_s3 + $0x240] ss:$8 sps:$4 sm:$0xff]   ;;  %vm4041_vm5 = vmmov 0  }
 0x1f0   :  { %1748 = vmatpush1.bf16.msra.mxu1 %v4437_v6  ;;  %v4898_v6 = vld [vmem:[%s6270_s3 + $0x1b4] ss:$8 sps:$4 sm:$0xff]   ;;  %v797_v52 = vpack.c.bf16 %v795_v57, %v795_v57  ;;  %v5070_v57 = vpop.permute.xlu0 %869 }
 0x1f1   :  { %1595 = vmatpush1.bf16.msra.mxu0 %v4874_v53  ;;  %1749 = vmatprep.subr.bf16.mxu1 %v4443_v7  ;;  %v1718_v46 = vpop.permute.xlu1 %1717  ;;  %6463 = vst [vmem:[#allocation40_spill] sm:$0xff] %v4898_v6  ;;  %v796_v7 = vsel %vm792_vm6, %v787_v3, %v794_v47  ;;  %v4918_v47 = vld [vmem:[%s6270_s3 + $0x1c4] ss:$8 sps:$4 sm:$0xff]   ;;  %v5007_v3 = vld [vmem:[%s6270_s3 + $0x210] ss:$8 sps:$4 sm:$0xff]  }
 0x1f2   :  { %1596 = vmatprep.subr.bf16.mxu0 %v4883_v4  ;;  %v4902_v59 = vsel %vm379_vm4, %v4876_v62, %v1718_v46  ;;  %v798_v29 = vpack.c.bf16 %v796_v7, %v796_v7  ;;  %6466 = vst [vmem:[#allocation43_spill] sm:$0xff] %v4918_v47  ;;  %v5060_v46 = vld [vmem:[%s6270_s3 + $0x254] ss:$8 sps:$4 sm:$0xff]   ;;  %v5068_v7 = vld [vmem:[%s6270_s3 + $0x250] ss:$8 sps:$4 sm:$0xff]  }
 0x1f3   :  { %6464 = vst [vmem:[#allocation41_spill] sm:$0xff] %v4902_v59  ;;  %2339 = vrot.lane.b32.xlu1 %v797_v52, %s4030_s25  ;;  %6476 = vst [vmem:[#allocation53_spill] sm:$0xff] %v5060_v46  ;;  %v5110_v59 = vld [vmem:[%s6270_s3 + $0x284] ss:$8 sps:$4 sm:$0xff]  }
 0x1f4   :  { %1750 = vmatpush1.bf16.msra.mxu1 %v4448_v8  ;;  %2341 = vrot.lane.b32.xlu0 %v798_v29, %s4030_s25  ;;  %v4928_v8 = vld [vmem:[%s6270_s3 + $0x1c0] ss:$8 sps:$4 sm:$0xff]   ;;  %v5076_v29 = vld [vmem:[%s6270_s3 + $0x264] ss:$8 sps:$4 sm:$0xff]   ;;  %6483 = vst [vmem:[#allocation60_spill] sm:$0xff] %v5110_v59 }
 0x1f5   :  { %1597 = vmatpush1.bf16.msra.mxu0 %v4892_v40  ;;  %1751 = vmatprep.subr.bf16.mxu1 %v4453_v9  ;;  %6467 = vst [vmem:[#allocation44_spill] sm:$0xff] %v4928_v8  ;;  %v4934_v9 = vld [vmem:[%s6270_s3 + $0x1d4] ss:$8 sps:$4 sm:$0xff]   ;;  %6477 = vst [vmem:[#allocation54_spill] sm:$0xff] %v5076_v29 }
 0x1f6   :  { %1598 = vmatprep.subr.bf16.mxu0 %v4898_v6  ;;  %6468 = vst [vmem:[#allocation45_spill] sm:$0xff] %v4934_v9 }
 0x1f8   :  { %1752 = vmatpush1.bf16.msra.mxu1 %v4460_v10  ;;  %v4942_v10 = vld [vmem:[%s6270_s3 + $0x1d0] ss:$8 sps:$4 sm:$0xff]  }
 0x1f9   :  { %1599 = vmatpush1.bf16.msra.mxu0 %v4912_v5  ;;  %1753 = vmatprep.subr.bf16.mxu1 %v4465_v11  ;;  %6469 = vst [vmem:[#allocation46_spill] sm:$0xff] %v4942_v10  ;;  %v4948_v11 = vld [vmem:[%s6270_s3 + $0x1e4] ss:$8 sps:$4 sm:$0xff]  }
 0x1fa   :  { %1600 = vmatprep.subr.bf16.mxu0 %v4918_v47  ;;  %6470 = vst [vmem:[#allocation47_spill] sm:$0xff] %v4948_v11 }
 0x1fc   :  { %1754 = vmatpush1.bf16.msra.mxu1 %v4472_v12  ;;  %v4956_v12 = vld [vmem:[%s6270_s3 + $0x1e0] ss:$8 sps:$4 sm:$0xff]  }
 0x1fd   :  { %1601 = vmatpush1.bf16.msra.mxu0 %v4928_v8  ;;  %1755 = vmatprep.subr.bf16.mxu1 %v4477_v13  ;;  %6471 = vst [vmem:[#allocation48_spill] sm:$0xff] %v4956_v12  ;;  %v4962_v13 = vld [vmem:[%s6270_s3 + $0x1f4] ss:$8 sps:$4 sm:$0xff]  }
 0x1fe   :  { %1602 = vmatprep.subr.bf16.mxu0 %v4934_v9  ;;  %6472 = vst [vmem:[#allocation49_spill] sm:$0xff] %v4962_v13 }
 0x200   :  { %1756 = vmatpush1.bf16.msra.mxu1 %v4484_v14  ;;  %v4970_v14 = vld [vmem:[%s6270_s3 + $0x1f0] ss:$8 sps:$4 sm:$0xff]  }
 0x201   :  { %1603 = vmatpush1.bf16.msra.mxu0 %v4942_v10  ;;  %1757 = vmatprep.subr.bf16.mxu1 %v4489_v15  ;;  %6473 = vst [vmem:[#allocation50_spill] sm:$0xff] %v4970_v14 }
 0x202   :  { %1604 = vmatprep.subr.bf16.mxu0 %v4948_v11  ;;  %v4972_v15 = vpop.permute.xlu1 %1724 }
 0x204   :  { %1758 = vmatpush1.bf16.msra.mxu1 %v4498_v16  ;;  %v4986_v16 = vld [vmem:[%s6270_s3 + $0x200] ss:$8 sps:$4 sm:$0xff]  }
 0x205   :  { %1605 = vmatpush1.bf16.msra.mxu0 %v4956_v12  ;;  %1759 = vmatprep.subr.bf16.mxu1 %v4503_v17  ;;  %v4992_v17 = vld [vmem:[%s6270_s3 + $0x214] ss:$8 sps:$4 sm:$0xff]  }
 0x206   :  { %1606 = vmatprep.subr.bf16.mxu0 %v4962_v13  ;;  %v4997_v41 = vpop.permute.xlu1 %1923 }
 0x207   :  { %6474 = vst [vmem:[#allocation51_spill] sm:$0xff] %v4997_v41 }
 0x208   :  { %1760 = vmatpush1.bf16.msra.mxu1 %v4508_v18  ;;  %v863_v18 = vsel %vm745_vm9, %v4691_v61, %v4811_v51  ;;  %v5032_v61 = vld [vmem:[%s6270_s3 + $0x234] ss:$8 sps:$4 sm:$0xff]  }
 0x209   :  { %1607 = vmatpush1.bf16.msra.mxu0 %v4970_v14  ;;  %1761 = vmatprep.subr.bf16.mxu1 %v4513_v19  ;;  %v879_v19 = vsel %vm136_vm0, %v4847_v48, %v4833_v50 }
 0x20a   :  { %1617 = vmatprep.subr.bf16.mxu0 %v4978_v56  ;;  %v1926_v51 = vpop.permute.xlu1 %1925 }
 0x20b   :  { %v5019_v50 = vsel %vm379_vm4, %v4997_v41, %v1926_v51 }
 0x20c   :  { %1762 = vmatpush1.bf16.msra.mxu1 %v4520_v20  ;;  %1609 = vmatmul.mubr.bf16.vlgmr.msra.gmra.mrb[20].mxu0 %v863_v18  ;;  %v5014_v20 = vld [vmem:[%s6270_s3 + $0x224] ss:$8 sps:$4 sm:$0xff]   ;;  %6475 = vst [vmem:[#allocation52_spill] sm:$0xff] %v5019_v50  ;;  %v5086_v18 = vld [vmem:[%s6270_s3 + $0x260] ss:$8 sps:$4 sm:$0xff]   ;;  %v5096_v50 = vpop.permute.xlu0 %1709 }
 0x20d   :  { %1618 = vmatpush1.bf16.msra.mxu0 %v4986_v16  ;;  %1649 = vmatprep.mubr.bf16.mxu0 %v879_v19  ;;  %6479 = vst [vmem:[#allocation56_spill] sm:$0xff] %v5086_v18  ;;  %v5092_v19 = vld [vmem:[%s6270_s3 + $0x274] ss:$8 sps:$4 sm:$0xff]   ;;  %v1734_v41 = vsel %vm379_vm4, %v5096_v50, %v4876_v62  ;;  %v5146_v62 = vld [vmem:[%s6270_s3 + $0x2a4] ss:$8 sps:$4 sm:$0xff]  }
 0x20e   :  { %1763 = vmatprep.subr.bf16.mxu1 %v4525_v21  ;;  %1619 = vmatprep.subr.bf16.mxu0 %v4992_v17  ;;  %v5026_v21 = vld [vmem:[%s6270_s3 + $0x220] ss:$8 sps:$4 sm:$0xff]   ;;  %6480 = vst [vmem:[#allocation57_spill] sm:$0xff] %v5092_v19  ;;  %6488 = vst [vmem:[#allocation65_spill] sm:$0xff] %v5146_v62 }
 0x210   :  { %1764 = vmatpush1.bf16.msra.mxu1 %v4532_v22  ;;  %v5040_v22 = vld [vmem:[%s6270_s3 + $0x230] ss:$8 sps:$4 sm:$0xff]  }
 0x211   :  { %1620 = vmatpush1.bf16.msra.mxu0 %v5007_v3  ;;  %1765 = vmatprep.subr.bf16.mxu1 %v4537_v23  ;;  %v5046_v23 = vld [vmem:[%s6270_s3 + $0x244] ss:$8 sps:$4 sm:$0xff]  }
 0x212   :  { %1621 = vmatprep.subr.bf16.mxu0 %v5014_v20 }
 0x214   :  { %1766 = vmatpush1.bf16.msra.mxu1 %v4545_v24 }
 0x215   :  { %1622 = vmatpush1.bf16.msra.mxu0 %v5026_v21  ;;  %1767 = vmatprep.subr.bf16.mxu1 %v4551_v25 }
 0x216   :  { %1623 = vmatprep.subr.bf16.mxu0 %v5032_v61 }
 0x218   :  { %1768 = vmatpush1.bf16.msra.mxu1 %v4557_v26 }
 0x219   :  { %1624 = vmatpush1.bf16.msra.mxu0 %v5040_v22  ;;  %1769 = vmatprep.subr.bf16.mxu1 %v4564_v27 }
 0x21a   :  { %1625 = vmatprep.subr.bf16.mxu0 %v5046_v23 }
 0x21c   :  { %1770 = vmatpush1.bf16.msra.mxu1 %v4569_v28 }
 0x21d   :  { %1626 = vmatpush1.bf16.msra.mxu0 %v5054_v30  ;;  %1771 = vmatprep.subr.bf16.mxu1 %v4576_v31 }
 0x21e   :  { %1627 = vmatprep.subr.bf16.mxu0 %v5060_v46  ;;  %v5078_v52 = vpop.permute.xlu1 %1932 }
 0x21f   :  { %6478 = vst [vmem:[#allocation55_spill] sm:$0xff] %v5078_v52  ;;  %v5104_v52 = vld [vmem:[%s6270_s3 + $0x270] ss:$8 sps:$4 sm:$0xff]  }
 0x220   :  { %1772 = vmatpush1.bf16.msra.mxu1 %v4581_v32  ;;  %6482 = vst [vmem:[#allocation59_spill] sm:$0xff] %v5104_v52 }
 0x221   :  { %1628 = vmatpush1.bf16.msra.mxu0 %v5068_v7  ;;  %1773 = vmatprep.subr.bf16.mxu1 %v4590_v34 }
 0x222   :  { %1629 = vmatprep.subr.bf16.mxu0 %v5076_v29  ;;  %v5094_v51 = vpop.permute.xlu1 %2131 }
 0x223   :  { %6481 = vst [vmem:[#allocation58_spill] sm:$0xff] %v5094_v51 }
 0x224   :  { %1774 = vmatpush1.bf16.msra.mxu1 %v4595_v35  ;;  %v5126_v35 = vld [vmem:[%s6270_s3 + $0x280] ss:$8 sps:$4 sm:$0xff]  }
 0x225   :  { %1630 = vmatpush1.bf16.msra.mxu0 %v5086_v18  ;;  %1784 = vmatprep.subr.bf16.mxu1 %v4603_v37  ;;  %6485 = vst [vmem:[#allocation62_spill] sm:$0xff] %v5126_v35 }
 0x226   :  { %1631 = vmatprep.subr.bf16.mxu0 %v5092_v19  ;;  %v2134_v42 = vpop.permute.xlu1 %2133 }
 0x227   :  { %1776 = vmatmul.mubr.bf16.vlgmr.msra.gmra.mrb[32].mxu1 %v4635_v63  ;;  %v5118_v37 = vsel %vm379_vm4, %v5094_v51, %v2134_v42  ;;  %v5132_v63 = vld [vmem:[%s6270_s3 + $0x294] ss:$8 sps:$4 sm:$0xff]   ;;  %v5140_v42 = vld [vmem:[%s6270_s3 + $0x290] ss:$8 sps:$4 sm:$0xff]  }
 0x228   :  { %6484 = vst [vmem:[#allocation61_spill] sm:$0xff] %v5118_v37  ;;  %1785 = vmatpush1.bf16.msra.mxu1 %v4696_v60  ;;  %1816 = vmatprep.mubr.bf16.mxu1 %v1734_v41  ;;  %6486 = vst [vmem:[#allocation63_spill] sm:$0xff] %v5132_v63  ;;  %v5154_v41 = vld [vmem:[%s6270_s3 + $0x2a0] ss:$8 sps:$4 sm:$0xff]   ;;  %v5160_v37 = vld [vmem:[%s6270_s3 + $0x2b4] ss:$8 sps:$4 sm:$0xff]  }
 0x229   :  { %1632 = vmatpush1.bf16.msra.mxu0 %v5104_v52  ;;  %1786 = vmatprep.subr.bf16.mxu1 %v4703_v54  ;;  %6487 = vst [vmem:[#allocation64_spill] sm:$0xff] %v5140_v42  ;;  %6489 = vst [vmem:[#allocation66_spill] sm:$0xff] %v5154_v41  ;;  %v5168_v51 = vld [vmem:[%s6270_s3 + $0x2b0] ss:$8 sps:$4 sm:$0xff]  }
 0x22a   :  { %1633 = vmatprep.subr.bf16.mxu0 %v5110_v59  ;;  %6490 = vst [vmem:[#allocation67_spill] sm:$0xff] %v5160_v37  ;;  %6491 = vst [vmem:[#allocation68_spill] sm:$0xff] %v5168_v51 }
 0x22c   :  { %1787 = vmatpush1.bf16.msra.mxu1 %v4715_v43 }
 0x22d   :  { %1634 = vmatpush1.bf16.msra.mxu0 %v5126_v35  ;;  %1788 = vmatprep.subr.bf16.mxu1 %v4726_v44 }
 0x22e   :  { %1635 = vmatprep.subr.bf16.mxu0 %v5132_v63 }
 0x230   :  { %1789 = vmatpush1.bf16.msra.mxu1 %v4740_v38 }
 0x231   :  { %1636 = vmatpush1.bf16.msra.mxu0 %v5140_v42  ;;  %1790 = vmatprep.subr.bf16.mxu1 %v4752_v49  ;;  %v5174_v49 = vld [vmem:[%s6270_s3 + $0x2c4] ss:$8 sps:$4 sm:$0xff]  }
 0x232   :  { %1637 = vmatprep.subr.bf16.mxu0 %v5146_v62  ;;  %6492 = vst [vmem:[#allocation69_spill] sm:$0xff] %v5174_v49 }
 0x234   :  { %1791 = vmatpush1.bf16.msra.mxu1 %v4764_v55  ;;  %v5188_v55 = vld [vmem:[%s6270_s3 + $0x2d4] ss:$8 sps:$4 sm:$0xff]  }
 0x235   :  { %1638 = vmatpush1.bf16.msra.mxu0 %v5154_v41  ;;  %1792 = vmatprep.subr.bf16.mxu1 %v4776_v58  ;;  %v5182_v58 = vld [vmem:[%s6270_s3 + $0x2c0] ss:$8 sps:$4 sm:$0xff]   ;;  %6494 = vst [vmem:[#allocation71_spill] sm:$0xff] %v5188_v55 }
 0x236   :  { %1639 = vmatprep.subr.bf16.mxu0 %v5160_v37  ;;  %6493 = vst [vmem:[#allocation70_spill] sm:$0xff] %v5182_v58 }
 0x238   :  { %1793 = vmatpush1.bf16.msra.mxu1 %v4788_v45  ;;  %v5202_v45 = vld [vmem:[%s6270_s3 + $0x2e4] ss:$8 sps:$4 sm:$0xff]  }
 0x239   :  { %1640 = vmatpush1.bf16.msra.mxu0 %v5168_v51  ;;  %1794 = vmatprep.subr.bf16.mxu1 %v4795_v39  ;;  %v5196_v39 = vld [vmem:[%s6270_s3 + $0x2d0] ss:$8 sps:$4 sm:$0xff]   ;;  %6496 = vst [vmem:[#allocation73_spill] sm:$0xff] %v5202_v45 }
 0x23a   :  { %1641 = vmatprep.subr.bf16.mxu0 %v5174_v49  ;;  %6495 = vst [vmem:[#allocation72_spill] sm:$0xff] %v5196_v39  ;;  %v5231_v49 = vpop.permute.xlu0 %1915 }
 0x23c   :  { %1795 = vmatpush1.bf16.msra.mxu1 %v4802_v36  ;;  %v5216_v36 = vld [vmem:[%s6270_s3 + $0x2f4] ss:$8 sps:$4 sm:$0xff]  }
 0x23d   :  { %1642 = vmatpush1.bf16.msra.mxu0 %v5182_v58  ;;  %1796 = vmatprep.subr.bf16.mxu1 %v4809_v2  ;;  %v5210_v2 = vld [vmem:[%s6270_s3 + $0x2e0] ss:$8 sps:$4 sm:$0xff]   ;;  %6498 = vst [vmem:[#allocation75_spill] sm:$0xff] %v5216_v36  ;;  %v6503_v58 = vld [vmem:[#allocation36_spill] sm:$0xff] }
 0x23e   :  { %1643 = vmatprep.subr.bf16.mxu0 %v5188_v55  ;;  %6497 = vst [vmem:[#allocation74_spill] sm:$0xff] %v5210_v2  ;;  %v6499_v55 = vld [vmem:[#allocation34_spill] sm:$0xff] }
 0x240   :  { %1797 = vmatpush1.bf16.msra.mxu1 %v4817_v33  ;;  %v6500_v33 = vld [vmem:[#allocation35_spill] sm:$0xff] }
 0x241   :  { %1644 = vmatpush1.bf16.msra.mxu0 %v5196_v39  ;;  %1798 = vmatprep.subr.bf16.mxu1 %v4823_v0  ;;  %v5224_v0 = vld [vmem:[%s6270_s3 + $0x2f0] ss:$8 sps:$4 sm:$0xff]  }
 0x242   :  { %1645 = vmatprep.subr.bf16.mxu0 %v5202_v45  ;;  %6501 = vst [vmem:[#allocation76_spill] sm:$0xff] %v5224_v0  ;;  %v6502_v45 = vld [vmem:[#allocation37_spill] sm:$0xff] }
 0x243   :  { %v871_v39 = vsel %vm379_vm4, %v6502_v45, %v5070_v57  ;;  %6504 = vst [vmem:[#allocation37_spill] sm:$0xff] %v5231_v49  ;;  %v6505_v45 = vld [vmem:[#allocation8_spill] sm:$0xff] }
 0x244   :  { %1799 = vmatpush1.bf16.msra.mxu1 %v6499_v55  ;;  %v893_v55 = vsel %vm136_vm0, %v871_v39, %v4847_v48  ;;  %v1938_v57 = vsel %vm745_vm9, %v6505_v45, %v5231_v49  ;;  %v5257_v39 = vld [vmem:[%s6270_s3 + $0x14] ss:$8 sps:$4 sm:$0xff]   ;;  %v5264_v48 = vld [vmem:[%s6270_s3 + $0x10] ss:$8 sps:$4 sm:$0xff]   ;;  %v5278_v45 = vld [vmem:[%s6270_s3 + $0x20] ss:$8 sps:$4 sm:$0xff]  }
 0x245   :  { %1646 = vmatpush1.bf16.msra.mxu0 %v5210_v2  ;;  %1800 = vmatprep.subr.bf16.mxu1 %v6500_v33  ;;  %v5238_v33 = vld [vmem:[%s6270_s3 + $0x4] ss:$8 sps:$4 sm:$0xff]   ;;  %6506 = vst [vmem:[#allocation36_spill] sm:$0xff] %v5278_v45  ;;  %v5292_v49 = vld [vmem:[%s6270_s3 + $0x30] ss:$8 sps:$4 sm:$0xff]  }
 0x246   :  { %1647 = vmatprep.subr.bf16.mxu0 %v5216_v36  ;;  %6508 = vst [vmem:[#allocation77_spill] sm:$0xff] %v5292_v49 }
 0x248   :  { %1801 = vmatpush1.bf16.msra.mxu1 %v6503_v58 }
 0x249   :  { %1648 = vmatpush1.bf16.msra.mxu0 %v5224_v0  ;;  %1802 = vmatprep.subr.bf16.mxu1 %v4863_v1  ;;  %v5250_v1 = vld [vmem:[%s6270_s3] ss:$8 sps:$4 sm:$0xff]  }
 0x24a   :  { %1951 = vmatprep.subr.bf16.mxu0 %v5238_v33 }
 0x24c   :  { %1803 = vmatpush1.bf16.msra.mxu1 %v4874_v53  ;;  %1650 = vmatmul.mubr.bf16.vlgmr.msra.gmra.mrb[20].mxu0 %v893_v55  ;;  %v5271_v55 = vld [vmem:[%s6270_s3 + $0x24] ss:$8 sps:$4 sm:$0xff]  }
 0x24d   :  { %1952 = vmatpush1.bf16.msra.mxu0 %v5250_v1  ;;  %1983 = vmatprep.mubr.bf16.mxu0 %v1938_v57  ;;  %v5285_v57 = vld [vmem:[%s6270_s3 + $0x34] ss:$8 sps:$4 sm:$0xff]  }
 0x24e   :  { %1804 = vmatprep.subr.bf16.mxu1 %v4883_v4  ;;  %1953 = vmatprep.subr.bf16.mxu0 %v5257_v39  ;;  %6507 = vst [vmem:[#allocation8_spill] sm:$0xff] %v5285_v57 }
 0x250   :  { %1805 = vmatpush1.bf16.msra.mxu1 %v4892_v40 }
 0x251   :  { %1954 = vmatpush1.bf16.msra.mxu0 %v5264_v48  ;;  %1806 = vmatprep.subr.bf16.mxu1 %v4898_v6 }
 0x252   :  { %1955 = vmatprep.subr.bf16.mxu0 %v5271_v55 }
 0x254   :  { %1807 = vmatpush1.bf16.msra.mxu1 %v4912_v5 }
 0x255   :  { %1956 = vmatpush1.bf16.msra.mxu0 %v5278_v45  ;;  %1808 = vmatprep.subr.bf16.mxu1 %v4918_v47  ;;  %v5299_v45 = vld [vmem:[%s6270_s3 + $0x44] ss:$8 sps:$4 sm:$0xff]  }
 0x256   :  { %1957 = vmatprep.subr.bf16.mxu0 %v5285_v57  ;;  %6509 = vst [vmem:[#allocation78_spill] sm:$0xff] %v5299_v45  ;;  %v5306_v57 = vld [vmem:[%s6270_s3 + $0x40] ss:$8 sps:$4 sm:$0xff]  }
 0x257   :  { %6510 = vst [vmem:[#allocation79_spill] sm:$0xff] %v5306_v57 }
 0x258   :  { %1809 = vmatpush1.bf16.msra.mxu1 %v4928_v8 }
 0x259   :  { %1958 = vmatpush1.bf16.msra.mxu0 %v5292_v49  ;;  %1810 = vmatprep.subr.bf16.mxu1 %v4934_v9  ;;  %v5313_v49 = vld [vmem:[%s6270_s3 + $0x54] ss:$8 sps:$4 sm:$0xff]  }
 0x25a   :  { %1959 = vmatprep.subr.bf16.mxu0 %v5299_v45  ;;  %6511 = vst [vmem:[#allocation80_spill] sm:$0xff] %v5313_v49  ;;  %v5320_v45 = vld [vmem:[%s6270_s3 + $0x50] ss:$8 sps:$4 sm:$0xff]  }
 0x25b   :  { %6512 = vst [vmem:[#allocation81_spill] sm:$0xff] %v5320_v45 }
 0x25c   :  { %1811 = vmatpush1.bf16.msra.mxu1 %v4942_v10 }
 0x25d   :  { %1960 = vmatpush1.bf16.msra.mxu0 %v5306_v57  ;;  %1812 = vmatprep.subr.bf16.mxu1 %v4948_v11  ;;  %v5327_v57 = vld [vmem:[%s6270_s3 + $0x64] ss:$8 sps:$4 sm:$0xff]   ;;  %v5330_v11 = vpop.permute.xlu0 %1722 }
 0x25e   :  { %1961 = vmatprep.subr.bf16.mxu0 %v5313_v49  ;;  %6513 = vst [vmem:[#allocation82_spill] sm:$0xff] %v5327_v57  ;;  %v5336_v49 = vld [vmem:[%s6270_s3 + $0x60] ss:$8 sps:$4 sm:$0xff]  }
 0x25f   :  { %6514 = vst [vmem:[#allocation83_spill] sm:$0xff] %v5336_v49 }
 0x260   :  { %1813 = vmatpush1.bf16.msra.mxu1 %v4956_v12 }
 0x261   :  { %1962 = vmatpush1.bf16.msra.mxu0 %v5320_v45  ;;  %1814 = vmatprep.subr.bf16.mxu1 %v4962_v13  ;;  %v1726_v45 = vsel %vm136_vm0, %v5330_v11, %v4972_v15  ;;  %v6515_v13 = vld [vmem:[#allocation33_spill] sm:$0xff] }
 0x262   :  { %1963 = vmatprep.subr.bf16.mxu0 %v5327_v57  ;;  %v1711_v57 = vsel %vm745_vm9, %v6515_v13, %v5096_v50  ;;  %v5363_v13 = vld [vmem:[%s6270_s3 + $0x84] ss:$8 sps:$4 sm:$0xff]   ;;  %v5370_v50 = vld [vmem:[%s6270_s3 + $0x80] ss:$8 sps:$4 sm:$0xff]  }
 0x263   :  { %6516 = vst [vmem:[#allocation33_spill] sm:$0xff] %v5370_v50 }
 0x264   :  { %1815 = vmatpush1.bf16.msra.mxu1 %v4970_v14  ;;  %v5349_v14 = vld [vmem:[%s6270_s3 + $0x74] ss:$8 sps:$4 sm:$0xff]  }
 0x265   :  { %1964 = vmatpush1.bf16.msra.mxu0 %v5336_v49  ;;  %1825 = vmatprep.subr.bf16.mxu1 %v4978_v56  ;;  %v5356_v49 = vld [vmem:[%s6270_s3 + $0x70] ss:$8 sps:$4 sm:$0xff]  }
 0x266   :  { %1965 = vmatprep.subr.bf16.mxu0 %v5349_v14 }
 0x267   :  { %1817 = vmatmul.mubr.bf16.vlgmr.msra.gmra.mrb[32].mxu1 %v1711_v57  ;;  %v5384_v57 = vld [vmem:[%s6270_s3 + $0x90] ss:$8 sps:$4 sm:$0xff]  }
 0x268   :  { %1826 = vmatpush1.bf16.msra.mxu1 %v4986_v16  ;;  %1857 = vmatprep.mubr.bf16.mxu1 %v1726_v45  ;;  %v5377_v45 = vld [vmem:[%s6270_s3 + $0x94] ss:$8 sps:$4 sm:$0xff]   ;;  %6518 = vst [vmem:[#allocation85_spill] sm:$0xff] %v5384_v57 }
 0x269   :  { %1966 = vmatpush1.bf16.msra.mxu0 %v5356_v49  ;;  %1827 = vmatprep.subr.bf16.mxu1 %v4992_v17  ;;  %6517 = vst [vmem:[#allocation84_spill] sm:$0xff] %v5377_v45 }
 0x26a   :  { %1967 = vmatprep.subr.bf16.mxu0 %v5363_v13 }
 0x26c   :  { %1828 = vmatpush1.bf16.msra.mxu1 %v5007_v3 }
 0x26d   :  { %1968 = vmatpush1.bf16.msra.mxu0 %v5370_v50  ;;  %1829 = vmatprep.subr.bf16.mxu1 %v5014_v20  ;;  %v5391_v50 = vld [vmem:[%s6270_s3 + $0xa4] ss:$8 sps:$4 sm:$0xff]  }
 0x26e   :  { %1969 = vmatprep.subr.bf16.mxu0 %v5377_v45  ;;  %v5398_v45 = vld [vmem:[%s6270_s3 + $0xa0] ss:$8 sps:$4 sm:$0xff]  }
 0x270   :  { %1830 = vmatpush1.bf16.msra.mxu1 %v5026_v21 }
 0x271   :  { %1970 = vmatpush1.bf16.msra.mxu0 %v5384_v57  ;;  %1831 = vmatprep.subr.bf16.mxu1 %v5032_v61  ;;  %v5405_v57 = vld [vmem:[%s6270_s3 + $0xb4] ss:$8 sps:$4 sm:$0xff]  }
 0x272   :  { %1971 = vmatprep.subr.bf16.mxu0 %v5391_v50 }
 0x274   :  { %1832 = vmatpush1.bf16.msra.mxu1 %v5040_v22 }
 0x275   :  { %1972 = vmatpush1.bf16.msra.mxu0 %v5398_v45  ;;  %1833 = vmatprep.subr.bf16.mxu1 %v5046_v23 }
 0x276   :  { %1973 = vmatprep.subr.bf16.mxu0 %v5405_v57 }
 0x278   :  { %1834 = vmatpush1.bf16.msra.mxu1 %v5054_v30 }
 0x279   :  { %1974 = vmatpush1.bf16.msra.mxu0 %v4545_v24  ;;  %1835 = vmatprep.subr.bf16.mxu1 %v5060_v46  ;;  %v6519_v24 = vld [vmem:[#allocation3_spill] sm:$0xff] }
 0x27a   :  { %1975 = vmatprep.subr.bf16.mxu0 %v4551_v25  ;;  %v5427_v25 = vpop.permute.xlu0 %1917 }
 0x27c   :  { %1836 = vmatpush1.bf16.msra.mxu1 %v5068_v7 }
 0x27d   :  { %1976 = vmatpush1.bf16.msra.mxu0 %v4557_v26  ;;  %1837 = vmatprep.subr.bf16.mxu1 %v5076_v29  ;;  %v6520_v26 = vld [vmem:[#allocation4_spill] sm:$0xff] }
 0x27e   :  { %1977 = vmatprep.subr.bf16.mxu0 %v4564_v27  ;;  %v6521_v27 = vld [vmem:[#allocation51_spill] sm:$0xff] }
 0x280   :  { %1838 = vmatpush1.bf16.msra.mxu1 %v5086_v18 }
 0x281   :  { %1978 = vmatpush1.bf16.msra.mxu0 %v4569_v28  ;;  %1839 = vmatprep.subr.bf16.mxu1 %v5092_v19  ;;  %v1942_v28 = vsel %vm379_vm4, %v5427_v25, %v6521_v27  ;;  %v6527_v27 = vld [vmem:[#allocation71_spill] sm:$0xff] }
 0x282   :  { %1979 = vmatprep.subr.bf16.mxu0 %v4576_v31  ;;  %v6522_v31 = vld [vmem:[#allocation7_spill] sm:$0xff] }
 0x284   :  { %1840 = vmatpush1.bf16.msra.mxu1 %v5104_v52 }
 0x285   :  { %1980 = vmatpush1.bf16.msra.mxu0 %v4581_v32  ;;  %1841 = vmatprep.subr.bf16.mxu1 %v5110_v59  ;;  %v6523_v32 = vld [vmem:[#allocation69_spill] sm:$0xff] }
 0x286   :  { %1981 = vmatprep.subr.bf16.mxu0 %v4590_v34  ;;  %v6524_v34 = vld [vmem:[#allocation21_spill] sm:$0xff] }
 0x288   :  { %1842 = vmatpush1.bf16.msra.mxu1 %v5126_v35 }
 0x289   :  { %1982 = vmatpush1.bf16.msra.mxu0 %v6519_v24  ;;  %1843 = vmatprep.subr.bf16.mxu1 %v5132_v63  ;;  %v6525_v24 = vld [vmem:[#allocation70_spill] sm:$0xff] }
 0x28a   :  { %1992 = vmatprep.subr.bf16.mxu0 %v6520_v26  ;;  %v6526_v26 = vld [vmem:[#allocation23_spill] sm:$0xff] }
 0x28c   :  { %1844 = vmatpush1.bf16.msra.mxu1 %v5140_v42  ;;  %1984 = vmatmul.mubr.bf16.vlgmr.msra.gmra.mrb[24].mxu0 %v6522_v31  ;;  %v6529_v31 = vld [vmem:[#allocation72_spill] sm:$0xff] }
 0x28d   :  { %1993 = vmatpush1.bf16.msra.mxu0 %v4696_v60  ;;  %1845 = vmatprep.subr.bf16.mxu1 %v5146_v62 }
 0x28e   :  { %1994 = vmatprep.subr.bf16.mxu0 %v4703_v54  ;;  %2024 = vmatprep.mubr.bf16.mxu0 %v1942_v28  ;;  %v6528_v28 = vld [vmem:[#allocation25_spill] sm:$0xff]  ;;  %v6532_v54 = vld [vmem:[#allocation28_spill] sm:$0xff] }
 0x290   :  { %1846 = vmatpush1.bf16.msra.mxu1 %v5154_v41 }
 0x291   :  { %1995 = vmatpush1.bf16.msra.mxu0 %v4715_v43  ;;  %1847 = vmatprep.subr.bf16.mxu1 %v5160_v37  ;;  %v6530_v43 = vld [vmem:[#allocation27_spill] sm:$0xff] }
 0x292   :  { %1996 = vmatprep.subr.bf16.mxu0 %v4726_v44  ;;  %v6531_v44 = vld [vmem:[#allocation73_spill] sm:$0xff] }
 0x294   :  { %1848 = vmatpush1.bf16.msra.mxu1 %v5168_v51  ;;  %v6543_v51 = vld [vmem:[#allocation34_spill] sm:$0xff] }
 0x295   :  { %1997 = vmatpush1.bf16.msra.mxu0 %v4740_v38  ;;  %1849 = vmatprep.subr.bf16.mxu1 %v6523_v32  ;;  %v6533_v38 = vld [vmem:[#allocation29_spill] sm:$0xff] }
 0x296   :  { %1998 = vmatprep.subr.bf16.mxu0 %v6524_v34 }
 0x298   :  { %1850 = vmatpush1.bf16.msra.mxu1 %v6525_v24 }
 0x299   :  { %1999 = vmatpush1.bf16.msra.mxu0 %v6526_v26  ;;  %1851 = vmatprep.subr.bf16.mxu1 %v6527_v27  ;;  %v6534_v26 = vld [vmem:[#allocation30_spill] sm:$0xff]  ;;  %v6535_v27 = vld [vmem:[#allocation5_spill] sm:$0xff] }
 0x29a   :  { %2000 = vmatprep.subr.bf16.mxu0 %v6528_v28 }
 0x29c   :  { %1852 = vmatpush1.bf16.msra.mxu1 %v6529_v31  ;;  %v6536_v31 = vld [vmem:[#allocation6_spill] sm:$0xff] }
 0x29d   :  { %2001 = vmatpush1.bf16.msra.mxu0 %v6530_v43  ;;  %1853 = vmatprep.subr.bf16.mxu1 %v6531_v44 }
 0x29e   :  { %2002 = vmatprep.subr.bf16.mxu0 %v6532_v54  ;;  %v6537_v54 = vld [vmem:[#allocation31_spill] sm:$0xff] }
 0x2a0   :  { %1854 = vmatpush1.bf16.msra.mxu1 %v5210_v2  ;;  %v6542_v2 = vmov 0  }
 0x2a1   :  { %2003 = vmatpush1.bf16.msra.mxu0 %v6533_v38  ;;  %1855 = vmatprep.subr.bf16.mxu1 %v5216_v36  ;;  %v5465_v38 = vld [vmem:[%s6270_s3 + $0x304] ss:$8 sps:$4 sm:$0xff]  }
 0x2a2   :  { %v842_v34 = vpop.f32.mrb[24].mxu1  ;;  %2004 = vmatprep.subr.bf16.mxu0 %v6534_v26  ;;  %6538 = vst [vmem:[#allocation3_spill] sm:$0xff] %v5465_v38 }
 0x2a3   :  { %v843_v24 = vadd.f32 %v842_v34, %v6535_v27  ;;  %v844_v28 = vpop.f32.mrb[25].mxu1  ;;  %v6539_v34 = vld [vmem:[#allocation41_spill] sm:$0xff] }
 0x2a4   :  { %1856 = vmatpush1.bf16.msra.mxu1 %v5224_v0  ;;  %v845_v43 = vadd.f32 %v844_v28, %v6536_v31  ;;  %v846_v32 = vpop.f32.mrb[26].mxu1  ;;  %v1738_v27 = vsel %vm136_vm0, %v6539_v34, %v5330_v11  ;;  %v6540_v28 = vld [vmem:[#allocation32_spill] sm:$0xff]  ;;  %v6541_v31 = vld [vmem:[#allocation14_spill] sm:$0xff]  ;;  %v6545_v11 = vld [vmem:[#allocation35_spill] sm:$0xff] }
 0x2a5   :  { %vm849_vm8 = vcmp.gt.f32.partialorder %v843_v24, 0.0  ;;  %v851_v44 = vmul.f32 0.2, %v843_v24  ;;  %2005 = vmatpush1.bf16.msra.mxu0 %v6537_v54  ;;  %1866 = vmatprep.subr.bf16.mxu1 %v5465_v38  ;;  %v847_v26 = vpop.f32.mrb[27].mxu1  ;;  %v6544_v38 = vld [vmem:[#allocation16_spill] sm:$0xff]  ;;  %v6546_v34 = vld [vmem:[#allocation18_spill] sm:$0xff] }
 0x2a6   :  { %vm850_vm10 = vcmp.gt.f32.partialorder %v845_v43, 0.0  ;;  %v852_v0 = vmul.f32 0.2, %v845_v43  ;;  %2006 = vmatprep.subr.bf16.mxu0 %v6540_v28 }
 0x2a7   :  { %1858 = vmatmul.mubr.bf16.vlgmr.msra.gmra.mrb[32].mxu1 %v1738_v27  ;;  %v853_v32 = vsel %vm849_vm8, %v843_v24, %v851_v44  ;;  %v6547_v44 = vld [vmem:[#allocation20_spill] sm:$0xff]  ;;  %v6553_v27 = vld [vmem:[#allocation10_spill] sm:$0xff] }
 0x2a8   :  { %1867 = vmatpush1.bf16.msra.mxu1 %v6541_v31  ;;  %v855_v54 = vpack.c.bf16 %v853_v32, %v853_v32  ;;  %v854_v36 = vsel %vm850_vm10, %v845_v43, %v852_v0  ;;  %1898 = vmatprep.mubr.bf16.mxu1 %v6542_v2  ;;  %v6548_v43 = vld [vmem:[#allocation38_spill] sm:$0xff]  ;;  %v6550_v24 = vld [vmem:[#allocation24_spill] sm:$0xff]  ;;  %vm3285_vm10 = vcmask 80896  }
 0x2a9   :  { %2007 = vmatpush1.bf16.msra.mxu0 %v6543_v51  ;;  %1868 = vmatprep.subr.bf16.mxu1 %v6544_v38  ;;  %v856_v26 = vpack.c.bf16 %v854_v36, %v854_v36  ;;  %v6549_v0 = vld [vmem:[#allocation22_spill] sm:$0xff]  ;;  %v5487_v36 = vpop.permute.xlu0 %2123 }
 0x2aa   :  { %2346 = vrot.lane.b32.xlu1 %v855_v54, %s4038_s0  ;;  %2008 = vmatprep.subr.bf16.mxu0 %v6545_v11  ;;  %6551 = vst [vmem:[#allocation4_spill] sm:$0xff] %v5487_v36  ;;  %v6552_v54 = vld [vmem:[#allocation26_spill] sm:$0xff]  ;;  %v2146_v32 = vsel %vm745_vm9, %v6553_v27, %v5487_v36  ;;  %v6554_v27 = vld [vmem:[#allocation36_spill] sm:$0xff]  ;;  %v6556_v36 = vld [vmem:[#allocation47_spill] sm:$0xff] }
 0x2ab   :  { %2348 = vrot.lane.b32.xlu0 %v856_v26, %s4038_s0 }
 0x2ac   :  { %1869 = vmatpush1.bf16.msra.mxu1 %v6546_v34 }
 0x2ad   :  { %2009 = vmatpush1.bf16.msra.mxu0 %v6503_v58  ;;  %1870 = vmatprep.subr.bf16.mxu1 %v6547_v44 }
 0x2ae   :  { %2010 = vmatprep.subr.bf16.mxu0 %v6548_v43 }
 0x2b0   :  { %1871 = vmatpush1.bf16.msra.mxu1 %v6549_v0 }
 0x2b1   :  { %2011 = vmatpush1.bf16.msra.mxu0 %v4874_v53  ;;  %1872 = vmatprep.subr.bf16.mxu1 %v6550_v24 }
 0x2b2   :  { %2012 = vmatprep.subr.bf16.mxu0 %v4883_v4 }
 0x2b4   :  { %1873 = vmatpush1.bf16.msra.mxu1 %v6552_v54 }
 0x2b5   :  { %2013 = vmatpush1.bf16.msra.mxu0 %v4892_v40  ;;  %2159 = vmatprep.subr.bf16.mxu1 %v5238_v33 }
 0x2b6   :  { %2014 = vmatprep.subr.bf16.mxu0 %v4898_v6 }
 0x2b7   :  { %3433 = vmatmul.mubr.msk.bf16.vlgmr.msra.gmra.mrb[32].mxu1 %vm623_vm7, %v4972_v15 }
 0x2b8   :  { %2160 = vmatpush1.bf16.msra.mxu1 %v5250_v1  ;;  %2191 = vmatprep.mubr.bf16.mxu1 %v2146_v32  ;;  %v6555_v32 = vld [vmem:[#allocation8_spill] sm:$0xff] }
 0x2b9   :  { %2015 = vmatpush1.bf16.msra.mxu0 %v4912_v5  ;;  %2161 = vmatprep.subr.bf16.mxu1 %v5257_v39  ;;  %v6561_v5 = vld [vmem:[#allocation50_spill] sm:$0xff] }
 0x2ba   :  { %v5501_v26 = vpop.f32.mrb[28].mxu1  ;;  %2016 = vmatprep.subr.bf16.mxu0 %v4918_v47  ;;  %v6557_v47 = vld [vmem:[#allocation77_spill] sm:$0xff] }
 0x2bb   :  { %v5504_v40 = vpop.f32.mrb[29].mxu1 }
 0x2bc   :  { %2162 = vmatpush1.bf16.msra.mxu1 %v5264_v48  ;;  %v1696_v15 = vpop.f32.mrb[30].mxu1 }
 0x2bd   :  { %v1697_v6 = vpop.f32.mrb[31].mxu1  ;;  %2017 = vmatpush1.bf16.msra.mxu0 %v4928_v8  ;;  %2163 = vmatprep.subr.bf16.mxu1 %v5271_v55  ;;  %v6558_v15 = vld [vmem:[#allocation78_spill] sm:$0xff]  ;;  %v6560_v8 = vld [vmem:[#allocation79_spill] sm:$0xff] }
 0x2be   :  { %2018 = vmatprep.subr.bf16.mxu0 %v4934_v9  ;;  %v6559_v6 = vld [vmem:[#allocation49_spill] sm:$0xff]  ;;  %v6562_v9 = vld [vmem:[#allocation80_spill] sm:$0xff] }
 0x2c0   :  { %2164 = vmatpush1.bf16.msra.mxu1 %v6554_v27  ;;  %v5521_v27 = vpop.permute.xlu0 %1930 }
 0x2c1   :  { %2019 = vmatpush1.bf16.msra.mxu0 %v4942_v10  ;;  %2165 = vmatprep.subr.bf16.mxu1 %v6555_v32 }
 0x2c2   :  { %2020 = vmatprep.subr.bf16.mxu0 %v6556_v36  ;;  %v6563_v36 = vld [vmem:[#allocation37_spill] sm:$0xff] }
 0x2c3   :  { %v1919_v10 = vsel %vm745_vm9, %v6563_v36, %v5427_v25  ;;  %v6570_v25 = vld [vmem:[#allocation85_spill] sm:$0xff] }
 0x2c4   :  { %2166 = vmatpush1.bf16.msra.mxu1 %v6557_v47  ;;  %v6564_v47 = vld [vmem:[#allocation55_spill] sm:$0xff]  ;;  %v5557_v36 = vld [vmem:[%s6270_s3 + $0xb0] ss:$8 sps:$4 sm:$0xff]  }
 0x2c5   :  { %2021 = vmatpush1.bf16.msra.mxu0 %v4956_v12  ;;  %2167 = vmatprep.subr.bf16.mxu1 %v6558_v15  ;;  %v1934_v12 = vsel %vm136_vm0, %v5521_v27, %v6564_v47  ;;  %v6565_v15 = vld [vmem:[#allocation81_spill] sm:$0xff] }
 0x2c6   :  { %2022 = vmatprep.subr.bf16.mxu0 %v6559_v6  ;;  %v6567_v6 = vld [vmem:[#allocation83_spill] sm:$0xff] }
 0x2c8   :  { %2168 = vmatpush1.bf16.msra.mxu1 %v6560_v8 }
 0x2c9   :  { %2023 = vmatpush1.bf16.msra.mxu0 %v6561_v5  ;;  %2169 = vmatprep.subr.bf16.mxu1 %v6562_v9  ;;  %v6566_v5 = vld [vmem:[#allocation82_spill] sm:$0xff] }
 0x2ca   :  { %2033 = vmatprep.subr.bf16.mxu0 %v4978_v56 }
 0x2cc   :  { %2170 = vmatpush1.bf16.msra.mxu1 %v6565_v15  ;;  %2025 = vmatmul.mubr.bf16.vlgmr.msra.gmra.mrb[24].mxu0 %v1919_v10  ;;  %v6568_v10 = vld [vmem:[#allocation33_spill] sm:$0xff] }
 0x2cd   :  { %2034 = vmatpush1.bf16.msra.mxu0 %v4986_v16  ;;  %2171 = vmatprep.subr.bf16.mxu1 %v6566_v5 }
 0x2ce   :  { %2035 = vmatprep.subr.bf16.mxu0 %v4992_v17  ;;  %2065 = vmatprep.mubr.bf16.mxu0 %v1934_v12  ;;  %v6569_v12 = vld [vmem:[#allocation84_spill] sm:$0xff] }
 0x2d0   :  { %2172 = vmatpush1.bf16.msra.mxu1 %v6567_v6 }
 0x2d1   :  { %2036 = vmatpush1.bf16.msra.mxu0 %v5007_v3  ;;  %2173 = vmatprep.subr.bf16.mxu1 %v5349_v14 }
 0x2d2   :  { %2037 = vmatprep.subr.bf16.mxu0 %v5014_v20 }
 0x2d4   :  { %2174 = vmatpush1.bf16.msra.mxu1 %v5356_v49 }
 0x2d5   :  { %2038 = vmatpush1.bf16.msra.mxu0 %v5026_v21  ;;  %2175 = vmatprep.subr.bf16.mxu1 %v5363_v13 }
 0x2d6   :  { %2039 = vmatprep.subr.bf16.mxu0 %v5032_v61 }
 0x2d8   :  { %2176 = vmatpush1.bf16.msra.mxu1 %v6568_v10 }
 0x2d9   :  { %2040 = vmatpush1.bf16.msra.mxu0 %v5040_v22  ;;  %2177 = vmatprep.subr.bf16.mxu1 %v6569_v12 }
 0x2da   :  { %2041 = vmatprep.subr.bf16.mxu0 %v5046_v23 }
 0x2dc   :  { %2178 = vmatpush1.bf16.msra.mxu1 %v6570_v25 }
 0x2dd   :  { %2042 = vmatpush1.bf16.msra.mxu0 %v5054_v30  ;;  %2179 = vmatprep.subr.bf16.mxu1 %v5391_v50 }
 0x2de   :  { %2043 = vmatprep.subr.bf16.mxu0 %v5060_v46  ;;  %v5564_v46 = vld [vmem:[%s6270_s3 + $0xc4] ss:$8 sps:$4 sm:$0xff]  }
 0x2e0   :  { %2180 = vmatpush1.bf16.msra.mxu1 %v5398_v45 }
 0x2e1   :  { %2044 = vmatpush1.bf16.msra.mxu0 %v5068_v7  ;;  %2181 = vmatprep.subr.bf16.mxu1 %v5405_v57 }
 0x2e2   :  { %2045 = vmatprep.subr.bf16.mxu0 %v5076_v29  ;;  %v5571_v29 = vld [vmem:[%s6270_s3 + $0xc0] ss:$8 sps:$4 sm:$0xff]  }
 0x2e3   :  { %6571 = vst [vmem:[#allocation51_spill] sm:$0xff] %v5571_v29 }
 0x2e4   :  { %2182 = vmatpush1.bf16.msra.mxu1 %v5557_v36 }
 0x2e5   :  { %2046 = vmatpush1.bf16.msra.mxu0 %v5086_v18  ;;  %2183 = vmatprep.subr.bf16.mxu1 %v5564_v46  ;;  %v5578_v18 = vld [vmem:[%s6270_s3 + $0xd4] ss:$8 sps:$4 sm:$0xff]  }
 0x2e6   :  { %2047 = vmatprep.subr.bf16.mxu0 %v5092_v19  ;;  %6572 = vst [vmem:[#allocation7_spill] sm:$0xff] %v5578_v18  ;;  %v5585_v19 = vld [vmem:[%s6270_s3 + $0xd0] ss:$8 sps:$4 sm:$0xff]  }
 0x2e7   :  { %6573 = vst [vmem:[#allocation5_spill] sm:$0xff] %v5585_v19 }
 0x2e8   :  { %2184 = vmatpush1.bf16.msra.mxu1 %v5571_v29  ;;  %v6588_v29 = vld [vmem:[#allocation19_spill] sm:$0xff] }
 0x2e9   :  { %2048 = vmatpush1.bf16.msra.mxu0 %v5104_v52  ;;  %2185 = vmatprep.subr.bf16.mxu1 %v5578_v18  ;;  %v5592_v52 = vld [vmem:[%s6270_s3 + $0xe4] ss:$8 sps:$4 sm:$0xff]  }
 0x2ea   :  { %2049 = vmatprep.subr.bf16.mxu0 %v5110_v59  ;;  %6574 = vst [vmem:[#allocation6_spill] sm:$0xff] %v5592_v52  ;;  %v5599_v59 = vld [vmem:[%s6270_s3 + $0xe0] ss:$8 sps:$4 sm:$0xff]  }
 0x2eb   :  { %6575 = vst [vmem:[#allocation41_spill] sm:$0xff] %v5599_v59  ;;  %v6585_v18 = vld [vmem:[#allocation70_spill] sm:$0xff] }
 0x2ec   :  { %2186 = vmatpush1.bf16.msra.mxu1 %v5585_v19  ;;  %v6583_v19 = vld [vmem:[#allocation69_spill] sm:$0xff] }
 0x2ed   :  { %2050 = vmatpush1.bf16.msra.mxu0 %v5126_v35  ;;  %2187 = vmatprep.subr.bf16.mxu1 %v5592_v52  ;;  %v5606_v35 = vld [vmem:[%s6270_s3 + $0xf4] ss:$8 sps:$4 sm:$0xff]  }
 0x2ee   :  { %2051 = vmatprep.subr.bf16.mxu0 %v5132_v63  ;;  %6576 = vst [vmem:[#allocation32_spill] sm:$0xff] %v5606_v35  ;;  %v5613_v63 = vld [vmem:[%s6270_s3 + $0xf0] ss:$8 sps:$4 sm:$0xff]  }
 0x2ef   :  { %6577 = vst [vmem:[#allocation14_spill] sm:$0xff] %v5613_v63 }
 0x2f0   :  { %2188 = vmatpush1.bf16.msra.mxu1 %v5599_v59  ;;  %v5623_v59 = vpop.permute.xlu0 %2125 }
 0x2f1   :  { %2052 = vmatpush1.bf16.msra.mxu0 %v5140_v42  ;;  %2189 = vmatprep.subr.bf16.mxu1 %v5606_v35  ;;  %v5620_v42 = vld [vmem:[%s6270_s3 + $0x104] ss:$8 sps:$4 sm:$0xff]  }
 0x2f2   :  { %2053 = vmatprep.subr.bf16.mxu0 %v5146_v62  ;;  %6578 = vst [vmem:[#allocation34_spill] sm:$0xff] %v5620_v42  ;;  %v6579_v62 = vld [vmem:[#allocation9_spill] sm:$0xff]  ;;  %v6580_v35 = vld [vmem:[#allocation58_spill] sm:$0xff] }
 0x2f3   :  { %v2150_v52 = vsel %vm379_vm4, %v5623_v59, %v6580_v35  ;;  %v6589_v35 = vld [vmem:[#allocation72_spill] sm:$0xff] }
 0x2f4   :  { %2190 = vmatpush1.bf16.msra.mxu1 %v5613_v63  ;;  %v6582_v63 = vld [vmem:[#allocation13_spill] sm:$0xff] }
 0x2f5   :  { %2054 = vmatpush1.bf16.msra.mxu0 %v5154_v41  ;;  %2200 = vmatprep.subr.bf16.mxu1 %v5620_v42  ;;  %v6581_v41 = vld [vmem:[#allocation68_spill] sm:$0xff]  ;;  %v6584_v42 = vld [vmem:[#allocation15_spill] sm:$0xff] }
 0x2f6   :  { %2055 = vmatprep.subr.bf16.mxu0 %v5160_v37  ;;  %v6586_v37 = vld [vmem:[#allocation17_spill] sm:$0xff] }
 0x2f7   :  { %2192 = vmatmul.mubr.bf16.vlgmr.msra.gmra.mrb[36].mxu1 %v6579_v62  ;;  %v6587_v62 = vld [vmem:[#allocation71_spill] sm:$0xff] }
 0x2f8   :  { %2201 = vmatpush1.bf16.msra.mxu1 %v4696_v60  ;;  %2232 = vmatprep.mubr.bf16.mxu1 %v2150_v52  ;;  %v6590_v60 = vld [vmem:[#allocation21_spill] sm:$0xff] }
 0x2f9   :  { %2056 = vmatpush1.bf16.msra.mxu0 %v6581_v41  ;;  %2202 = vmatprep.subr.bf16.mxu1 %v6582_v63  ;;  %v6591_v52 = vld [vmem:[#allocation73_spill] sm:$0xff]  ;;  %v6592_v41 = vld [vmem:[#allocation23_spill] sm:$0xff]  ;;  %v6593_v63 = vld [vmem:[#allocation74_spill] sm:$0xff] }
 0x2fa   :  { %2057 = vmatprep.subr.bf16.mxu0 %v6583_v19  ;;  %v6594_v19 = vld [vmem:[#allocation25_spill] sm:$0xff] }
 0x2fc   :  { %2203 = vmatpush1.bf16.msra.mxu1 %v6584_v42  ;;  %v6595_v42 = vld [vmem:[#allocation75_spill] sm:$0xff] }
 0x2fd   :  { %2058 = vmatpush1.bf16.msra.mxu0 %v6585_v18  ;;  %2204 = vmatprep.subr.bf16.mxu1 %v6586_v37  ;;  %v6596_v18 = vld [vmem:[#allocation27_spill] sm:$0xff]  ;;  %v6597_v37 = vld [vmem:[#allocation76_spill] sm:$0xff] }
 0x2fe   :  { %2059 = vmatprep.subr.bf16.mxu0 %v6587_v62  ;;  %v6598_v62 = vld [vmem:[#allocation28_spill] sm:$0xff] }
 0x300   :  { %2205 = vmatpush1.bf16.msra.mxu1 %v6588_v29  ;;  %v6599_v29 = vld [vmem:[#allocation3_spill] sm:$0xff] }
 0x301   :  { %2060 = vmatpush1.bf16.msra.mxu0 %v6589_v35  ;;  %2206 = vmatprep.subr.bf16.mxu1 %v6590_v60  ;;  %v6600_v60 = vld [vmem:[#allocation52_spill] sm:$0xff]  ;;  %v6601_v35 = vld [vmem:[#allocation29_spill] sm:$0xff] }
 0x302   :  { %2061 = vmatprep.subr.bf16.mxu0 %v6591_v52  ;;  %v1946_v52 = vsel %vm136_vm0, %v6600_v60, %v5521_v27  ;;  %v6616_v60 = vld [vmem:[#allocation78_spill] sm:$0xff] }
 0x304   :  { %2207 = vmatpush1.bf16.msra.mxu1 %v6592_v41  ;;  %v999_v41 = vld [vmem:[%s6272_s4] sm:$0x3] }
 0x305   :  { %2062 = vmatpush1.bf16.msra.mxu0 %v6593_v63  ;;  %2208 = vmatprep.subr.bf16.mxu1 %v6594_v19  ;;  %v6602_v19 = vld [vmem:[#allocation30_spill] sm:$0xff] }
 0x306   :  { %2063 = vmatprep.subr.bf16.mxu0 %v6595_v42 }
 0x308   :  { %2209 = vmatpush1.bf16.msra.mxu1 %v6596_v18  ;;  %v6603_v18 = vld [vmem:[#allocation31_spill] sm:$0xff] }
 0x309   :  { %2064 = vmatpush1.bf16.msra.mxu0 %v6597_v37  ;;  %2210 = vmatprep.subr.bf16.mxu1 %v6598_v62  ;;  %v6611_v62 = vld [vmem:[#allocation36_spill] sm:$0xff] }
 0x30a   :  { %2074 = vmatprep.subr.bf16.mxu0 %v6599_v29 }
 0x30c   :  { %2211 = vmatpush1.bf16.msra.mxu1 %v6601_v35  ;;  %2066 = vmatmul.mubr.bf16.vlgmr.msra.gmra.mrb[24].mxu0 %v1946_v52  ;;  %v6612_v35 = vld [vmem:[#allocation43_spill] sm:$0xff]  ;;  %v6614_v52 = vld [vmem:[#allocation77_spill] sm:$0xff] }
 0x30d   :  { %2075 = vmatpush1.bf16.msra.mxu0 %v6541_v31  ;;  %2212 = vmatprep.subr.bf16.mxu1 %v6602_v19  ;;  %v6619_v19 = vld [vmem:[#allocation48_spill] sm:$0xff] }
 0x30e   :  { %2076 = vmatprep.subr.bf16.mxu0 %v6544_v38  ;;  %2106 = vmatprep.mubr.bf16.mxu0 %v6542_v2  ;;  %v5667_v38 = vpop.permute.xlu0 %2331 }
 0x310   :  { %2213 = vmatpush1.bf16.msra.mxu1 %v6603_v18  ;;  %v6621_v18 = vld [vmem:[#allocation50_spill] sm:$0xff] }
 0x311   :  { %2077 = vmatpush1.bf16.msra.mxu0 %v6546_v34  ;;  %2214 = vmatprep.subr.bf16.mxu1 %v6540_v28  ;;  %v6605_v28 = vld [vmem:[#allocation2_spill] sm:$0xff] }
 0x312   :  { %2078 = vmatprep.subr.bf16.mxu0 %v6547_v44  ;;  %v6606_v31 = vsub.s32 0, %v6605_v28  ;;  %v6607_v34 = vsub.s32 1, %v6605_v28  ;;  %v6643_v28 = vld [vmem:[#allocation67_spill] sm:$0xff] }
 0x314   :  { %2215 = vmatpush1.bf16.msra.mxu1 %v6543_v51  ;;  %v6604_v51 = vld [vmem:[#allocation12_spill] sm:$0xff]  ;;  %v5688_v44 = vrot.slane %v999_v41, %v6607_v34 }
 0x315   :  { %2079 = vmatpush1.bf16.msra.mxu0 %v6549_v0  ;;  %2216 = vmatprep.subr.bf16.mxu1 %v6545_v11  ;;  %v5683_v11 = vrot.slane %v999_v41, %v6606_v31  ;;  %v3959_v31 = vld [vmem:[%s6270_s3 + $0x124] ss:$8 sps:$4 sm:$0xff]   ;;  %v6644_v34 = vld [vmem:[#allocation68_spill] sm:$0xff] }
 0x316   :  { %2080 = vmatprep.subr.bf16.mxu0 %v6550_v24 }
 0x318   :  { %2217 = vmatpush1.bf16.msra.mxu1 %v6503_v58  ;;  %v2354_v58 = vsel %vm745_vm9, %v6604_v51, %v5667_v38  ;;  %v5726_v51 = vpop.permute.xlu0 %2138 }
 0x319   :  { %2081 = vmatpush1.bf16.msra.mxu0 %v6552_v54  ;;  %2218 = vmatprep.subr.bf16.mxu1 %v6548_v43 }
 0x31a   :  { %2367 = vmatprep.subr.bf16.mxu0 %v5238_v33 }
 0x31c   :  { %2219 = vmatpush1.bf16.msra.mxu1 %v4874_v53  ;;  %3434 = vmatmul.mubr.msk.bf16.vlgmr.msra.gmra.mrb[24].mxu0 %vm623_vm7, %v6564_v47  ;;  %v6608_v47 = vld [vmem:[#allocation39_spill] sm:$0xff] }
 0x31d   :  { %2368 = vmatpush1.bf16.msra.mxu0 %v5250_v1  ;;  %2399 = vmatprep.mubr.bf16.mxu0 %v2354_v58  ;;  %v6609_v1 = vld [vmem:[#allocation40_spill] sm:$0xff] }
 0x31e   :  { %2220 = vmatprep.subr.bf16.mxu1 %v4883_v4  ;;  %2369 = vmatprep.subr.bf16.mxu0 %v5257_v39  ;;  %v6610_v39 = vld [vmem:[#allocation42_spill] sm:$0xff]  ;;  %v3958_v58 = vld [vmem:[%s6270_s3 + $0x110] ss:$8 sps:$4 sm:$0xff]  }
 0x31f   :  { %v1651_v33 = vpop.f32.mrb[20].mxu0 }
 0x320   :  { %v3596_v53 = vadd.f32 %v1651_v33, %v5683_v11  ;;  %2221 = vmatpush1.bf16.msra.mxu1 %v6608_v47  ;;  %v1653_v43 = vpop.f32.mrb[21].mxu0  ;;  %v3960_v33 = vld [vmem:[%s6270_s3 + $0x120] ss:$8 sps:$4 sm:$0xff]   ;;  %v3961_v47 = vld [vmem:[%s6270_s3 + $0x134] ss:$8 sps:$4 sm:$0xff]  }
 0x321   :  { %v3598_v0 = vadd.f32 %v1653_v43, %v5688_v44  ;;  %v1655_v24 = vpop.f32.mrb[22].mxu0  ;;  %2370 = vmatpush1.bf16.msra.mxu0 %v5264_v48  ;;  %2222 = vmatprep.subr.bf16.mxu1 %v6609_v1  ;;  %v6613_v48 = vld [vmem:[#allocation44_spill] sm:$0xff]  ;;  %v6646_v43 = vld [vmem:[#allocation70_spill] sm:$0xff] }
 0x322   :  { %v5698_v54 = vadd.f32 %v3596_v53, %v5501_v26  ;;  %v1656_v27 = vpop.f32.mrb[23].mxu0  ;;  %2371 = vmatprep.subr.bf16.mxu0 %v5271_v55  ;;  %v6615_v26 = vld [vmem:[#allocation45_spill] sm:$0xff]  ;;  %v6617_v55 = vld [vmem:[#allocation46_spill] sm:$0xff]  ;;  %v6647_v24 = vld [vmem:[#allocation71_spill] sm:$0xff] }
 0x323   :  { %v5702_v4 = vadd.f32 %v3598_v0, %v5504_v40  ;;  %v6618_v40 = vld [vmem:[#allocation47_spill] sm:$0xff]  ;;  %v6645_v53 = vld [vmem:[#allocation69_spill] sm:$0xff]  ;;  %v6648_v27 = vld [vmem:[#allocation72_spill] sm:$0xff] }
 0x324   :  { %2223 = vmatpush1.bf16.msra.mxu1 %v6610_v39  ;;  %v3962_v0 = vld [vmem:[%s6270_s3 + $0x130] ss:$8 sps:$4 sm:$0xff]   ;;  %v3963_v1 = vld [vmem:[%s6270_s3 + $0x144] ss:$8 sps:$4 sm:$0xff]   ;;  %v3964_v39 = vld [vmem:[%s6270_s3 + $0x140] ss:$8 sps:$4 sm:$0xff]  }
 0x325   :  { %2372 = vmatpush1.bf16.msra.mxu0 %v6611_v62  ;;  %2224 = vmatprep.subr.bf16.mxu1 %v6612_v35  ;;  %v6649_v62 = vld [vmem:[#allocation73_spill] sm:$0xff]  ;;  %vm1700_vm13 = vcmp.gt.f32.partialorder %v5702_v4, 0.0  ;;  %vm1699_vm14 = vcmp.gt.f32.partialorder %v5698_v54, 0.0 }
 0x326   :  { %2373 = vmatprep.subr.bf16.mxu0 %v6555_v32  ;;  %v6620_v32 = vld [vmem:[#allocation49_spill] sm:$0xff] }
 0x327   :  { %v3965_v35 = vld [vmem:[%s6270_s3 + $0x154] ss:$8 sps:$4 sm:$0xff]  }
 0x328   :  { %2225 = vmatpush1.bf16.msra.mxu1 %v6613_v48  ;;  %v3966_v48 = vld [vmem:[%s6270_s3 + $0x150] ss:$8 sps:$4 sm:$0xff]  }
 0x329   :  { %2374 = vmatpush1.bf16.msra.mxu0 %v6614_v52  ;;  %2226 = vmatprep.subr.bf16.mxu1 %v6615_v26  ;;  %v3967_v52 = vld [vmem:[%s6270_s3 + $0x164] ss:$8 sps:$4 sm:$0xff]   ;;  %v3968_v26 = vld [vmem:[%s6270_s3 + $0x160] ss:$8 sps:$4 sm:$0xff]  }
 0x32a   :  { %2375 = vmatprep.subr.bf16.mxu0 %v6616_v60 }
 0x32c   :  { %2227 = vmatpush1.bf16.msra.mxu1 %v6617_v55  ;;  %v3971_v55 = vld [vmem:[%s6270_s3 + $0x170] ss:$8 sps:$4 sm:$0xff]  }
 0x32d   :  { %2376 = vmatpush1.bf16.msra.mxu0 %v6560_v8  ;;  %2228 = vmatprep.subr.bf16.mxu1 %v6618_v40  ;;  %v6622_v8 = vld [vmem:[#allocation4_spill] sm:$0xff] }
 0x32e   :  { %2377 = vmatprep.subr.bf16.mxu0 %v6562_v9  ;;  %v2127_v41 = vsel %vm745_vm9, %v6622_v8, %v5623_v59  ;;  %v5728_v9 = vpop.permute.xlu1 %2140  ;;  %v6624_v59 = vld [vmem:[#allocation51_spill] sm:$0xff]  ;;  %v5850_v40 = vld [vmem:[%s6270_s3 + $0x314] ss:$8 sps:$4 sm:$0xff]  }
 0x32f   :  { %v5868_v8 = vld [vmem:[%s6270_s3 + $0x324] ss:$8 sps:$4 sm:$0xff]  }
 0x330   :  { %2229 = vmatpush1.bf16.msra.mxu1 %v6619_v19  ;;  %v3973_v19 = vld [vmem:[%s6270_s3 + $0x184] ss:$8 sps:$4 sm:$0xff]  }
 0x331   :  { %2378 = vmatpush1.bf16.msra.mxu0 %v6565_v15  ;;  %2230 = vmatprep.subr.bf16.mxu1 %v6620_v32  ;;  %v6640_v15 = vld [vmem:[#allocation11_spill] sm:$0xff]  ;;  %v5859_v32 = vld [vmem:[%s6270_s3 + $0x310] ss:$8 sps:$4 sm:$0xff]  }
 0x332   :  { %2379 = vmatprep.subr.bf16.mxu0 %v6566_v5  ;;  %v2142_v5 = vsel %vm136_vm0, %v5726_v51, %v5728_v9 }
 0x334   :  { %2231 = vmatpush1.bf16.msra.mxu1 %v6621_v18  ;;  %v3975_v18 = vld [vmem:[%s6270_s3 + $0x180] ss:$8 sps:$4 sm:$0xff]  }
 0x335   :  { %2380 = vmatpush1.bf16.msra.mxu0 %v6567_v6  ;;  %2241 = vmatprep.subr.bf16.mxu1 %v4978_v56  ;;  %v6626_v56 = vld [vmem:[#allocation7_spill] sm:$0xff] }
 0x336   :  { %2381 = vmatprep.subr.bf16.mxu0 %v5349_v14  ;;  %v6625_v14 = vld [vmem:[#allocation54_spill] sm:$0xff] }
 0x337   :  { %2233 = vmatmul.mubr.bf16.vlgmr.msra.gmra.mrb[36].mxu1 %v2127_v41  ;;  %v3977_v41 = vld [vmem:[%s6270_s3 + $0x194] ss:$8 sps:$4 sm:$0xff]  }
 0x338   :  { %2242 = vmatpush1.bf16.msra.mxu1 %v4986_v16  ;;  %2273 = vmatprep.mubr.bf16.mxu1 %v2142_v5  ;;  %v6627_v16 = vld [vmem:[#allocation56_spill] sm:$0xff]  ;;  %v5880_v5 = vld [vmem:[%s6270_s3 + $0x320] ss:$8 sps:$4 sm:$0xff]  }
 0x339   :  { %2382 = vmatpush1.bf16.msra.mxu0 %v5356_v49  ;;  %2243 = vmatprep.subr.bf16.mxu1 %v4992_v17  ;;  %v6623_v49 = vld [vmem:[#allocation53_spill] sm:$0xff] }
 0x33a   :  { %2383 = vmatprep.subr.bf16.mxu0 %v5363_v13  ;;  %v6628_v17 = vld [vmem:[#allocation5_spill] sm:$0xff]  ;;  %v6637_v13 = vld [vmem:[#allocation63_spill] sm:$0xff] }
 0x33c   :  { %2244 = vmatpush1.bf16.msra.mxu1 %v5007_v3  ;;  %v6629_v3 = vld [vmem:[#allocation57_spill] sm:$0xff] }
 0x33d   :  { %2384 = vmatpush1.bf16.msra.mxu0 %v6568_v10  ;;  %2245 = vmatprep.subr.bf16.mxu1 %v5014_v20  ;;  %v6630_v20 = vld [vmem:[#allocation6_spill] sm:$0xff] }
 0x33e   :  { %2385 = vmatprep.subr.bf16.mxu0 %v6569_v12  ;;  %v3956_v10 = vld [vmem:[%s6270_s3 + $0x100] ss:$8 sps:$4 sm:$0xff]   ;;  %v6641_v12 = vld [vmem:[#allocation65_spill] sm:$0xff] }
 0x340   :  { %2246 = vmatpush1.bf16.msra.mxu1 %v5026_v21  ;;  %v6631_v21 = vld [vmem:[#allocation59_spill] sm:$0xff] }
 0x341   :  { %2386 = vmatpush1.bf16.msra.mxu0 %v6570_v25  ;;  %2247 = vmatprep.subr.bf16.mxu1 %v5032_v61  ;;  %v6632_v61 = vld [vmem:[#allocation41_spill] sm:$0xff] }
 0x342   :  { %2387 = vmatprep.subr.bf16.mxu0 %v5391_v50  ;;  %v6638_v50 = vld [vmem:[#allocation34_spill] sm:$0xff]  ;;  %v3957_v25 = vld [vmem:[%s6270_s3 + $0x114] ss:$8 sps:$4 sm:$0xff]  }
 0x344   :  { %2248 = vmatpush1.bf16.msra.mxu1 %v5040_v22  ;;  %v6633_v22 = vld [vmem:[#allocation60_spill] sm:$0xff] }
 0x345   :  { %2388 = vmatpush1.bf16.msra.mxu0 %v5398_v45  ;;  %2249 = vmatprep.subr.bf16.mxu1 %v5046_v23  ;;  %v6634_v23 = vld [vmem:[#allocation32_spill] sm:$0xff]  ;;  %v5772_v45 = vpop.permute.xlu0 %2333 }
 0x346   :  { %2389 = vmatprep.subr.bf16.mxu0 %v5405_v57  ;;  %v6639_v57 = vld [vmem:[#allocation64_spill] sm:$0xff] }
 0x348   :  { %2250 = vmatpush1.bf16.msra.mxu1 %v5054_v30  ;;  %v6635_v30 = vld [vmem:[#allocation62_spill] sm:$0xff] }
 0x349   :  { %2390 = vmatpush1.bf16.msra.mxu0 %v5557_v36  ;;  %2251 = vmatprep.subr.bf16.mxu1 %v6623_v49  ;;  %v6642_v36 = vld [vmem:[#allocation66_spill] sm:$0xff]  ;;  %v3979_v49 = vld [vmem:[%s6270_s3 + $0x190] ss:$8 sps:$4 sm:$0xff]  }
 0x34a   :  { %2391 = vmatprep.subr.bf16.mxu0 %v5564_v46  ;;  %v5767_v46 = vpop.permute.xlu1 %2339 }
 0x34b   :  { %v2358_v6 = vsel %vm379_vm4, %v5772_v45, %v5767_v46 }
 0x34c   :  { %2252 = vmatpush1.bf16.msra.mxu1 %v5068_v7  ;;  %v6636_v7 = vld [vmem:[#allocation14_spill] sm:$0xff] }
 0x34d   :  { %2392 = vmatpush1.bf16.msra.mxu0 %v6624_v59  ;;  %2253 = vmatprep.subr.bf16.mxu1 %v6625_v14  ;;  %v5889_v59 = vld [vmem:[%s6270_s3 + $0x334] ss:$8 sps:$4 sm:$0xff]   ;;  %v3981_v14 = vld [vmem:[%s6270_s3 + $0x1a4] ss:$8 sps:$4 sm:$0xff]  }
 0x34e   :  { %2393 = vmatprep.subr.bf16.mxu0 %v6626_v56  ;;  %v3869_v56 = vld [vmem:[%s6273_s5] sm:$0xff]  }
 0x350   :  { %2254 = vmatpush1.bf16.msra.mxu1 %v6627_v16  ;;  %v3870_v16 = vld [vmem:[%s6273_s5 + $0x48] sm:$0xff]  }
 0x351   :  { %2394 = vmatpush1.bf16.msra.mxu0 %v6628_v17  ;;  %2255 = vmatprep.subr.bf16.mxu1 %v6629_v3  ;;  %v5904_v17 = vld [vmem:[%s6270_s3 + $0x330] ss:$8 sps:$4 sm:$0xff]   ;;  %v3983_v3 = vld [vmem:[%s6270_s3 + $0x1a0] ss:$8 sps:$4 sm:$0xff]  }
 0x352   :  { %2395 = vmatprep.subr.bf16.mxu0 %v6630_v20  ;;  %v3984_v20 = vld [vmem:[%s6270_s3 + $0x1b4] ss:$8 sps:$4 sm:$0xff]  }
 0x354   :  { %2256 = vmatpush1.bf16.msra.mxu1 %v6631_v21  ;;  %v3871_v21 = vld [vmem:[%s6273_s5 + $0x8] sm:$0xff]  }
 0x355   :  { %2396 = vmatpush1.bf16.msra.mxu0 %v6632_v61  ;;  %2257 = vmatprep.subr.bf16.mxu1 %v6633_v22  ;;  %v3872_v61 = vld [vmem:[%s6273_s5 + $0x50] sm:$0xff]  }
 0x356   :  { %2397 = vmatprep.subr.bf16.mxu0 %v6634_v23  ;;  %v3985_v22 = vld [vmem:[%s6270_s3 + $0x1b0] ss:$8 sps:$4 sm:$0xff]  }
 0x358   :  { %2258 = vmatpush1.bf16.msra.mxu1 %v6635_v30  ;;  %v3986_v30 = vld [vmem:[%s6270_s3 + $0x1c4] ss:$8 sps:$4 sm:$0xff]  }
 0x359   :  { %2398 = vmatpush1.bf16.msra.mxu0 %v6636_v7  ;;  %2259 = vmatprep.subr.bf16.mxu1 %v6637_v13 }
 0x35a   :  { %2408 = vmatprep.subr.bf16.mxu0 %v6638_v50  ;;  %v3873_v50 = vld [vmem:[%s6273_s5 + $0x10] sm:$0xff]  }
 0x35c   :  { %2260 = vmatpush1.bf16.msra.mxu1 %v6639_v57  ;;  %2400 = vmatmul.mubr.bf16.vlgmr.msra.gmra.mrb[28].mxu0 %v6640_v15 }
 0x35d   :  { %2409 = vmatpush1.bf16.msra.mxu0 %v3956_v10  ;;  %2440 = vmatprep.mubr.bf16.mxu0 %v2358_v6  ;;  %v3987_v6 = vld [vmem:[%s6270_s3 + $0x1c0] ss:$8 sps:$4 sm:$0xff]   ;;  %v3874_v10 = vld [vmem:[%s6273_s5 + $0x58] sm:$0xff]  }
 0x35e   :  { %2261 = vmatprep.subr.bf16.mxu1 %v6641_v12  ;;  %2410 = vmatprep.subr.bf16.mxu0 %v3957_v25  ;;  %v3988_v12 = vld [vmem:[%s6270_s3 + $0x1d4] ss:$8 sps:$4 sm:$0xff]  }
 0x360   :  { %2262 = vmatpush1.bf16.msra.mxu1 %v6642_v36 }
 0x361   :  { %2411 = vmatpush1.bf16.msra.mxu0 %v3958_v58  ;;  %2263 = vmatprep.subr.bf16.mxu1 %v6643_v28  ;;  %v3875_v58 = vld [vmem:[%s6273_s5 + $0x18] sm:$0xff]  }
 0x362   :  { %2412 = vmatprep.subr.bf16.mxu0 %v3959_v31  ;;  %v3989_v28 = vld [vmem:[%s6270_s3 + $0x1d0] ss:$8 sps:$4 sm:$0xff]   ;;  %v3876_v31 = vld [vmem:[%s6273_s5 + $0x60] sm:$0xff]  }
 0x364   :  { %2264 = vmatpush1.bf16.msra.mxu1 %v6644_v34  ;;  %v3990_v34 = vld [vmem:[%s6270_s3 + $0x1e4] ss:$8 sps:$4 sm:$0xff]  }
 0x365   :  { %2413 = vmatpush1.bf16.msra.mxu0 %v3960_v33  ;;  %2265 = vmatprep.subr.bf16.mxu1 %v6645_v53  ;;  %v3877_v33 = vld [vmem:[%s6273_s5 + $0x20] sm:$0xff]   ;;  %v5958_v53 = vpop.permute.xlu0 %2341 }
 0x366   :  { %2414 = vmatprep.subr.bf16.mxu0 %v3961_v47  ;;  %v3991_v47 = vld [vmem:[%s6270_s3 + $0x1e0] ss:$8 sps:$4 sm:$0xff]  }
 0x368   :  { %2266 = vmatpush1.bf16.msra.mxu1 %v6646_v43  ;;  %v3878_v43 = vld [vmem:[%s6273_s5 + $0x68] sm:$0xff]  }
 0x369   :  { %2415 = vmatpush1.bf16.msra.mxu0 %v3962_v0  ;;  %2267 = vmatprep.subr.bf16.mxu1 %v6647_v24  ;;  %v3992_v0 = vld [vmem:[%s6270_s3 + $0x1f4] ss:$8 sps:$4 sm:$0xff]   ;;  %v3879_v24 = vld [vmem:[%s6273_s5 + $0x28] sm:$0xff]  }
 0x36a   :  { %2416 = vmatprep.subr.bf16.mxu0 %v3963_v1  ;;  %v5972_v1 = vpop.permute.xlu0 %2348 }
 0x36c   :  { %2268 = vmatpush1.bf16.msra.mxu1 %v6648_v27  ;;  %v3993_v27 = vld [vmem:[%s6270_s3 + $0x1f0] ss:$8 sps:$4 sm:$0xff]  }
 0x36d   :  { %2417 = vmatpush1.bf16.msra.mxu0 %v3964_v39  ;;  %2269 = vmatprep.subr.bf16.mxu1 %v6649_v62  ;;  %v3994_v39 = vld [vmem:[%s6270_s3 + $0x204] ss:$8 sps:$4 sm:$0xff]   ;;  %v3880_v62 = vld [vmem:[%s6273_s5 + $0x70] sm:$0xff]  }
 0x36e   :  { %2418 = vmatprep.subr.bf16.mxu0 %v3965_v35  ;;  %v2335_v35 = vsel %vm745_vm9, %v5667_v38, %v5772_v45  ;;  %v3882_v38 = vld [vmem:[%s6273_s5 + $0x78] sm:$0xff]  }
 0x36f   :  { %v3996_v45 = vld [vmem:[%s6270_s3 + $0x214] ss:$8 sps:$4 sm:$0xff]  }
 0x370   :  { %2270 = vmatpush1.bf16.msra.mxu1 %v6593_v63  ;;  %v6650_v63 = vld [vmem:[#allocation61_spill] sm:$0xff] }
 0x371   :  { %2419 = vmatpush1.bf16.msra.mxu0 %v3966_v48  ;;  %2271 = vmatprep.subr.bf16.mxu1 %v6595_v42  ;;  %v2154_v60 = vsel %vm136_vm0, %v6650_v63, %v5726_v51  ;;  %v3969_v42 = vld [vmem:[%s6270_s3 + $0x174] ss:$8 sps:$4 sm:$0xff]   ;;  %v3868_v51 = vld [vmem:[%s6273_s5 + $0x40] sm:$0xff]   ;;  %v5986_v48 = vpop.permute.xlu1 %2346 }
 0x372   :  { %2420 = vmatprep.subr.bf16.mxu0 %v3967_v52  ;;  %v2350_v52 = vsel %vm136_vm0, %v5986_v48, %v5972_v1  ;;  %v3995_v63 = vld [vmem:[%s6270_s3 + $0x200] ss:$8 sps:$4 sm:$0xff]  }
 0x374   :  { %2272 = vmatpush1.bf16.msra.mxu1 %v6597_v37  ;;  %v5840_v37 = vld [vmem:[%s6270_s3 + $0x300] ss:$8 sps:$4 sm:$0xff]  }
 0x375   :  { %2421 = vmatpush1.bf16.msra.mxu0 %v3968_v26  ;;  %2282 = vmatprep.subr.bf16.mxu1 %v6599_v29  ;;  %v3881_v26 = vld [vmem:[%s6273_s5 + $0x30] sm:$0xff]  }
 0x376   :  { %2422 = vmatprep.subr.bf16.mxu0 %v3969_v42  ;;  %v3997_v42 = vld [vmem:[%s6270_s3 + $0x210] ss:$8 sps:$4 sm:$0xff]  }
 0x377   :  { %2274 = vmatmul.mubr.bf16.vlgmr.msra.gmra.mrb[36].mxu1 %v2154_v60  ;;  %v3883_v60 = vld [vmem:[%s6273_s5 + $0x38] sm:$0xff]  }
 0x378   :  { %2283 = vmatpush1.bf16.msra.mxu1 %v5840_v37  ;;  %2314 = vmatprep.mubr.bf16.mxu1 %v6542_v2 }
 0x379   :  { %2423 = vmatpush1.bf16.msra.mxu0 %v3971_v55  ;;  %2284 = vmatprep.subr.bf16.mxu1 %v5850_v40  ;;  %v3998_v55 = vld [vmem:[%s6270_s3 + $0x224] ss:$8 sps:$4 sm:$0xff]  }
 0x37a   :  { %2424 = vmatprep.subr.bf16.mxu0 %v3973_v19  ;;  %v3999_v19 = vld [vmem:[%s6270_s3 + $0x220] ss:$8 sps:$4 sm:$0xff]  }
 0x37c   :  { %2285 = vmatpush1.bf16.msra.mxu1 %v5859_v32 }
 0x37d   :  { %2425 = vmatpush1.bf16.msra.mxu0 %v3975_v18  ;;  %2286 = vmatprep.subr.bf16.mxu1 %v5868_v8  ;;  %v4000_v18 = vld [vmem:[%s6270_s3 + $0x234] ss:$8 sps:$4 sm:$0xff]  }
 0x37e   :  { %2426 = vmatprep.subr.bf16.mxu0 %v3977_v41  ;;  %v4001_v41 = vld [vmem:[%s6270_s3 + $0x230] ss:$8 sps:$4 sm:$0xff]  }
 0x380   :  { %2287 = vmatpush1.bf16.msra.mxu1 %v5880_v5 }
 0x381   :  { %2427 = vmatpush1.bf16.msra.mxu0 %v3979_v49  ;;  %2288 = vmatprep.subr.bf16.mxu1 %v5889_v59  ;;  %v4003_v49 = vld [vmem:[%s6270_s3 + $0x240] ss:$8 sps:$4 sm:$0xff]  }
 0x382   :  { %2428 = vmatprep.subr.bf16.mxu0 %v3981_v14  ;;  %v4004_v14 = vld [vmem:[%s6270_s3 + $0x254] ss:$8 sps:$4 sm:$0xff]  }
 0x384   :  { %2289 = vmatpush1.bf16.msra.mxu1 %v5904_v17 }
 0x385   :  { %2429 = vmatpush1.bf16.msra.mxu0 %v3983_v3  ;;  %3497 = vmatprep.subr.bf16.mxu1 %v3868_v51  ;;  %v4002_v51 = vld [vmem:[%s6270_s3 + $0x244] ss:$8 sps:$4 sm:$0xff]   ;;  %v4007_v3 = vld [vmem:[%s6270_s3 + $0x260] ss:$8 sps:$4 sm:$0xff]  }
 0x386   :  { %2430 = vmatprep.subr.bf16.mxu0 %v3984_v20  ;;  %v4008_v20 = vld [vmem:[%s6270_s3 + $0x274] ss:$8 sps:$4 sm:$0xff]  }
 0x387   :  { %3435 = vmatmul.mubr.msk.bf16.vlgmr.msra.gmra.mrb[36].mxu1 %vm623_vm7, %v5728_v9 }
 0x388   :  { %3498 = vmatpush3.bf16.msra.mxu1 %v3869_v56  ;;  %v4005_v56 = vld [vmem:[%s6270_s3 + $0x250] ss:$8 sps:$4 sm:$0xff]  }
 0x389   :  { %2431 = vmatpush1.bf16.msra.mxu0 %v3985_v22  ;;  %3499 = vmatprep.subr.bf16.mxu1 %v3870_v16  ;;  %v4006_v16 = vld [vmem:[%s6270_s3 + $0x264] ss:$8 sps:$4 sm:$0xff]   ;;  %v4011_v22 = vld [vmem:[%s6270_s3 + $0x280] ss:$8 sps:$4 sm:$0xff]  }
 0x38a   :  { %v1900_v23 = vpop.f32.mrb[32].mxu1  ;;  %2432 = vmatprep.subr.bf16.mxu0 %v3986_v30  ;;  %v4013_v30 = vld [vmem:[%s6270_s3 + $0x290] ss:$8 sps:$4 sm:$0xff]  }
 0x38b   :  { %v3600_v7 = vadd.f32 %v1900_v23, %v5683_v11  ;;  %v5928_v9 = vpop.f32.mrb[33].mxu1  ;;  %v4012_v23 = vld [vmem:[%s6270_s3 + $0x294] ss:$8 sps:$4 sm:$0xff]  }
 0x38c   :  { %v1904_v13 = vpop.f32.mrb[34].mxu1  ;;  %3500 = vmatpush3.bf16.msra.mxu1 %v3871_v21  ;;  %v4009_v21 = vld [vmem:[%s6270_s3 + $0x270] ss:$8 sps:$4 sm:$0xff]  }
 0x38d   :  { %vm1907_vm11 = vcmp.gt.f32.partialorder %v3600_v7, 0.0  ;;  %v1909_v57 = vmul.f32 0.2, %v3600_v7  ;;  %v1905_v15 = vpop.f32.mrb[35].mxu1  ;;  %2433 = vmatpush1.bf16.msra.mxu0 %v3987_v6  ;;  %3501 = vmatprep.subr.bf16.mxu1 %v3872_v61  ;;  %v4010_v61 = vld [vmem:[%s6270_s3 + $0x284] ss:$8 sps:$4 sm:$0xff]  }
 0x38e   :  { %2434 = vmatprep.subr.bf16.mxu0 %v3988_v12  ;;  %v4015_v13 = vld [vmem:[%s6270_s3 + $0x2a0] ss:$8 sps:$4 sm:$0xff]   ;;  %v4018_v15 = vld [vmem:[%s6270_s3 + $0x2c4] ss:$8 sps:$4 sm:$0xff]   ;;  %v4021_v12 = vld [vmem:[%s6270_s3 + $0x2d0] ss:$8 sps:$4 sm:$0xff]  }
 0x38f   :  { %v1911_v25 = vsel %vm1907_vm11, %v3600_v7, %v1909_v57  ;;  %v4014_v7 = vld [vmem:[%s6270_s3 + $0x2a4] ss:$8 sps:$4 sm:$0xff]   ;;  %v4017_v57 = vld [vmem:[%s6270_s3 + $0x2b0] ss:$8 sps:$4 sm:$0xff]   ;;  %v4019_v6 = vld [vmem:[%s6270_s3 + $0x2c0] ss:$8 sps:$4 sm:$0xff]  }
 0x390   :  { %v1913_v36 = vpack.c.bf16 %v1911_v25, %v1911_v25  ;;  %3502 = vmatpush3.bf16.msra.mxu1 %v3873_v50  ;;  %v4016_v50 = vld [vmem:[%s6270_s3 + $0x2b4] ss:$8 sps:$4 sm:$0xff]   ;;  %v4022_v25 = vld [vmem:[%s6270_s3 + $0x2e4] ss:$8 sps:$4 sm:$0xff]  }
 0x391   :  { %2435 = vmatpush1.bf16.msra.mxu0 %v3989_v28  ;;  %3503 = vmatprep.subr.bf16.mxu1 %v3874_v10  ;;  %v4020_v10 = vld [vmem:[%s6270_s3 + $0x2d4] ss:$8 sps:$4 sm:$0xff]   ;;  %v4025_v28 = vld [vmem:[%s6270_s3 + $0x2f0] ss:$8 sps:$4 sm:$0xff]  }
 0x392   :  { %2541 = vrot.lane.b32.xlu1 %v1913_v36, %s4030_s25  ;;  %2436 = vmatprep.subr.bf16.mxu0 %v3990_v34  ;;  %v4023_v36 = vld [vmem:[%s6270_s3 + $0x2e0] ss:$8 sps:$4 sm:$0xff]  }
 0x394   :  { %3504 = vmatpush3.bf16.msra.mxu1 %v3875_v58  ;;  %v4024_v58 = vld [vmem:[%s6270_s3 + $0x2f4] ss:$8 sps:$4 sm:$0xff]  }
 0x395   :  { %2437 = vmatpush1.bf16.msra.mxu0 %v3991_v47  ;;  %3505 = vmatprep.subr.bf16.mxu1 %v3876_v31  ;;  %v2343_v31 = vsel %vm379_vm4, %v5767_v46, %v5958_v53 }
 0x396   :  { %2438 = vmatprep.subr.bf16.mxu0 %v3992_v0  ;;  %v2362_v34 = vsel %vm136_vm0, %v2343_v31, %v5986_v48 }
 0x398   :  { %3506 = vmatpush3.bf16.msra.mxu1 %v3877_v33 }
 0x399   :  { %2439 = vmatpush1.bf16.msra.mxu0 %v3993_v27  ;;  %3507 = vmatprep.subr.bf16.mxu1 %v3878_v43  ;;  %v1701_v27 = vmul.f32 0.2, %v5698_v54 }
 0x39a   :  { %2449 = vmatprep.subr.bf16.mxu0 %v3994_v39 }
 0x39c   :  { %2441 = vmatmul.mubr.bf16.vlgmr.msra.gmra.mrb[28].mxu0 %v2335_v35  ;;  %3508 = vmatpush3.bf16.msra.mxu1 %v3879_v24 }
 0x39d   :  { %2450 = vmatpush1.bf16.msra.mxu0 %v3995_v63  ;;  %2481 = vmatprep.mubr.bf16.mxu0 %v2350_v52  ;;  %v3885_v52 = vld [vmem:[%s6273_s5 + $0x80] sm:$0xff]  }
 0x39e   :  { %2451 = vmatprep.subr.bf16.mxu0 %v3996_v45  ;;  %3509 = vmatprep.subr.bf16.mxu1 %v3880_v62  ;;  %v1703_v62 = vsel %vm1699_vm14, %v5698_v54, %v1701_v27  ;;  %v3887_v54 = vld [vmem:[%s6273_s5 + $0x88] sm:$0xff]   ;;  %v3889_v45 = vld [vmem:[%s6273_s5 + $0x90] sm:$0xff]   ;;  %v3908_v27 = vld [vmem:[%s6273_s5 + $0x160] sm:$0xff]  }
 0x3a0   :  { %3510 = vmatpush3.bf16.msra.mxu1 %v3881_v26  ;;  %v1705_v26 = vpack.c.bf16 %v1703_v62, %v1703_v62  ;;  %v3910_v62 = vld [vmem:[%s6273_s5 + $0x168] sm:$0xff]  }
 0x3a1   :  { %2452 = vmatpush1.bf16.msra.mxu0 %v3997_v42  ;;  %3511 = vmatprep.subr.bf16.mxu1 %v3882_v38  ;;  %v3886_v38 = vld [vmem:[%s6273_s5 + $0xc8] sm:$0xff]   ;;  %v3891_v42 = vld [vmem:[%s6273_s5 + $0x98] sm:$0xff]  }
 0x3a2   :  { %2453 = vmatprep.subr.bf16.mxu0 %v3998_v55  ;;  %v3892_v55 = vld [vmem:[%s6273_s5 + $0xe0] sm:$0xff]  }
 0x3a4   :  { %3512 = vmatpush3.bf16.msra.mxu1 %v3883_v60  ;;  %v3890_v60 = vld [vmem:[%s6273_s5 + $0xd8] sm:$0xff]  }
 0x3a5   :  { %2454 = vmatpush1.bf16.msra.mxu0 %v3999_v19  ;;  %v3893_v19 = vld [vmem:[%s6273_s5 + $0xa0] sm:$0xff]  }
 0x3a6   :  { %2455 = vmatprep.subr.bf16.mxu0 %v4000_v18  ;;  %v3894_v18 = vld [vmem:[%s6273_s5 + $0xe8] sm:$0xff]  }
 0x3a9   :  { %2456 = vmatpush1.bf16.msra.mxu0 %v4001_v41  ;;  %v3895_v41 = vld [vmem:[%s6273_s5 + $0xa8] sm:$0xff]  }
 0x3aa   :  { %2457 = vmatprep.subr.bf16.mxu0 %v4002_v51  ;;  %v3896_v51 = vld [vmem:[%s6273_s5 + $0xf0] sm:$0xff]  }
 0x3ad   :  { %2458 = vmatpush1.bf16.msra.mxu0 %v4003_v49  ;;  %v3897_v49 = vld [vmem:[%s6273_s5 + $0xb0] sm:$0xff]  }
 0x3ae   :  { %2459 = vmatprep.subr.bf16.mxu0 %v4004_v14  ;;  %v3898_v14 = vld [vmem:[%s6273_s5 + $0xf8] sm:$0xff]  }
 0x3b1   :  { %2460 = vmatpush1.bf16.msra.mxu0 %v4005_v56  ;;  %v3899_v56 = vld [vmem:[%s6273_s5 + $0xb8] sm:$0xff]  }
 0x3b2   :  { %2461 = vmatprep.subr.bf16.mxu0 %v4006_v16  ;;  %v3900_v16 = vld [vmem:[%s6273_s5 + $0x140] sm:$0xff]  }
 0x3b5   :  { %2462 = vmatpush1.bf16.msra.mxu0 %v4007_v3 }
 0x3b6   :  { %2463 = vmatprep.subr.bf16.mxu0 %v4008_v20 }
 0x3b9   :  { %2464 = vmatpush1.bf16.msra.mxu0 %v4009_v21 }
 0x3ba   :  { %2465 = vmatprep.subr.bf16.mxu0 %v4010_v61 }
 0x3bd   :  { %2466 = vmatpush1.bf16.msra.mxu0 %v4011_v22 }
 0x3be   :  { %2467 = vmatprep.subr.bf16.mxu0 %v4012_v23 }
 0x3c1   :  { %2468 = vmatpush1.bf16.msra.mxu0 %v4013_v30 }
 0x3c2   :  { %2469 = vmatprep.subr.bf16.mxu0 %v4014_v7 }
 0x3c5   :  { %2470 = vmatpush1.bf16.msra.mxu0 %v4015_v13 }
 0x3c6   :  { %2471 = vmatprep.subr.bf16.mxu0 %v4016_v50 }
 0x3c9   :  { %2472 = vmatpush1.bf16.msra.mxu0 %v4017_v57 }
 0x3ca   :  { %2473 = vmatprep.subr.bf16.mxu0 %v4018_v15 }
 0x3cd   :  { %2474 = vmatpush1.bf16.msra.mxu0 %v4019_v6 }
 0x3ce   :  { %2475 = vmatprep.subr.bf16.mxu0 %v4020_v10 }
 0x3d1   :  { %2476 = vmatpush1.bf16.msra.mxu0 %v4021_v12 }
 0x3d2   :  { %2477 = vmatprep.subr.bf16.mxu0 %v4022_v25 }
 0x3d5   :  { %2478 = vmatpush1.bf16.msra.mxu0 %v4023_v36 }
 0x3d6   :  { %2479 = vmatprep.subr.bf16.mxu0 %v4024_v58 }
 0x3d9   :  { %2480 = vmatpush1.bf16.msra.mxu0 %v4025_v28 }
 0x3da   :  { %2490 = vmatprep.subr.bf16.mxu0 %v6599_v29  ;;  %v3601_v29 = vadd.f32 %v5928_v9, %v5688_v44 }
 0x3dc   :  { %2482 = vmatmul.mubr.bf16.vlgmr.msra.gmra.mrb[28].mxu0 %v2362_v34  ;;  %vm1908_vm9 = vcmp.gt.f32.partialorder %v3601_v29, 0.0 }
 0x3dd   :  { %2491 = vmatpush1.bf16.msra.mxu0 %v5840_v37  ;;  %2522 = vmatprep.mubr.bf16.mxu0 %v6542_v2  ;;  %v3884_v2 = vld [vmem:[%s6273_s5 + $0xc0] sm:$0xff]  }
 0x3de   :  { %2492 = vmatprep.subr.bf16.mxu0 %v5850_v40  ;;  %3519 = vmatprep.subr.bf16.mxu1 %v3884_v2 }
 0x3e1   :  { %2493 = vmatpush1.bf16.msra.mxu0 %v5859_v32 }
 0x3e2   :  { %2494 = vmatprep.subr.bf16.mxu0 %v5868_v8 }
 0x3e5   :  { %2495 = vmatpush1.bf16.msra.mxu0 %v5880_v5  ;;  %v1910_v5 = vmul.f32 0.2, %v3601_v29 }
 0x3e6   :  { %2496 = vmatprep.subr.bf16.mxu0 %v5889_v59 }
 0x3e7   :  { %v1912_v0 = vsel %vm1908_vm9, %v3601_v29, %v1910_v5 }
 0x3e8   :  { %v1914_v24 = vpack.c.bf16 %v1912_v0, %v1912_v0 }
 0x3e9   :  { %2497 = vmatpush1.bf16.msra.mxu0 %v5904_v17 }
 0x3ec   :  { %3436 = vmatmul.mubr.msk.bf16.vlgmr.msra.gmra.mrb[28].mxu0 %vm623_vm7, %v5972_v1  ;;  %v1702_v1 = vmul.f32 0.2, %v5702_v4 }
 0x3ee   :  { %v1704_v39 = vsel %vm1700_vm13, %v5702_v4, %v1702_v1  ;;  %v3888_v4 = vld [vmem:[%s6273_s5 + $0xd0] sm:$0xff]   ;;  %v3907_v1 = vld [vmem:[%s6273_s5 + $0x118] sm:$0xff]  }
 0x3ef   :  { %v2108_v46 = vpop.f32.mrb[24].mxu0  ;;  %v1706_v35 = vpack.c.bf16 %v1704_v39, %v1704_v39  ;;  %v3909_v39 = vld [vmem:[%s6273_s5 + $0x120] sm:$0xff]  }
 0x3f0   :  { %v3602_v37 = vadd.f32 %v2108_v46, %v5683_v11  ;;  %v2110_v40 = vpop.f32.mrb[25].mxu0 }
 0x3f1   :  { %v3603_v32 = vadd.f32 %v2110_v40, %v5688_v44  ;;  %v2112_v8 = vpop.f32.mrb[26].mxu0  ;;  %v3901_v40 = vld [vmem:[%s6273_s5 + $0x100] sm:$0xff]  }
 0x3f2   :  { %vm2115_vm0 = vcmp.gt.f32.partialorder %v3602_v37, 0.0  ;;  %v2117_v59 = vmul.f32 0.2, %v3602_v37  ;;  %v2113_v17 = vpop.f32.mrb[27].mxu0 }
 0x3f3   :  { %vm2116_vm12 = vcmp.gt.f32.partialorder %v3603_v32, 0.0  ;;  %v2118_v33 = vmul.f32 0.2, %v3603_v32  ;;  %v3904_v17 = vld [vmem:[%s6273_s5 + $0x150] sm:$0xff]  }
 0x3f4   :  { %v2119_v9 = vsel %vm2115_vm0, %v3602_v37, %v2117_v59  ;;  %v3903_v59 = vld [vmem:[%s6273_s5 + $0x108] sm:$0xff]  }
 0x3f5   :  { %v2121_v53 = vpack.c.bf16 %v2119_v9, %v2119_v9  ;;  %v2120_v47 = vsel %vm2116_vm12, %v3603_v32, %v2118_v33 }
 0x3f6   :  { %v2122_v43 = vpack.c.bf16 %v2120_v47, %v2120_v47 }
 0x3f7   :  { %2548 = vrot.lane.b32.xlu0 %v2121_v53, %s4032_s18 }
 0x3f8   :  { %2550 = vrot.lane.b32.xlu1 %v2122_v43, %s4032_s18  ;;  %v3905_v43 = vld [vmem:[%s6273_s5 + $0x110] sm:$0xff]  }
 0x3fb   :  { %2543 = vrot.lane.b32.xlu0 %v1914_v24, %s4030_s25  ;;  %v3906_v24 = vld [vmem:[%s6273_s5 + $0x158] sm:$0xff]  }
 0x404   :  { %v6125_v48 = vpop.permute.xlu1 %2541 }
 0x405   :  { %v2564_v63 = vsel %vm379_vm4, %v1706_v35, %v6125_v48  ;;  %v3911_v35 = vld [vmem:[%s6273_s5 + $0x128] sm:$0xff]  }
 0x406   :  { %3017 = vmatprep.mubr.bf16.mxu1 %v2564_v63  ;;  %v3915_v63 = vld [vmem:[%s6273_s5 + $0x138] sm:$0xff]  }
 0x407   :  { %3018 = vmatmul.mubr.bf16.vlgmr.msra.gmra.mrb[40].mxu1 %v1705_v26  ;;  %v3914_v26 = vld [vmem:[%s6273_s5 + $0x178] sm:$0xff]  }
 0x408   :  { %3520 = vmatpush3.bf16.msra.mxu1 %v3885_v52  ;;  %v3913_v52 = vld [vmem:[%s6273_s5 + $0x130] sm:$0xff]  }
 0x409   :  { %3521 = vmatprep.subr.bf16.mxu1 %v3886_v38 }
 0x40c   :  { %3522 = vmatpush3.bf16.msra.mxu1 %v3887_v54 }
 0x40d   :  { %3523 = vmatprep.subr.bf16.mxu1 %v3888_v4  ;;  %v3916_v4 = vld [vmem:[%s6273_s5 + $0x180] sm:$0xff]  }
 0x410   :  { %3524 = vmatpush3.bf16.msra.mxu1 %v3889_v45  ;;  %v4040_v45 = vmov 0.0  }
 0x411   :  { %3525 = vmatprep.subr.bf16.mxu1 %v3890_v60 }
 0x414   :  { %3526 = vmatpush3.bf16.msra.mxu1 %v3891_v42 }
 0x415   :  { %3527 = vmatprep.subr.bf16.mxu1 %v3892_v55  ;;  %v3917_v55 = vld [vmem:[%s6273_s5 + $0x188] sm:$0xff]  }
 0x418   :  { %3528 = vmatpush3.bf16.msra.mxu1 %v3893_v19 }
 0x419   :  { %3529 = vmatprep.subr.bf16.mxu1 %v3894_v18  ;;  %v3918_v18 = vld [vmem:[%s6274_s7] sm:$0xff]  }
 0x41c   :  { %3530 = vmatpush3.bf16.msra.mxu1 %v3895_v41  ;;  %v3919_v41 = vld [vmem:[%s6274_s7 + $0x8] sm:$0xff]  }
 0x41d   :  { %3531 = vmatprep.subr.bf16.mxu1 %v3896_v51  ;;  %v3437_v51 = vld [vmem:[%s6275_s6] ss:$0 sm:$0xff] }
 0x420   :  { %3532 = vmatpush3.bf16.msra.mxu1 %v3897_v49 }
 0x421   :  { %3533 = vmatprep.subr.bf16.mxu1 %v3898_v14 }
 0x424   :  { %3534 = vmatpush3.bf16.msra.mxu1 %v3899_v56 }
 0x425   :  { %3541 = vmatprep.subr.bf16.mxu1 %v3900_v16 }
 0x45a   :  { %v2316_v3 = vpop.f32.mrb[36].mxu1 }
 0x45b   :  { %v3604_v20 = vadd.f32 %v2316_v3, %v5683_v11  ;;  %v2318_v21 = vpop.f32.mrb[37].mxu1 }
 0x45c   :  { %v3605_v61 = vadd.f32 %v2318_v21, %v5688_v44  ;;  %v2320_v22 = vpop.f32.mrb[38].mxu1 }
 0x45d   :  { %vm2323_vm15 = vcmp.gt.f32.partialorder %v3604_v20, 0.0  ;;  %v2325_v23 = vmul.f32 0.2, %v3604_v20  ;;  %v2321_v30 = vpop.f32.mrb[39].mxu1 }
 0x45e   :  { %vm2324_vm1 = vcmp.gt.f32.partialorder %v3605_v61, 0.0  ;;  %v2326_v7 = vmul.f32 0.2, %v3605_v61 }
 0x45f   :  { %v2327_v13 = vsel %vm2323_vm15, %v3604_v20, %v2325_v23 }
 0x460   :  { %v2329_v50 = vpack.c.bf16 %v2327_v13, %v2327_v13  ;;  %v2328_v57 = vsel %vm2324_vm1, %v3605_v61, %v2326_v7 }
 0x461   :  { %v2330_v15 = vpack.c.bf16 %v2328_v57, %v2328_v57 }
 0x462   :  { %2555 = vrot.lane.b32.xlu1 %v2329_v50, %s4039_s26 }
 0x463   :  { %2557 = vrot.lane.b32.xlu0 %v2330_v15, %s4039_s26 }
 0x469   :  { %v2549_v36 = vpop.permute.xlu0 %2548 }
 0x46a   :  { %v2551_v31 = vpop.permute.xlu1 %2550 }
 0x46b   :  { %v2552_v46 = vsel %vm623_vm7, %v2549_v36, %v2551_v31  ;;  %v3489_v31 = vld [vmem:[%s6277_s8] ss:$0 sm:$0xff] }
 0x46d   :  { %v2544_v34 = vpop.permute.xlu0 %2543 }
 0x46e   :  { %v2545_v29 = vsel %vm379_vm4, %v6125_v48, %v2544_v34  ;;  %v3912_v48 = vld [vmem:[%s6273_s5 + $0x170] sm:$0xff]  }
 0x46f   :  { %v2568_v8 = vsel %vm623_vm7, %v2545_v29, %v2549_v36 }
 0x4bf   :  { %v2524_v6 = vpop.f32.mrb[28].mxu0 }
 0x4c0   :  { %v2526_v10 = vpop.f32.mrb[29].mxu0  ;;  %v3606_v58 = vadd.f32 %v2524_v6, %v5683_v11  ;;  %v3902_v11 = vld [vmem:[%s6273_s5 + $0x148] sm:$0xff]  }
 0x4c1   :  { %v2528_v12 = vpop.f32.mrb[30].mxu0  ;;  %v3607_v38 = vadd.f32 %v2526_v10, %v5688_v44 }
 0x4c2   :  { %v2529_v25 = vpop.f32.mrb[31].mxu0  ;;  %v2533_v28 = vmul.f32 0.2, %v3606_v58  ;;  %vm2531_vm2 = vcmp.gt.f32.partialorder %v3606_v58, 0.0 }
 0x4c3   :  { %v2534_v60 = vmul.f32 0.2, %v3607_v38  ;;  %vm2532_vm7 = vcmp.gt.f32.partialorder %v3607_v38, 0.0 }
 0x4c4   :  { %v2535_v2 = vsel %vm2531_vm2, %v3606_v58, %v2533_v28  ;;  %v3920_v58 = vld [vmem:[%s6276_s9] sm:$0xff]   ;;  %v3921_v28 = vld [vmem:[%s6276_s9 + $0x8] sm:$0xff]  }
 0x4c5   :  { %v2537_v5 = vpack.c.bf16 %v2535_v2, %v2535_v2  ;;  %v2536_v44 = vsel %vm2532_vm7, %v3607_v38, %v2534_v60 }
 0x4c6   :  { %v2538_v19 = vpack.c.bf16 %v2536_v44, %v2536_v44 }
 0x4d4   :  { %v2556_v37 = vpop.permute.xlu1 %2555 }
 0x4d5   :  { %v2573_v32 = vsel %vm2559_vm3, %v2552_v46, %v2556_v37  ;;  %v2558_v54 = vpop.permute.xlu0 %2557 }
 0x4d6   :  { %3057 = vmatprep.mubr.bf16.mxu1 %v2573_v32  ;;  %v2560_v42 = vsel %vm2559_vm3, %v2556_v37, %v2558_v54 }
 0x4d7   :  { %3058 = vmatmul.mubr.bf16.vlgmr.msra.gmra.mrb[44].mxu1 %v2568_v8  ;;  %v3493_v8 = vld [vmem:[%s6278_s10] ss:$0 sm:$0xff] }
 0x4d8   :  { %3542 = vmatpush3.bf16.msra.mxu1 %v3901_v40  ;;  %3097 = vmatprep.mubr.bf16.mxu1 %v2537_v5 }
 0x4d9   :  { %3543 = vmatprep.subr.bf16.mxu1 %v3902_v11 }
 0x4da   :  { %v3513_v33 = vpop.f32.mrb[40].mxu1 }
 0x4db   :  { %v3514_v9 = vpop.f32.mrb[41].mxu1 }
 0x4dc   :  { %v3515_v53 = vadd.f32 %v3514_v9, %v3513_v33  ;;  %3544 = vmatpush3.bf16.msra.mxu1 %v3903_v59  ;;  %v3516_v47 = vpop.f32.mrb[42].mxu1 }
 0x4dd   :  { %v3517_v0 = vpop.f32.mrb[43].mxu1  ;;  %3545 = vmatprep.subr.bf16.mxu1 %v3904_v17 }
 0x4de   :  { %v3020_v56 = vadd.f32 %v3515_v53, %v3437_v51 }
 0x4e0   :  { %3546 = vmatpush3.bf16.msra.mxu1 %v3905_v43 }
 0x4e1   :  { %3547 = vmatprep.subr.bf16.mxu1 %v3906_v24 }
 0x4e4   :  { %3548 = vmatpush3.bf16.msra.mxu1 %v3907_v1 }
 0x4e5   :  { %3549 = vmatprep.subr.bf16.mxu1 %v3908_v27 }
 0x4e8   :  { %3550 = vmatpush3.bf16.msra.mxu1 %v3909_v39 }
 0x4e9   :  { %3551 = vmatprep.subr.bf16.mxu1 %v3910_v62 }
 0x4ec   :  { %3552 = vmatpush3.bf16.msra.mxu1 %v3911_v35 }
 0x4ed   :  { %3553 = vmatprep.subr.bf16.mxu1 %v3912_v48 }
 0x4f0   :  { %3554 = vmatpush3.bf16.msra.mxu1 %v3913_v52 }
 0x4f1   :  { %3555 = vmatprep.subr.bf16.mxu1 %v3914_v26 }
 0x4f4   :  { %3556 = vmatpush3.bf16.msra.mxu1 %v3915_v63 }
 0x4f5   :  { %3572 = vmatprep.subr.bf16.mxu1 %v4040_v45 }
 0x4f7   :  { %3098 = vmatmul.mubr.bf16.vlgmr.msra.gmra.mrb[48].mxu1 %v2560_v42 }
 0x4f8   :  { %3573 = vmatpush3.bf16.msra.mxu1 %v3916_v4  ;;  %3576 = vmatprep.mubr.msk.bf16.mxu1 %vm4041_vm5, %v4040_v45 }
 0x4f9   :  { %3574 = vmatprep.subr.bf16.mxu1 %v4040_v45 }
 0x4fc   :  { %3575 = vmatpush3.bf16.msra.mxu1 %v3917_v55 }
 0x4fd   :  { %3580 = vmatprep.subr.bf16.mxu1 %v4040_v45 }
 0x4ff   :  { %3577 = vmatmul.mubr.msk.bf16.vlgmr.msra.gmra.mrb[52].mxu1 %vm379_vm4, %v2538_v19 }
 0x500   :  { %3584 = vmatprep.mubr.msk.bf16.mxu1 %vm4041_vm5, %v4040_v45  ;;  %3581 = vmatpush3.bf16.msra.mxu1 %v3918_v18 }
 0x501   :  { %3582 = vmatprep.subr.bf16.mxu1 %v4040_v45 }
 0x504   :  { %3583 = vmatpush3.bf16.msra.mxu1 %v3919_v41 }
 0x505   :  { %3588 = vmatprep.subr.bf16.mxu1 %v4040_v45 }
 0x5aa   :  { %v3535_v49 = vpop.f32.mrb[44].mxu1 }
 0x5ab   :  { %v3536_v14 = vpop.f32.mrb[45].mxu1 }
 0x5ac   :  { %v3537_v16 = vadd.f32 %v3536_v14, %v3535_v49  ;;  %v3538_v3 = vpop.f32.mrb[46].mxu1 }
 0x5ad   :  { %v3539_v20 = vpop.f32.mrb[47].mxu1 }
 0x5ae   :  { %v3060_v21 = vadd.f32 %v3537_v16, %v3020_v56 }
 0x5ca   :  { %v3557_v61 = vpop.f32.mrb[48].mxu1 }
 0x5cb   :  { %v3558_v22 = vpop.f32.mrb[49].mxu1 }
 0x5cc   :  { %v3559_v23 = vadd.f32 %v3558_v22, %v3557_v61  ;;  %v3560_v30 = vpop.f32.mrb[50].mxu1 }
 0x5cd   :  { %v3561_v7 = vpop.f32.mrb[51].mxu1 }
 0x5ce   :  { %v3100_v13 = vadd.f32 %v3559_v23, %v3060_v21 }
 0x5d2   :  { %v3139_v50 = vpop.f32.mrb[52].mxu1 }
 0x5d3   :  { %v3140_v57 = vadd.f32 %v3139_v50, %v3100_v13  ;;  %v3578_v15 = vpop.f32.mrb[53].mxu1 }
 0x5d4   :  { %v3142_v6 = vpop.f32.mrb[54].mxu1 }
 0x5d5   :  { %vm3145_vm6 = vcmp.gt.f32.partialorder %v3140_v57, 0.0  ;;  %v3146_v10 = vmul.f32 0.2, %v3140_v57  ;;  %v3579_v12 = vpop.f32.mrb[55].mxu1 }
 0x5d7   :  { %v3147_v25 = vsel %vm3145_vm6, %v3140_v57, %v3146_v10 }
 0x5d8   :  { %v3148_v36 = vpack.c.bf16 %v3147_v25, %v3147_v25 }
 0x5da   :  { %3585 = vmatmul.mubr.msk.bf16.vlgmr.msra.gmra.mrb[56].mxu1 %vm379_vm4, %v3148_v36 }
 0x5db   :  { %3592 = vmatprep.mubr.msk.bf16.mxu1 %vm4041_vm5, %v4040_v45  ;;  %3589 = vmatpush3.bf16.msra.mxu1 %v3920_v58 }
 0x5dc   :  { %3590 = vmatprep.subr.bf16.mxu1 %v4040_v45 }
 0x5df   :  { %3591 = vmatpush3.bf16.msra.mxu1 %v3921_v28 }
 0x6ad   :  { %v3209_v34 = vpop.f32.mrb[56].mxu1 }
 0x6ae   :  { %v3210_v29 = vadd.f32 %v3489_v31, %v3209_v34  ;;  %v3586_v2 = vpop.f32.mrb[57].mxu1 }
 0x6af   :  { %v3212_v46 = vpop.f32.mrb[58].mxu1 }
 0x6b0   :  { %vm3215_vm8 = vcmp.gt.f32.partialorder %v3210_v29, 0.0  ;;  %v3216_v37 = vmul.f32 0.2, %v3210_v29  ;;  %v3587_v40 = vpop.f32.mrb[59].mxu1 }
 0x6b2   :  { %v3217_v32 = vsel %vm3215_vm8, %v3210_v29, %v3216_v37 }
 0x6b3   :  { %v3218_v11 = vpack.c.bf16 %v3217_v32, %v3217_v32 }
 0x6b5   :  { %3593 = vmatmul.mubr.msk.bf16.vlgmr.msra.gmra.mrb[60].mxu1 %vm379_vm4, %v3218_v11 }
 0x788   :  { %v3279_v5 = vpop.f32.mrb[60].mxu1 }
 0x789   :  { %v3280_v59 = vadd.f32 %v3493_v8, %v3279_v5  ;;  %v3594_v17 = vpop.f32.mrb[61].mxu1 }
 0x78a   :  { %v3282_v33 = vpop.f32.mrb[62].mxu1 }
 0x78b   :  { %3286 = vst.msk [vmem:[%s6279_s11] sm:$0xff] %vm3285_vm10, %v3280_v59  ;;  %v3595_v9 = vpop.f32.mrb[63].mxu1 }

</bundles_post_ra>
